<compile_context>
chip_gen: v7x
topology: tpu7x:2x2x1
jax: 0.10.0
libtpu: 0.0.40
codegen_flags: <defaults>
</compile_context>

<pallas_src>
import jax
import jax.numpy as jnp
from jax.experimental import pallas as pl
from jax.experimental.pallas import tpu as pltpu

EPS = 1e-5                     # nn.BatchNorm2d default eps
LANE = 128
GUARD = 128                    # left halo columns (multiple of 128, >= W + 3)
VMEM_LIMIT_BYTES = 48 * 1024 * 1024


def _vmem_spec():
    return pl.BlockSpec(memory_space=pltpu.MemorySpace.VMEM)


def _round_up(v, m):
    return (v + m - 1) // m * m


def _geom(n, h, w):
    """Flat padded-grid length and lane-padded slab width for an (n,h,w) map."""
    assert w + 3 <= GUARD, "spatial width too large for the fixed halo"
    mp = n * (h + 2) * (w + 2)
    mtot = _round_up(GUARD + mp + (w + 3), LANE)
    return mp, mtot


# ----------------------------------------------------------------------------
# Wrapper-side layout helpers (plain XLA, run once per resolution)
# ----------------------------------------------------------------------------
def _nhwc_to_slab(x):
    """(N,H,W,C) f32 -> (C, Mtot) bf16 slab: zero-padded spatially, flattened,
    GUARD zero columns on the left, lane-padded to a multiple of 128."""
    n, h, w, c = x.shape
    mp, mtot = _geom(n, h, w)
    xp = jnp.pad(x, ((0, 0), (1, 1), (1, 1), (0, 0)))
    flat = jnp.transpose(xp, (3, 0, 1, 2)).reshape(c, mp).astype(jnp.bfloat16)
    slab = jnp.zeros((c, mtot), jnp.bfloat16)
    return slab.at[:, GUARD:GUARD + mp].set(flat)


def _valid_mask(n, h, w):
    """(1, Mp) f32 mask: 1 at real pixels, 0 on the zero-padding ring."""
    m = jnp.pad(jnp.ones((n, h, w), jnp.float32), ((0, 0), (1, 1), (1, 1)))
    return m.reshape(1, n * (h + 2) * (w + 2))


def _pool_matrix(n, h, w):
    """(Mp, N) f32: column n averages image n's (already masked) activations."""
    mp_img = (h + 2) * (w + 2)
    p = jnp.repeat(jnp.eye(n, dtype=jnp.float32), mp_img, axis=0)
    return p / float(h * w)


def _slab_to_phases(slab, n, h, w, c):
    """Split a full-resolution slab into its 4 even/odd (row,col) phases at half
    resolution, each re-padded and re-flattened like a normal slab.  This is
    the only inter-kernel XLA reshuffle and only runs at the two downsampling
    transitions (same total bytes as the activation itself)."""
    mp, _ = _geom(n, h, w)
    hh, wh = h // 2, w // 2
    mph, mtot_h = _geom(n, hh, wh)
    core = slab[:, GUARD:GUARD + mp].reshape(c, n, h + 2, w + 2)[:, :, 1:h + 1, 1:w + 1]
    phases = []
    for py in range(2):
        for px in range(2):
            p = core[:, :, py::2, px::2]
            p = jnp.pad(p, ((0, 0), (0, 0), (1, 1), (1, 1))).reshape(c, mph)
            full = jnp.zeros((c, mtot_h), slab.dtype)
            phases.append(full.at[:, GUARD:GUARD + mph].set(p))
    return jnp.stack(phases, axis=0)                      # (4, C, Mtot_half)


# ----------------------------------------------------------------------------
# In-kernel helper: conv (as shifted bf16 matmuls) + BatchNorm (+ ReLU)
# ----------------------------------------------------------------------------
def _conv_bn_flat(taps, w_ref, g_ref, b_ref, mask, mp, inv_count, relu):
    """taps: list of (src_f32, lane_offset); output column m reads
    src[:, GUARD + m + lane_offset].  Returns masked f32 (Cout, mp)."""
    acc = None
    for i, (src, off) in enumerate(taps):
        lo = GUARD + off
        tap = src[:, lo:lo + mp].astype(jnp.bfloat16)      # (Cin, mp) bf16
        y = jnp.dot(w_ref[i], tap, preferred_element_type=jnp.float32)
        acc = y if acc is None else acc + y                # (Cout, mp) f32
    # BatchNorm: training-mode batch statistics (biased variance) over the
    # valid N*H*W positions only (pads excluded via the mask).
    s1 = jnp.sum(acc * mask, axis=1, keepdims=True)
    s2 = jnp.sum(acc * acc * mask, axis=1, keepdims=True)
    mean = s1 * inv_count
    var = jnp.maximum(s2 * inv_count - mean * mean, 0.0)
    y = (acc - mean) * jax.lax.rsqrt(var + EPS) * g_ref[...] + b_ref[...]
    if relu:
        y = jnp.maximum(y, 0.0)
    return y * mask


# ----------------------------------------------------------------------------
# Fused kernels: stem / residual block / residual block + avgpool + fc head
# ----------------------------------------------------------------------------
def _make_block_kernel(*, stem, downsample, fuse_head, wout, mp, inv_count):
    wp = wout + 2
    # stride-1 3x3 tap offsets on the (flattened, padded) output grid
    offs3 = [(dy - 1) * wp + (dx - 1) for dy in range(3) for dx in range(3)]
    # stride-2 3x3 taps: (phase index, offset on the half-res padded grid)
    ph_taps = []
    if downsample:
        for dy in range(3):
            py, ry = ((0, 0) if dy == 1 else (1, -1 if dy == 0 else 0))
            for dx in range(3):
                px, rx = ((0, 0) if dx == 1 else (1, -1 if dx == 0 else 0))
                ph_taps.append((2 * py + px, ry * wp + rx))

    def kernel(*refs):
        refs = list(refs)
        x_ref = refs.pop(0)
        w1_ref, g1_ref, b1_ref = refs.pop(0), refs.pop(0), refs.pop(0)
        if not stem:
            w2_ref, g2_ref, b2_ref = refs.pop(0), refs.pop(0), refs.pop(0)
            if downsample:
                ws_ref, gs_ref, bs_ref = refs.pop(0), refs.pop(0), refs.pop(0)
        mask_ref = refs.pop(0)
        if fuse_head:
            pool_ref, fcw_ref, fcb_ref = refs.pop(0), refs.pop(0), refs.pop(0)
        o_ref = refs.pop(0)
        h_scr = refs.pop(0) if not stem else None

        mask = mask_ref[...]                               # (1, mp) f32

        # ---- conv1 + BN1 + ReLU ----
        if downsample:
            phases = [x_ref[k].astype(jnp.float32) for k in range(4)]
            taps1 = [(phases[p], off) for (p, off) in ph_taps]
        else:
            x_full = x_ref[...].astype(jnp.float32)        # (Cin, mtot)
            taps1 = [(x_full, off) for off in offs3]
        h = _conv_bn_flat(taps1, w1_ref, g1_ref, b1_ref, mask, mp, inv_count,
                          relu=True)                       # (Cout, mp) f32

        if stem:
            out = h
        else:
            # ---- conv2 + BN2 (h re-hosted in a zero-haloed VMEM scratch so the
            # 3x3 taps are plain shifted slices; intermediate never hits HBM) --
            h_scr[...] = jnp.zeros(h_scr.shape, h_scr.dtype)
            h_scr[:, GUARD:GUARD + mp] = h
            h_full = h_scr[...]
            taps2 = [(h_full, off) for off in offs3]
            y2 = _conv_bn_flat(taps2, w2_ref, g2_ref, b2_ref, mask, mp,
                               inv_count, relu=False)
            # ---- shortcut ----
            if downsample:
                sc = _conv_bn_flat([(phases[0], 0)], ws_ref, gs_ref, bs_ref,
                                   mask, mp, inv_count, relu=False)
            else:
                sc = x_full[:, GUARD:GUARD + mp]           # identity residual
            out = jnp.maximum(y2 + sc, 0.0) * mask

        if fuse_head:
            # fused global average pool + fully-connected head
            pooled = jnp.dot(out, pool_ref[...],
                             preferred_element_type=jnp.float32)      # (C, N)
            o_ref[...] = (jnp.dot(fcw_ref[...], pooled,
                                  preferred_element_type=jnp.float32)
                          + fcb_ref[...])                             # (out, N)
        else:
            # lane-dense (C, Mtot) bf16 slab: zero guards/pads then real data
            o_ref[...] = jnp.zeros(o_ref.shape, o_ref.dtype)
            o_ref[:, GUARD:GUARD + mp] = out.astype(o_ref.dtype)

    return kernel


def _run_layer(inputs, out_shape, *, scratch=None, **cfg):
    kernel = _make_block_kernel(**cfg)
    return pl.pallas_call(
        kernel,
        out_shape=out_shape,
        in_specs=[_vmem_spec() for _ in inputs],
        out_specs=_vmem_spec(),
        scratch_shapes=tuple(scratch) if scratch else (),
        compiler_params=pltpu.CompilerParams(vmem_limit_bytes=VMEM_LIMIT_BYTES),
    )(*inputs)


# ----------------------------------------------------------------------------
# Parameters (deterministic init, shapes follow ResNetCIFAR.__init__)
# ----------------------------------------------------------------------------
def init_params(key, plan, outputs=10):
    keys = list(jax.random.split(key, 256))
    idx = [0]

    def nk():
        k = keys[idx[0]]
        idx[0] += 1
        return k

    def conv_w(cout, cin, k):
        fan_in = cin * k * k
        return jax.random.normal(nk(), (cout, cin, k, k), jnp.float32) * (2.0 / fan_in) ** 0.5

    def bn(c):
        g = 1.0 + 0.1 * jax.random.normal(nk(), (c,), jnp.float32)
        b = 0.1 * jax.random.normal(nk(), (c,), jnp.float32)
        return g, b

    params = {}
    cur = plan[0][0]
    params["conv_w"] = conv_w(cur, 3, 3)
    params["bn_g"], params["bn_b"] = bn(cur)

    blocks = []
    for seg_idx, (filters, num_blocks) in enumerate(plan):
        for blk_idx in range(num_blocks):
            downsample = seg_idx > 0 and blk_idx == 0
            blk = {"downsample": downsample,
                   "w1": conv_w(filters, cur, 3),
                   "w2": conv_w(filters, filters, 3)}
            blk["g1"], blk["b1"] = bn(filters)
            blk["g2"], blk["b2"] = bn(filters)
            if downsample or cur != filters:
                blk["shortcut"] = {"w": conv_w(filters, cur, 1)}
                blk["shortcut"]["g"], blk["shortcut"]["b"] = bn(filters)
            else:
                blk["shortcut"] = None
            blocks.append(blk)
            cur = filters
    params["blocks"] = blocks

    c_last = plan[-1][0]
    limit = 1.0 / (c_last ** 0.5)
    params["fc_w"] = jax.random.uniform(nk(), (c_last, outputs), jnp.float32, -limit, limit)
    params["fc_b"] = jax.random.uniform(nk(), (outputs,), jnp.float32, -limit, limit)
    return params


def pack_params(params):
    """One-time pre-pack (hoisted out of the forward pass): conv weights ->
    (k*k, Cout, Cin) bf16 tap matrices, BN gamma/beta -> (C,1) f32 columns,
    fc -> (outputs, C) f32 + (outputs, 1) f32."""
    def pack_conv(w):
        co, ci, kh, kw = w.shape
        return jnp.transpose(w, (2, 3, 0, 1)).reshape(kh * kw, co, ci).astype(jnp.bfloat16)

    def col(v):
        return v.reshape(-1, 1).astype(jnp.float32)

    packed = {"stem": {"w": pack_conv(params["conv_w"]),
                       "g": col(params["bn_g"]),
                       "b": col(params["bn_b"])},
              "blocks": []}
    for blk in params["blocks"]:
        downsample = blk["downsample"]
        # The reference module's projection shortcut is always stride 2, so a
        # projection is only shape-consistent on a downsampling block.
        assert (blk["shortcut"] is not None) == downsample
        p = {"downsample": downsample,
             "w1": pack_conv(blk["w1"]), "g1": col(blk["g1"]), "b1": col(blk["b1"]),
             "w2": pack_conv(blk["w2"]), "g2": col(blk["g2"]), "b2": col(blk["b2"])}
        if downsample:
            p["ws"] = pack_conv(blk["shortcut"]["w"])
            p["gs"] = col(blk["shortcut"]["g"])
            p["bs"] = col(blk["shortcut"]["b"])
        packed["blocks"].append(p)
    packed["fc_wT"] = jnp.transpose(params["fc_w"], (1, 0)).astype(jnp.float32)
    packed["fc_b"] = params["fc_b"].reshape(-1, 1).astype(jnp.float32)
    return packed


# ----------------------------------------------------------------------------
# Forward pass (mirrors ResNetCIFAR.forward; BN uses batch statistics)
# ----------------------------------------------------------------------------
def resnet_forward(packed, x_nchw):
    x = jnp.transpose(x_nchw.astype(jnp.float32), (0, 2, 3, 1))   # NCHW -> NHWC
    n, h, w, _ = x.shape

    # stem: relu(bn(conv3x3(x)))  — one fused kernel
    mp, mtot = _geom(n, h, w)
    c0 = packed["stem"]["w"].shape[1]
    slab = _run_layer(
        [_nhwc_to_slab(x), packed["stem"]["w"], packed["stem"]["g"],
         packed["stem"]["b"], _valid_mask(n, h, w)],
        jax.ShapeDtypeStruct((c0, mtot), jnp.bfloat16),
        stem=True, downsample=False, fuse_head=False,
        wout=w, mp=mp, inv_count=1.0 / float(n * h * w),
    )
    cur_c, cur_h, cur_w = c0, h, w

    nblocks = len(packed["blocks"])
    for bi, blk in enumerate(packed["blocks"]):
        fuse_head = bi == nblocks - 1        # last block also runs avgpool + fc
        if blk["downsample"]:
            assert cur_h % 2 == 0 and cur_w % 2 == 0
            x_in = _slab_to_phases(slab, n, cur_h, cur_w, cur_c)
            cur_h //= 2
            cur_w //= 2
        else:
            x_in = slab
        mp, mtot = _geom(n, cur_h, cur_w)
        cout = blk["w1"].shape[1]

        inputs = [x_in, blk["w1"], blk["g1"], blk["b1"],
                  blk["w2"], blk["g2"], blk["b2"]]
        if blk["downsample"]:
            inputs += [blk["ws"], blk["gs"], blk["bs"]]
        inputs.append(_valid_mask(n, cur_h, cur_w))
        if fuse_head:
            inputs += [_pool_matrix(n, cur_h, cur_w),
                       packed["fc_wT"], packed["fc_b"]]
            out_shape = jax.ShapeDtypeStruct((packed["fc_wT"].shape[0], n),
                                             jnp.float32)
        else:
            out_shape = jax.ShapeDtypeStruct((cout, mtot), jnp.bfloat16)

        slab = _run_layer(
            inputs, out_shape,
            scratch=[pltpu.VMEM((cout, mp + 2 * GUARD), jnp.float32)],
            stem=False, downsample=blk["downsample"], fuse_head=fuse_head,
            wout=cur_w, mp=mp, inv_count=1.0 / float(n * cur_h * cur_w),
        )
        cur_c = cout

    # last kernel returned logits^T of shape (outputs, N)
    return jnp.transpose(slab, (1, 0))


if __name__ == "__main__":
    key = jax.random.PRNGKey(0)
    pkey, xkey = jax.random.split(key)

    # Small ResNetCIFAR plan: 3 segments, 1 block each; spatial 16 -> 8 -> 4.
    plan = [(8, 1), (16, 1), (32, 1)]
    params = init_params(pkey, plan, outputs=10)
    packed = pack_params(params)

    x = jax.random.normal(xkey, (2, 3, 16, 16), jnp.float32)   # NCHW like PyTorch
    fwd = jax.jit(lambda inp: resnet_forward(packed, inp))
    logits = fwd(x)
    jax.block_until_ready(logits)
    assert logits.shape == (2, 10) and logits.dtype == jnp.float32
    print("KERNEL_OK")
</pallas_src>

<mosaic_0001>
module attributes {stable_mosaic.version = 11 : i64} {
  func.func @kernel(%arg0: memref<3x896xbf16, #tpu.memory_space<vmem>>, %arg1: memref<9x8x3xbf16, #tpu.memory_space<vmem>>, %arg2: memref<8x1xf32, #tpu.memory_space<vmem>>, %arg3: memref<8x1xf32, #tpu.memory_space<vmem>>, %arg4: memref<1x648xf32, #tpu.memory_space<vmem>>, %arg5: memref<8x896xbf16, #tpu.memory_space<vmem>>) attributes {dimension_semantics = [], scalar_prefetch = 0 : i64, scratch_operands = 0 : i64, tpu.core_type = #tpu.core_type<tc>} {
    %c0 = arith.constant 0 : index
    %c0_0 = arith.constant 0 : index
    %0 = vector.load %arg4[%c0, %c0_0] : memref<1x648xf32, #tpu.memory_space<vmem>>, vector<1x648xf32>
    %c0_1 = arith.constant 0 : index
    %c0_2 = arith.constant 0 : index
    %1 = vector.load %arg0[%c0_1, %c0_2] : memref<3x896xbf16, #tpu.memory_space<vmem>>, vector<3x896xbf16>
    %2 = arith.extf %1 : vector<3x896xbf16> to vector<3x896xf32>
    %3 = vector.extract_strided_slice %2 {offsets = [0, 109], sizes = [3, 648], strides = [1, 1]} : vector<3x896xf32> to vector<3x648xf32>
    %4 = arith.truncf %3 : vector<3x648xf32> to vector<3x648xbf16>
    %c0_3 = arith.constant 0 : index
    %c0_4 = arith.constant 0 : index
    %c0_5 = arith.constant 0 : index
    %5 = vector.load %arg1[%c0_3, %c0_4, %c0_5] : memref<9x8x3xbf16, #tpu.memory_space<vmem>>, vector<1x8x3xbf16>
    %6 = vector.shape_cast %5 : vector<1x8x3xbf16> to vector<8x3xbf16>
    %cst = arith.constant dense<0.000000e+00> : vector<8x648xf32>
    %7 = tpu.matmul %6, %4, %cst {dimension_numbers = #tpu.dot_dimension_numbers<[1], [0], [0], [1], [0, 0, 1, 1], [], []>} : vector<8x3xbf16>, vector<3x648xbf16>, vector<8x648xf32> -> vector<8x648xf32>
    %8 = vector.extract_strided_slice %2 {offsets = [0, 110], sizes = [3, 648], strides = [1, 1]} : vector<3x896xf32> to vector<3x648xf32>
    %9 = arith.truncf %8 : vector<3x648xf32> to vector<3x648xbf16>
    %c1 = arith.constant 1 : index
    %c0_6 = arith.constant 0 : index
    %c0_7 = arith.constant 0 : index
    %10 = vector.load %arg1[%c1, %c0_6, %c0_7] : memref<9x8x3xbf16, #tpu.memory_space<vmem>>, vector<1x8x3xbf16>
    %11 = vector.shape_cast %10 : vector<1x8x3xbf16> to vector<8x3xbf16>
    %cst_8 = arith.constant dense<0.000000e+00> : vector<8x648xf32>
    %12 = tpu.matmul %11, %9, %cst_8 {dimension_numbers = #tpu.dot_dimension_numbers<[1], [0], [0], [1], [0, 0, 1, 1], [], []>} : vector<8x3xbf16>, vector<3x648xbf16>, vector<8x648xf32> -> vector<8x648xf32>
    %13 = arith.addf %7, %12 : vector<8x648xf32>
    %14 = vector.extract_strided_slice %2 {offsets = [0, 111], sizes = [3, 648], strides = [1, 1]} : vector<3x896xf32> to vector<3x648xf32>
    %15 = arith.truncf %14 : vector<3x648xf32> to vector<3x648xbf16>
    %c2 = arith.constant 2 : index
    %c0_9 = arith.constant 0 : index
    %c0_10 = arith.constant 0 : index
    %16 = vector.load %arg1[%c2, %c0_9, %c0_10] : memref<9x8x3xbf16, #tpu.memory_space<vmem>>, vector<1x8x3xbf16>
    %17 = vector.shape_cast %16 : vector<1x8x3xbf16> to vector<8x3xbf16>
    %cst_11 = arith.constant dense<0.000000e+00> : vector<8x648xf32>
    %18 = tpu.matmul %17, %15, %cst_11 {dimension_numbers = #tpu.dot_dimension_numbers<[1], [0], [0], [1], [0, 0, 1, 1], [], []>} : vector<8x3xbf16>, vector<3x648xbf16>, vector<8x648xf32> -> vector<8x648xf32>
    %19 = arith.addf %13, %18 : vector<8x648xf32>
    %20 = vector.extract_strided_slice %2 {offsets = [0, 127], sizes = [3, 648], strides = [1, 1]} : vector<3x896xf32> to vector<3x648xf32>
    %21 = arith.truncf %20 : vector<3x648xf32> to vector<3x648xbf16>
    %c3 = arith.constant 3 : index
    %c0_12 = arith.constant 0 : index
    %c0_13 = arith.constant 0 : index
    %22 = vector.load %arg1[%c3, %c0_12, %c0_13] : memref<9x8x3xbf16, #tpu.memory_space<vmem>>, vector<1x8x3xbf16>
    %23 = vector.shape_cast %22 : vector<1x8x3xbf16> to vector<8x3xbf16>
    %cst_14 = arith.constant dense<0.000000e+00> : vector<8x648xf32>
    %24 = tpu.matmul %23, %21, %cst_14 {dimension_numbers = #tpu.dot_dimension_numbers<[1], [0], [0], [1], [0, 0, 1, 1], [], []>} : vector<8x3xbf16>, vector<3x648xbf16>, vector<8x648xf32> -> vector<8x648xf32>
    %25 = arith.addf %19, %24 : vector<8x648xf32>
    %26 = vector.extract_strided_slice %2 {offsets = [0, 128], sizes = [3, 648], strides = [1, 1]} : vector<3x896xf32> to vector<3x648xf32>
    %27 = arith.truncf %26 : vector<3x648xf32> to vector<3x648xbf16>
    %c4 = arith.constant 4 : index
    %c0_15 = arith.constant 0 : index
    %c0_16 = arith.constant 0 : index
    %28 = vector.load %arg1[%c4, %c0_15, %c0_16] : memref<9x8x3xbf16, #tpu.memory_space<vmem>>, vector<1x8x3xbf16>
    %29 = vector.shape_cast %28 : vector<1x8x3xbf16> to vector<8x3xbf16>
    %cst_17 = arith.constant dense<0.000000e+00> : vector<8x648xf32>
    %30 = tpu.matmul %29, %27, %cst_17 {dimension_numbers = #tpu.dot_dimension_numbers<[1], [0], [0], [1], [0, 0, 1, 1], [], []>} : vector<8x3xbf16>, vector<3x648xbf16>, vector<8x648xf32> -> vector<8x648xf32>
    %31 = arith.addf %25, %30 : vector<8x648xf32>
    %32 = vector.extract_strided_slice %2 {offsets = [0, 129], sizes = [3, 648], strides = [1, 1]} : vector<3x896xf32> to vector<3x648xf32>
    %33 = arith.truncf %32 : vector<3x648xf32> to vector<3x648xbf16>
    %c5 = arith.constant 5 : index
    %c0_18 = arith.constant 0 : index
    %c0_19 = arith.constant 0 : index
    %34 = vector.load %arg1[%c5, %c0_18, %c0_19] : memref<9x8x3xbf16, #tpu.memory_space<vmem>>, vector<1x8x3xbf16>
    %35 = vector.shape_cast %34 : vector<1x8x3xbf16> to vector<8x3xbf16>
    %cst_20 = arith.constant dense<0.000000e+00> : vector<8x648xf32>
    %36 = tpu.matmul %35, %33, %cst_20 {dimension_numbers = #tpu.dot_dimension_numbers<[1], [0], [0], [1], [0, 0, 1, 1], [], []>} : vector<8x3xbf16>, vector<3x648xbf16>, vector<8x648xf32> -> vector<8x648xf32>
    %37 = arith.addf %31, %36 : vector<8x648xf32>
    %38 = vector.extract_strided_slice %2 {offsets = [0, 145], sizes = [3, 648], strides = [1, 1]} : vector<3x896xf32> to vector<3x648xf32>
    %39 = arith.truncf %38 : vector<3x648xf32> to vector<3x648xbf16>
    %c6 = arith.constant 6 : index
    %c0_21 = arith.constant 0 : index
    %c0_22 = arith.constant 0 : index
    %40 = vector.load %arg1[%c6, %c0_21, %c0_22] : memref<9x8x3xbf16, #tpu.memory_space<vmem>>, vector<1x8x3xbf16>
    %41 = vector.shape_cast %40 : vector<1x8x3xbf16> to vector<8x3xbf16>
    %cst_23 = arith.constant dense<0.000000e+00> : vector<8x648xf32>
    %42 = tpu.matmul %41, %39, %cst_23 {dimension_numbers = #tpu.dot_dimension_numbers<[1], [0], [0], [1], [0, 0, 1, 1], [], []>} : vector<8x3xbf16>, vector<3x648xbf16>, vector<8x648xf32> -> vector<8x648xf32>
    %43 = arith.addf %37, %42 : vector<8x648xf32>
    %44 = vector.extract_strided_slice %2 {offsets = [0, 146], sizes = [3, 648], strides = [1, 1]} : vector<3x896xf32> to vector<3x648xf32>
    %45 = arith.truncf %44 : vector<3x648xf32> to vector<3x648xbf16>
    %c7 = arith.constant 7 : index
    %c0_24 = arith.constant 0 : index
    %c0_25 = arith.constant 0 : index
    %46 = vector.load %arg1[%c7, %c0_24, %c0_25] : memref<9x8x3xbf16, #tpu.memory_space<vmem>>, vector<1x8x3xbf16>
    %47 = vector.shape_cast %46 : vector<1x8x3xbf16> to vector<8x3xbf16>
    %cst_26 = arith.constant dense<0.000000e+00> : vector<8x648xf32>
    %48 = tpu.matmul %47, %45, %cst_26 {dimension_numbers = #tpu.dot_dimension_numbers<[1], [0], [0], [1], [0, 0, 1, 1], [], []>} : vector<8x3xbf16>, vector<3x648xbf16>, vector<8x648xf32> -> vector<8x648xf32>
    %49 = arith.addf %43, %48 : vector<8x648xf32>
    %50 = vector.extract_strided_slice %2 {offsets = [0, 147], sizes = [3, 648], strides = [1, 1]} : vector<3x896xf32> to vector<3x648xf32>
    %51 = arith.truncf %50 : vector<3x648xf32> to vector<3x648xbf16>
    %c8 = arith.constant 8 : index
    %c0_27 = arith.constant 0 : index
    %c0_28 = arith.constant 0 : index
    %52 = vector.load %arg1[%c8, %c0_27, %c0_28] : memref<9x8x3xbf16, #tpu.memory_space<vmem>>, vector<1x8x3xbf16>
    %53 = vector.shape_cast %52 : vector<1x8x3xbf16> to vector<8x3xbf16>
    %cst_29 = arith.constant dense<0.000000e+00> : vector<8x648xf32>
    %54 = tpu.matmul %53, %51, %cst_29 {dimension_numbers = #tpu.dot_dimension_numbers<[1], [0], [0], [1], [0, 0, 1, 1], [], []>} : vector<8x3xbf16>, vector<3x648xbf16>, vector<8x648xf32> -> vector<8x648xf32>
    %55 = arith.addf %49, %54 : vector<8x648xf32>
    %56 = vector.broadcast %0 : vector<1x648xf32> to vector<8x648xf32>
    %57 = arith.mulf %55, %56 : vector<8x648xf32>
    %cst_30 = arith.constant dense<0.000000e+00> : vector<8xf32>
    %58 = vector.multi_reduction <add>, %57, %cst_30 [1] : vector<8x648xf32> to vector<8xf32>
    %59 = vector.shape_cast %58 : vector<8xf32> to vector<8x1xf32>
    %60 = arith.mulf %55, %55 : vector<8x648xf32>
    %61 = vector.broadcast %0 : vector<1x648xf32> to vector<8x648xf32>
    %62 = arith.mulf %60, %61 : vector<8x648xf32>
    %cst_31 = arith.constant dense<0.000000e+00> : vector<8xf32>
    %63 = vector.multi_reduction <add>, %62, %cst_31 [1] : vector<8x648xf32> to vector<8xf32>
    %64 = vector.shape_cast %63 : vector<8xf32> to vector<8x1xf32>
    %cst_32 = arith.constant 0.001953125 : f32
    %65 = vector.broadcast %cst_32 : f32 to vector<8x1xf32>
    %66 = arith.mulf %59, %65 : vector<8x1xf32>
    %cst_33 = arith.constant 0.001953125 : f32
    %67 = vector.broadcast %cst_33 : f32 to vector<8x1xf32>
    %68 = arith.mulf %64, %67 : vector<8x1xf32>
    %69 = arith.mulf %66, %66 : vector<8x1xf32>
    %70 = arith.subf %68, %69 : vector<8x1xf32>
    %cst_34 = arith.constant 0.000000e+00 : f32
    %71 = vector.broadcast %cst_34 : f32 to vector<8x1xf32>
    %72 = arith.maximumf %70, %71 : vector<8x1xf32>
    %73 = vector.broadcast %66 : vector<8x1xf32> to vector<8x648xf32>
    %74 = arith.subf %55, %73 : vector<8x648xf32>
    %cst_35 = arith.constant 9.99999974E-6 : f32
    %75 = vector.broadcast %cst_35 : f32 to vector<8x1xf32>
    %76 = arith.addf %72, %75 : vector<8x1xf32>
    %77 = math.rsqrt %76 : vector<8x1xf32>
    %78 = vector.broadcast %77 : vector<8x1xf32> to vector<8x648xf32>
    %79 = arith.mulf %74, %78 : vector<8x648xf32>
    %c0_36 = arith.constant 0 : index
    %c0_37 = arith.constant 0 : index
    %80 = vector.load %arg2[%c0_36, %c0_37] : memref<8x1xf32, #tpu.memory_space<vmem>>, vector<8x1xf32>
    %81 = vector.broadcast %80 : vector<8x1xf32> to vector<8x648xf32>
    %82 = arith.mulf %79, %81 : vector<8x648xf32>
    %c0_38 = arith.constant 0 : index
    %c0_39 = arith.constant 0 : index
    %83 = vector.load %arg3[%c0_38, %c0_39] : memref<8x1xf32, #tpu.memory_space<vmem>>, vector<8x1xf32>
    %84 = vector.broadcast %83 : vector<8x1xf32> to vector<8x648xf32>
    %85 = arith.addf %82, %84 : vector<8x648xf32>
    %cst_40 = arith.constant 0.000000e+00 : f32
    %86 = vector.broadcast %cst_40 : f32 to vector<8x648xf32>
    %87 = arith.maximumf %85, %86 : vector<8x648xf32>
    %88 = vector.broadcast %0 : vector<1x648xf32> to vector<8x648xf32>
    %89 = arith.mulf %87, %88 : vector<8x648xf32>
    %cst_41 = arith.constant 0.000000e+00 : bf16
    %90 = vector.broadcast %cst_41 : bf16 to vector<8x896xbf16>
    %c0_42 = arith.constant 0 : index
    %c0_43 = arith.constant 0 : index
    %91 = vector.load %arg5[%c0_42, %c0_43] : memref<8x896xbf16, #tpu.memory_space<vmem>>, vector<8x896xbf16>
    tpu.vector_store %arg5[%c0_42, %c0_43], %90 {strides = array<i32>} : memref<8x896xbf16, #tpu.memory_space<vmem>>, vector<8x896xbf16>,
    %92 = arith.truncf %89 : vector<8x648xf32> to vector<8x648xbf16>
    %c0_44 = arith.constant 0 : index
    %c128 = arith.constant 128 : index
    %93 = vector.load %arg5[%c0_44, %c128] : memref<8x896xbf16, #tpu.memory_space<vmem>>, vector<8x648xbf16>
    tpu.vector_store %arg5[%c0_44, %c128], %92 {strides = array<i32>} : memref<8x896xbf16, #tpu.memory_space<vmem>>, vector<8x648xbf16>,
    return
  }
}

module attributes {stable_mosaic.version = 11 : i64} {
  func.func @kernel(%arg0: memref<8x896xbf16, #tpu.memory_space<vmem>>, %arg1: memref<9x8x8xbf16, #tpu.memory_space<vmem>>, %arg2: memref<8x1xf32, #tpu.memory_space<vmem>>, %arg3: memref<8x1xf32, #tpu.memory_space<vmem>>, %arg4: memref<9x8x8xbf16, #tpu.memory_space<vmem>>, %arg5: memref<8x1xf32, #tpu.memory_space<vmem>>, %arg6: memref<8x1xf32, #tpu.memory_space<vmem>>, %arg7: memref<1x648xf32, #tpu.memory_space<vmem>>, %arg8: memref<8x896xbf16, #tpu.memory_space<vmem>>, %arg9: memref<8x904xf32, #tpu.memory_space<vmem>>) attributes {dimension_semantics = [], scalar_prefetch = 0 : i64, scratch_operands = 1 : i64, tpu.core_type = #tpu.core_type<tc>} {
    %c0 = arith.constant 0 : index
    %c0_0 = arith.constant 0 : index
    %0 = vector.load %arg7[%c0, %c0_0] : memref<1x648xf32, #tpu.memory_space<vmem>>, vector<1x648xf32>
    %c0_1 = arith.constant 0 : index
    %c0_2 = arith.constant 0 : index
    %1 = vector.load %arg0[%c0_1, %c0_2] : memref<8x896xbf16, #tpu.memory_space<vmem>>, vector<8x896xbf16>
    %2 = arith.extf %1 : vector<8x896xbf16> to vector<8x896xf32>
    %3 = vector.extract_strided_slice %2 {offsets = [0, 109], sizes = [8, 648], strides = [1, 1]} : vector<8x896xf32> to vector<8x648xf32>
    %4 = arith.truncf %3 : vector<8x648xf32> to vector<8x648xbf16>
    %c0_3 = arith.constant 0 : index
    %c0_4 = arith.constant 0 : index
    %c0_5 = arith.constant 0 : index
    %5 = vector.load %arg1[%c0_3, %c0_4, %c0_5] : memref<9x8x8xbf16, #tpu.memory_space<vmem>>, vector<1x8x8xbf16>
    %6 = vector.shape_cast %5 : vector<1x8x8xbf16> to vector<8x8xbf16>
    %cst = arith.constant dense<0.000000e+00> : vector<8x648xf32>
    %7 = tpu.matmul %6, %4, %cst {dimension_numbers = #tpu.dot_dimension_numbers<[1], [0], [0], [1], [0, 0, 1, 1], [], []>} : vector<8x8xbf16>, vector<8x648xbf16>, vector<8x648xf32> -> vector<8x648xf32>
    %8 = vector.extract_strided_slice %2 {offsets = [0, 110], sizes = [8, 648], strides = [1, 1]} : vector<8x896xf32> to vector<8x648xf32>
    %9 = arith.truncf %8 : vector<8x648xf32> to vector<8x648xbf16>
    %c1 = arith.constant 1 : index
    %c0_6 = arith.constant 0 : index
    %c0_7 = arith.constant 0 : index
    %10 = vector.load %arg1[%c1, %c0_6, %c0_7] : memref<9x8x8xbf16, #tpu.memory_space<vmem>>, vector<1x8x8xbf16>
    %11 = vector.shape_cast %10 : vector<1x8x8xbf16> to vector<8x8xbf16>
    %cst_8 = arith.constant dense<0.000000e+00> : vector<8x648xf32>
    %12 = tpu.matmul %11, %9, %cst_8 {dimension_numbers = #tpu.dot_dimension_numbers<[1], [0], [0], [1], [0, 0, 1, 1], [], []>} : vector<8x8xbf16>, vector<8x648xbf16>, vector<8x648xf32> -> vector<8x648xf32>
    %13 = arith.addf %7, %12 : vector<8x648xf32>
    %14 = vector.extract_strided_slice %2 {offsets = [0, 111], sizes = [8, 648], strides = [1, 1]} : vector<8x896xf32> to vector<8x648xf32>
    %15 = arith.truncf %14 : vector<8x648xf32> to vector<8x648xbf16>
    %c2 = arith.constant 2 : index
    %c0_9 = arith.constant 0 : index
    %c0_10 = arith.constant 0 : index
    %16 = vector.load %arg1[%c2, %c0_9, %c0_10] : memref<9x8x8xbf16, #tpu.memory_space<vmem>>, vector<1x8x8xbf16>
    %17 = vector.shape_cast %16 : vector<1x8x8xbf16> to vector<8x8xbf16>
    %cst_11 = arith.constant dense<0.000000e+00> : vector<8x648xf32>
    %18 = tpu.matmul %17, %15, %cst_11 {dimension_numbers = #tpu.dot_dimension_numbers<[1], [0], [0], [1], [0, 0, 1, 1], [], []>} : vector<8x8xbf16>, vector<8x648xbf16>, vector<8x648xf32> -> vector<8x648xf32>
    %19 = arith.addf %13, %18 : vector<8x648xf32>
    %20 = vector.extract_strided_slice %2 {offsets = [0, 127], sizes = [8, 648], strides = [1, 1]} : vector<8x896xf32> to vector<8x648xf32>
    %21 = arith.truncf %20 : vector<8x648xf32> to vector<8x648xbf16>
    %c3 = arith.constant 3 : index
    %c0_12 = arith.constant 0 : index
    %c0_13 = arith.constant 0 : index
    %22 = vector.load %arg1[%c3, %c0_12, %c0_13] : memref<9x8x8xbf16, #tpu.memory_space<vmem>>, vector<1x8x8xbf16>
    %23 = vector.shape_cast %22 : vector<1x8x8xbf16> to vector<8x8xbf16>
    %cst_14 = arith.constant dense<0.000000e+00> : vector<8x648xf32>
    %24 = tpu.matmul %23, %21, %cst_14 {dimension_numbers = #tpu.dot_dimension_numbers<[1], [0], [0], [1], [0, 0, 1, 1], [], []>} : vector<8x8xbf16>, vector<8x648xbf16>, vector<8x648xf32> -> vector<8x648xf32>
    %25 = arith.addf %19, %24 : vector<8x648xf32>
    %26 = vector.extract_strided_slice %2 {offsets = [0, 128], sizes = [8, 648], strides = [1, 1]} : vector<8x896xf32> to vector<8x648xf32>
    %27 = arith.truncf %26 : vector<8x648xf32> to vector<8x648xbf16>
    %c4 = arith.constant 4 : index
    %c0_15 = arith.constant 0 : index
    %c0_16 = arith.constant 0 : index
    %28 = vector.load %arg1[%c4, %c0_15, %c0_16] : memref<9x8x8xbf16, #tpu.memory_space<vmem>>, vector<1x8x8xbf16>
    %29 = vector.shape_cast %28 : vector<1x8x8xbf16> to vector<8x8xbf16>
    %cst_17 = arith.constant dense<0.000000e+00> : vector<8x648xf32>
    %30 = tpu.matmul %29, %27, %cst_17 {dimension_numbers = #tpu.dot_dimension_numbers<[1], [0], [0], [1], [0, 0, 1, 1], [], []>} : vector<8x8xbf16>, vector<8x648xbf16>, vector<8x648xf32> -> vector<8x648xf32>
    %31 = arith.addf %25, %30 : vector<8x648xf32>
    %32 = vector.extract_strided_slice %2 {offsets = [0, 129], sizes = [8, 648], strides = [1, 1]} : vector<8x896xf32> to vector<8x648xf32>
    %33 = arith.truncf %32 : vector<8x648xf32> to vector<8x648xbf16>
    %c5 = arith.constant 5 : index
    %c0_18 = arith.constant 0 : index
    %c0_19 = arith.constant 0 : index
    %34 = vector.load %arg1[%c5, %c0_18, %c0_19] : memref<9x8x8xbf16, #tpu.memory_space<vmem>>, vector<1x8x8xbf16>
    %35 = vector.shape_cast %34 : vector<1x8x8xbf16> to vector<8x8xbf16>
    %cst_20 = arith.constant dense<0.000000e+00> : vector<8x648xf32>
    %36 = tpu.matmul %35, %33, %cst_20 {dimension_numbers = #tpu.dot_dimension_numbers<[1], [0], [0], [1], [0, 0, 1, 1], [], []>} : vector<8x8xbf16>, vector<8x648xbf16>, vector<8x648xf32> -> vector<8x648xf32>
    %37 = arith.addf %31, %36 : vector<8x648xf32>
    %38 = vector.extract_strided_slice %2 {offsets = [0, 145], sizes = [8, 648], strides = [1, 1]} : vector<8x896xf32> to vector<8x648xf32>
    %39 = arith.truncf %38 : vector<8x648xf32> to vector<8x648xbf16>
    %c6 = arith.constant 6 : index
    %c0_21 = arith.constant 0 : index
    %c0_22 = arith.constant 0 : index
    %40 = vector.load %arg1[%c6, %c0_21, %c0_22] : memref<9x8x8xbf16, #tpu.memory_space<vmem>>, vector<1x8x8xbf16>
    %41 = vector.shape_cast %40 : vector<1x8x8xbf16> to vector<8x8xbf16>
    %cst_23 = arith.constant dense<0.000000e+00> : vector<8x648xf32>
    %42 = tpu.matmul %41, %39, %cst_23 {dimension_numbers = #tpu.dot_dimension_numbers<[1], [0], [0], [1], [0, 0, 1, 1], [], []>} : vector<8x8xbf16>, vector<8x648xbf16>, vector<8x648xf32> -> vector<8x648xf32>
    %43 = arith.addf %37, %42 : vector<8x648xf32>
    %44 = vector.extract_strided_slice %2 {offsets = [0, 146], sizes = [8, 648], strides = [1, 1]} : vector<8x896xf32> to vector<8x648xf32>
    %45 = arith.truncf %44 : vector<8x648xf32> to vector<8x648xbf16>
    %c7 = arith.constant 7 : index
    %c0_24 = arith.constant 0 : index
    %c0_25 = arith.constant 0 : index
    %46 = vector.load %arg1[%c7, %c0_24, %c0_25] : memref<9x8x8xbf16, #tpu.memory_space<vmem>>, vector<1x8x8xbf16>
    %47 = vector.shape_cast %46 : vector<1x8x8xbf16> to vector<8x8xbf16>
    %cst_26 = arith.constant dense<0.000000e+00> : vector<8x648xf32>
    %48 = tpu.matmul %47, %45, %cst_26 {dimension_numbers = #tpu.dot_dimension_numbers<[1], [0], [0], [1], [0, 0, 1, 1], [], []>} : vector<8x8xbf16>, vector<8x648xbf16>, vector<8x648xf32> -> vector<8x648xf32>
    %49 = arith.addf %43, %48 : vector<8x648xf32>
    %50 = vector.extract_strided_slice %2 {offsets = [0, 147], sizes = [8, 648], strides = [1, 1]} : vector<8x896xf32> to vector<8x648xf32>
    %51 = arith.truncf %50 : vector<8x648xf32> to vector<8x648xbf16>
    %c8 = arith.constant 8 : index
    %c0_27 = arith.constant 0 : index
    %c0_28 = arith.constant 0 : index
    %52 = vector.load %arg1[%c8, %c0_27, %c0_28] : memref<9x8x8xbf16, #tpu.memory_space<vmem>>, vector<1x8x8xbf16>
    %53 = vector.shape_cast %52 : vector<1x8x8xbf16> to vector<8x8xbf16>
    %cst_29 = arith.constant dense<0.000000e+00> : vector<8x648xf32>
    %54 = tpu.matmul %53, %51, %cst_29 {dimension_numbers = #tpu.dot_dimension_numbers<[1], [0], [0], [1], [0, 0, 1, 1], [], []>} : vector<8x8xbf16>, vector<8x648xbf16>, vector<8x648xf32> -> vector<8x648xf32>
    %55 = arith.addf %49, %54 : vector<8x648xf32>
    %56 = vector.broadcast %0 : vector<1x648xf32> to vector<8x648xf32>
    %57 = arith.mulf %55, %56 : vector<8x648xf32>
    %cst_30 = arith.constant dense<0.000000e+00> : vector<8xf32>
    %58 = vector.multi_reduction <add>, %57, %cst_30 [1] : vector<8x648xf32> to vector<8xf32>
    %59 = vector.shape_cast %58 : vector<8xf32> to vector<8x1xf32>
    %60 = arith.mulf %55, %55 : vector<8x648xf32>
    %61 = vector.broadcast %0 : vector<1x648xf32> to vector<8x648xf32>
    %62 = arith.mulf %60, %61 : vector<8x648xf32>
    %cst_31 = arith.constant dense<0.000000e+00> : vector<8xf32>
    %63 = vector.multi_reduction <add>, %62, %cst_31 [1] : vector<8x648xf32> to vector<8xf32>
    %64 = vector.shape_cast %63 : vector<8xf32> to vector<8x1xf32>
    %cst_32 = arith.constant 0.001953125 : f32
    %65 = vector.broadcast %cst_32 : f32 to vector<8x1xf32>
    %66 = arith.mulf %59, %65 : vector<8x1xf32>
    %cst_33 = arith.constant 0.001953125 : f32
    %67 = vector.broadcast %cst_33 : f32 to vector<8x1xf32>
    %68 = arith.mulf %64, %67 : vector<8x1xf32>
    %69 = arith.mulf %66, %66 : vector<8x1xf32>
    %70 = arith.subf %68, %69 : vector<8x1xf32>
    %cst_34 = arith.constant 0.000000e+00 : f32
    %71 = vector.broadcast %cst_34 : f32 to vector<8x1xf32>
    %72 = arith.maximumf %70, %71 : vector<8x1xf32>
    %73 = vector.broadcast %66 : vector<8x1xf32> to vector<8x648xf32>
    %74 = arith.subf %55, %73 : vector<8x648xf32>
    %cst_35 = arith.constant 9.99999974E-6 : f32
    %75 = vector.broadcast %cst_35 : f32 to vector<8x1xf32>
    %76 = arith.addf %72, %75 : vector<8x1xf32>
    %77 = math.rsqrt %76 : vector<8x1xf32>
    %78 = vector.broadcast %77 : vector<8x1xf32> to vector<8x648xf32>
    %79 = arith.mulf %74, %78 : vector<8x648xf32>
    %c0_36 = arith.constant 0 : index
    %c0_37 = arith.constant 0 : index
    %80 = vector.load %arg2[%c0_36, %c0_37] : memref<8x1xf32, #tpu.memory_space<vmem>>, vector<8x1xf32>
    %81 = vector.broadcast %80 : vector<8x1xf32> to vector<8x648xf32>
    %82 = arith.mulf %79, %81 : vector<8x648xf32>
    %c0_38 = arith.constant 0 : index
    %c0_39 = arith.constant 0 : index
    %83 = vector.load %arg3[%c0_38, %c0_39] : memref<8x1xf32, #tpu.memory_space<vmem>>, vector<8x1xf32>
    %84 = vector.broadcast %83 : vector<8x1xf32> to vector<8x648xf32>
    %85 = arith.addf %82, %84 : vector<8x648xf32>
    %cst_40 = arith.constant 0.000000e+00 : f32
    %86 = vector.broadcast %cst_40 : f32 to vector<8x648xf32>
    %87 = arith.maximumf %85, %86 : vector<8x648xf32>
    %88 = vector.broadcast %0 : vector<1x648xf32> to vector<8x648xf32>
    %89 = arith.mulf %87, %88 : vector<8x648xf32>
    %cst_41 = arith.constant 0.000000e+00 : f32
    %90 = vector.broadcast %cst_41 : f32 to vector<8x904xf32>
    %c0_42 = arith.constant 0 : index
    %c0_43 = arith.constant 0 : index
    %91 = vector.load %arg9[%c0_42, %c0_43] : memref<8x904xf32, #tpu.memory_space<vmem>>, vector<8x904xf32>
    tpu.vector_store %arg9[%c0_42, %c0_43], %90 {strides = array<i32>} : memref<8x904xf32, #tpu.memory_space<vmem>>, vector<8x904xf32>,
    %c0_44 = arith.constant 0 : index
    %c128 = arith.constant 128 : index
    %92 = vector.load %arg9[%c0_44, %c128] : memref<8x904xf32, #tpu.memory_space<vmem>>, vector<8x648xf32>
    tpu.vector_store %arg9[%c0_44, %c128], %89 {strides = array<i32>} : memref<8x904xf32, #tpu.memory_space<vmem>>, vector<8x648xf32>,
    %c0_45 = arith.constant 0 : index
    %c0_46 = arith.constant 0 : index
    %93 = vector.load %arg9[%c0_45, %c0_46] : memref<8x904xf32, #tpu.memory_space<vmem>>, vector<8x904xf32>
    %94 = vector.extract_strided_slice %93 {offsets = [0, 109], sizes = [8, 648], strides = [1, 1]} : vector<8x904xf32> to vector<8x648xf32>
    %95 = arith.truncf %94 : vector<8x648xf32> to vector<8x648xbf16>
    %c0_47 = arith.constant 0 : index
    %c0_48 = arith.constant 0 : index
    %c0_49 = arith.constant 0 : index
    %96 = vector.load %arg4[%c0_47, %c0_48, %c0_49] : memref<9x8x8xbf16, #tpu.memory_space<vmem>>, vector<1x8x8xbf16>
    %97 = vector.shape_cast %96 : vector<1x8x8xbf16> to vector<8x8xbf16>
    %cst_50 = arith.constant dense<0.000000e+00> : vector<8x648xf32>
    %98 = tpu.matmul %97, %95, %cst_50 {dimension_numbers = #tpu.dot_dimension_numbers<[1], [0], [0], [1], [0, 0, 1, 1], [], []>} : vector<8x8xbf16>, vector<8x648xbf16>, vector<8x648xf32> -> vector<8x648xf32>
    %99 = vector.extract_strided_slice %93 {offsets = [0, 110], sizes = [8, 648], strides = [1, 1]} : vector<8x904xf32> to vector<8x648xf32>
    %100 = arith.truncf %99 : vector<8x648xf32> to vector<8x648xbf16>
    %c1_51 = arith.constant 1 : index
    %c0_52 = arith.constant 0 : index
    %c0_53 = arith.constant 0 : index
    %101 = vector.load %arg4[%c1_51, %c0_52, %c0_53] : memref<9x8x8xbf16, #tpu.memory_space<vmem>>, vector<1x8x8xbf16>
    %102 = vector.shape_cast %101 : vector<1x8x8xbf16> to vector<8x8xbf16>
    %cst_54 = arith.constant dense<0.000000e+00> : vector<8x648xf32>
    %103 = tpu.matmul %102, %100, %cst_54 {dimension_numbers = #tpu.dot_dimension_numbers<[1], [0], [0], [1], [0, 0, 1, 1], [], []>} : vector<8x8xbf16>, vector<8x648xbf16>, vector<8x648xf32> -> vector<8x648xf32>
    %104 = arith.addf %98, %103 : vector<8x648xf32>
    %105 = vector.extract_strided_slice %93 {offsets = [0, 111], sizes = [8, 648], strides = [1, 1]} : vector<8x904xf32> to vector<8x648xf32>
    %106 = arith.truncf %105 : vector<8x648xf32> to vector<8x648xbf16>
    %c2_55 = arith.constant 2 : index
    %c0_56 = arith.constant 0 : index
    %c0_57 = arith.constant 0 : index
    %107 = vector.load %arg4[%c2_55, %c0_56, %c0_57] : memref<9x8x8xbf16, #tpu.memory_space<vmem>>, vector<1x8x8xbf16>
    %108 = vector.shape_cast %107 : vector<1x8x8xbf16> to vector<8x8xbf16>
    %cst_58 = arith.constant dense<0.000000e+00> : vector<8x648xf32>
    %109 = tpu.matmul %108, %106, %cst_58 {dimension_numbers = #tpu.dot_dimension_numbers<[1], [0], [0], [1], [0, 0, 1, 1], [], []>} : vector<8x8xbf16>, vector<8x648xbf16>, vector<8x648xf32> -> vector<8x648xf32>
    %110 = arith.addf %104, %109 : vector<8x648xf32>
    %111 = vector.extract_strided_slice %93 {offsets = [0, 127], sizes = [8, 648], strides = [1, 1]} : vector<8x904xf32> to vector<8x648xf32>
    %112 = arith.truncf %111 : vector<8x648xf32> to vector<8x648xbf16>
    %c3_59 = arith.constant 3 : index
    %c0_60 = arith.constant 0 : index
    %c0_61 = arith.constant 0 : index
    %113 = vector.load %arg4[%c3_59, %c0_60, %c0_61] : memref<9x8x8xbf16, #tpu.memory_space<vmem>>, vector<1x8x8xbf16>
    %114 = vector.shape_cast %113 : vector<1x8x8xbf16> to vector<8x8xbf16>
    %cst_62 = arith.constant dense<0.000000e+00> : vector<8x648xf32>
    %115 = tpu.matmul %114, %112, %cst_62 {dimension_numbers = #tpu.dot_dimension_numbers<[1], [0], [0], [1], [0, 0, 1, 1], [], []>} : vector<8x8xbf16>, vector<8x648xbf16>, vector<8x648xf32> -> vector<8x648xf32>
    %116 = arith.addf %110, %115 : vector<8x648xf32>
    %117 = vector.extract_strided_slice %93 {offsets = [0, 128], sizes = [8, 648], strides = [1, 1]} : vector<8x904xf32> to vector<8x648xf32>
    %118 = arith.truncf %117 : vector<8x648xf32> to vector<8x648xbf16>
    %c4_63 = arith.constant 4 : index
    %c0_64 = arith.constant 0 : index
    %c0_65 = arith.constant 0 : index
    %119 = vector.load %arg4[%c4_63, %c0_64, %c0_65] : memref<9x8x8xbf16, #tpu.memory_space<vmem>>, vector<1x8x8xbf16>
    %120 = vector.shape_cast %119 : vector<1x8x8xbf16> to vector<8x8xbf16>
    %cst_66 = arith.constant dense<0.000000e+00> : vector<8x648xf32>
    %121 = tpu.matmul %120, %118, %cst_66 {dimension_numbers = #tpu.dot_dimension_numbers<[1], [0], [0], [1], [0, 0, 1, 1], [], []>} : vector<8x8xbf16>, vector<8x648xbf16>, vector<8x648xf32> -> vector<8x648xf32>
    %122 = arith.addf %116, %121 : vector<8x648xf32>
    %123 = vector.extract_strided_slice %93 {offsets = [0, 129], sizes = [8, 648], strides = [1, 1]} : vector<8x904xf32> to vector<8x648xf32>
    %124 = arith.truncf %123 : vector<8x648xf32> to vector<8x648xbf16>
    %c5_67 = arith.constant 5 : index
    %c0_68 = arith.constant 0 : index
    %c0_69 = arith.constant 0 : index
    %125 = vector.load %arg4[%c5_67, %c0_68, %c0_69] : memref<9x8x8xbf16, #tpu.memory_space<vmem>>, vector<1x8x8xbf16>
    %126 = vector.shape_cast %125 : vector<1x8x8xbf16> to vector<8x8xbf16>
    %cst_70 = arith.constant dense<0.000000e+00> : vector<8x648xf32>
    %127 = tpu.matmul %126, %124, %cst_70 {dimension_numbers = #tpu.dot_dimension_numbers<[1], [0], [0], [1], [0, 0, 1, 1], [], []>} : vector<8x8xbf16>, vector<8x648xbf16>, vector<8x648xf32> -> vector<8x648xf32>
    %128 = arith.addf %122, %127 : vector<8x648xf32>
    %129 = vector.extract_strided_slice %93 {offsets = [0, 145], sizes = [8, 648], strides = [1, 1]} : vector<8x904xf32> to vector<8x648xf32>
    %130 = arith.truncf %129 : vector<8x648xf32> to vector<8x648xbf16>
    %c6_71 = arith.constant 6 : index
    %c0_72 = arith.constant 0 : index
    %c0_73 = arith.constant 0 : index
    %131 = vector.load %arg4[%c6_71, %c0_72, %c0_73] : memref<9x8x8xbf16, #tpu.memory_space<vmem>>, vector<1x8x8xbf16>
    %132 = vector.shape_cast %131 : vector<1x8x8xbf16> to vector<8x8xbf16>
    %cst_74 = arith.constant dense<0.000000e+00> : vector<8x648xf32>
    %133 = tpu.matmul %132, %130, %cst_74 {dimension_numbers = #tpu.dot_dimension_numbers<[1], [0], [0], [1], [0, 0, 1, 1], [], []>} : vector<8x8xbf16>, vector<8x648xbf16>, vector<8x648xf32> -> vector<8x648xf32>
    %134 = arith.addf %128, %133 : vector<8x648xf32>
    %135 = vector.extract_strided_slice %93 {offsets = [0, 146], sizes = [8, 648], strides = [1, 1]} : vector<8x904xf32> to vector<8x648xf32>
    %136 = arith.truncf %135 : vector<8x648xf32> to vector<8x648xbf16>
    %c7_75 = arith.constant 7 : index
    %c0_76 = arith.constant 0 : index
    %c0_77 = arith.constant 0 : index
    %137 = vector.load %arg4[%c7_75, %c0_76, %c0_77] : memref<9x8x8xbf16, #tpu.memory_space<vmem>>, vector<1x8x8xbf16>
    %138 = vector.shape_cast %137 : vector<1x8x8xbf16> to vector<8x8xbf16>
    %cst_78 = arith.constant dense<0.000000e+00> : vector<8x648xf32>
    %139 = tpu.matmul %138, %136, %cst_78 {dimension_numbers = #tpu.dot_dimension_numbers<[1], [0], [0], [1], [0, 0, 1, 1], [], []>} : vector<8x8xbf16>, vector<8x648xbf16>, vector<8x648xf32> -> vector<8x648xf32>
    %140 = arith.addf %134, %139 : vector<8x648xf32>
    %141 = vector.extract_strided_slice %93 {offsets = [0, 147], sizes = [8, 648], strides = [1, 1]} : vector<8x904xf32> to vector<8x648xf32>
    %142 = arith.truncf %141 : vector<8x648xf32> to vector<8x648xbf16>
    %c8_79 = arith.constant 8 : index
    %c0_80 = arith.constant 0 : index
    %c0_81 = arith.constant 0 : index
    %143 = vector.load %arg4[%c8_79, %c0_80, %c0_81] : memref<9x8x8xbf16, #tpu.memory_space<vmem>>, vector<1x8x8xbf16>
    %144 = vector.shape_cast %143 : vector<1x8x8xbf16> to vector<8x8xbf16>
    %cst_82 = arith.constant dense<0.000000e+00> : vector<8x648xf32>
    %145 = tpu.matmul %144, %142, %cst_82 {dimension_numbers = #tpu.dot_dimension_numbers<[1], [0], [0], [1], [0, 0, 1, 1], [], []>} : vector<8x8xbf16>, vector<8x648xbf16>, vector<8x648xf32> -> vector<8x648xf32>
    %146 = arith.addf %140, %145 : vector<8x648xf32>
    %147 = vector.broadcast %0 : vector<1x648xf32> to vector<8x648xf32>
    %148 = arith.mulf %146, %147 : vector<8x648xf32>
    %cst_83 = arith.constant dense<0.000000e+00> : vector<8xf32>
    %149 = vector.multi_reduction <add>, %148, %cst_83 [1] : vector<8x648xf32> to vector<8xf32>
    %150 = vector.shape_cast %149 : vector<8xf32> to vector<8x1xf32>
    %151 = arith.mulf %146, %146 : vector<8x648xf32>
    %152 = vector.broadcast %0 : vector<1x648xf32> to vector<8x648xf32>
    %153 = arith.mulf %151, %152 : vector<8x648xf32>
    %cst_84 = arith.constant dense<0.000000e+00> : vector<8xf32>
    %154 = vector.multi_reduction <add>, %153, %cst_84 [1] : vector<8x648xf32> to vector<8xf32>
    %155 = vector.shape_cast %154 : vector<8xf32> to vector<8x1xf32>
    %cst_85 = arith.constant 0.001953125 : f32
    %156 = vector.broadcast %cst_85 : f32 to vector<8x1xf32>
    %157 = arith.mulf %150, %156 : vector<8x1xf32>
    %cst_86 = arith.constant 0.001953125 : f32
    %158 = vector.broadcast %cst_86 : f32 to vector<8x1xf32>
    %159 = arith.mulf %155, %158 : vector<8x1xf32>
    %160 = arith.mulf %157, %157 : vector<8x1xf32>
    %161 = arith.subf %159, %160 : vector<8x1xf32>
    %cst_87 = arith.constant 0.000000e+00 : f32
    %162 = vector.broadcast %cst_87 : f32 to vector<8x1xf32>
    %163 = arith.maximumf %161, %162 : vector<8x1xf32>
    %164 = vector.broadcast %157 : vector<8x1xf32> to vector<8x648xf32>
    %165 = arith.subf %146, %164 : vector<8x648xf32>
    %cst_88 = arith.constant 9.99999974E-6 : f32
    %166 = vector.broadcast %cst_88 : f32 to vector<8x1xf32>
    %167 = arith.addf %163, %166 : vector<8x1xf32>
    %168 = math.rsqrt %167 : vector<8x1xf32>
    %169 = vector.broadcast %168 : vector<8x1xf32> to vector<8x648xf32>
    %170 = arith.mulf %165, %169 : vector<8x648xf32>
    %c0_89 = arith.constant 0 : index
    %c0_90 = arith.constant 0 : index
    %171 = vector.load %arg5[%c0_89, %c0_90] : memref<8x1xf32, #tpu.memory_space<vmem>>, vector<8x1xf32>
    %172 = vector.broadcast %171 : vector<8x1xf32> to vector<8x648xf32>
    %173 = arith.mulf %170, %172 : vector<8x648xf32>
    %c0_91 = arith.constant 0 : index
    %c0_92 = arith.constant 0 : index
    %174 = vector.load %arg6[%c0_91, %c0_92] : memref<8x1xf32, #tpu.memory_space<vmem>>, vector<8x1xf32>
    %175 = vector.broadcast %174 : vector<8x1xf32> to vector<8x648xf32>
    %176 = arith.addf %173, %175 : vector<8x648xf32>
    %177 = vector.broadcast %0 : vector<1x648xf32> to vector<8x648xf32>
    %178 = arith.mulf %176, %177 : vector<8x648xf32>
    %179 = vector.extract_strided_slice %2 {offsets = [0, 128], sizes = [8, 648], strides = [1, 1]} : vector<8x896xf32> to vector<8x648xf32>
    %180 = arith.addf %178, %179 : vector<8x648xf32>
    %cst_93 = arith.constant 0.000000e+00 : f32
    %181 = vector.broadcast %cst_93 : f32 to vector<8x648xf32>
    %182 = arith.maximumf %180, %181 : vector<8x648xf32>
    %183 = vector.broadcast %0 : vector<1x648xf32> to vector<8x648xf32>
    %184 = arith.mulf %182, %183 : vector<8x648xf32>
    %cst_94 = arith.constant 0.000000e+00 : bf16
    %185 = vector.broadcast %cst_94 : bf16 to vector<8x896xbf16>
    %c0_95 = arith.constant 0 : index
    %c0_96 = arith.constant 0 : index
    %186 = vector.load %arg8[%c0_95, %c0_96] : memref<8x896xbf16, #tpu.memory_space<vmem>>, vector<8x896xbf16>
    tpu.vector_store %arg8[%c0_95, %c0_96], %185 {strides = array<i32>} : memref<8x896xbf16, #tpu.memory_space<vmem>>, vector<8x896xbf16>,
    %187 = arith.truncf %184 : vector<8x648xf32> to vector<8x648xbf16>
    %c0_97 = arith.constant 0 : index
    %c128_98 = arith.constant 128 : index
    %188 = vector.load %arg8[%c0_97, %c128_98] : memref<8x896xbf16, #tpu.memory_space<vmem>>, vector<8x648xbf16>
    tpu.vector_store %arg8[%c0_97, %c128_98], %187 {strides = array<i32>} : memref<8x896xbf16, #tpu.memory_space<vmem>>, vector<8x648xbf16>,
    return
  }
}

module attributes {stable_mosaic.version = 11 : i64} {
  func.func @kernel(%arg0: memref<4x8x384xbf16, #tpu.memory_space<vmem>>, %arg1: memref<9x16x8xbf16, #tpu.memory_space<vmem>>, %arg2: memref<16x1xf32, #tpu.memory_space<vmem>>, %arg3: memref<16x1xf32, #tpu.memory_space<vmem>>, %arg4: memref<9x16x16xbf16, #tpu.memory_space<vmem>>, %arg5: memref<16x1xf32, #tpu.memory_space<vmem>>, %arg6: memref<16x1xf32, #tpu.memory_space<vmem>>, %arg7: memref<1x16x8xbf16, #tpu.memory_space<vmem>>, %arg8: memref<16x1xf32, #tpu.memory_space<vmem>>, %arg9: memref<16x1xf32, #tpu.memory_space<vmem>>, %arg10: memref<1x200xf32, #tpu.memory_space<vmem>>, %arg11: memref<16x384xbf16, #tpu.memory_space<vmem>>, %arg12: memref<16x456xf32, #tpu.memory_space<vmem>>) attributes {dimension_semantics = [], scalar_prefetch = 0 : i64, scratch_operands = 1 : i64, tpu.core_type = #tpu.core_type<tc>} {
    %c0 = arith.constant 0 : index
    %c0_0 = arith.constant 0 : index
    %0 = vector.load %arg10[%c0, %c0_0] : memref<1x200xf32, #tpu.memory_space<vmem>>, vector<1x200xf32>
    %c0_1 = arith.constant 0 : index
    %c0_2 = arith.constant 0 : index
    %c0_3 = arith.constant 0 : index
    %1 = vector.load %arg0[%c0_1, %c0_2, %c0_3] : memref<4x8x384xbf16, #tpu.memory_space<vmem>>, vector<1x8x384xbf16>
    %2 = vector.shape_cast %1 : vector<1x8x384xbf16> to vector<8x384xbf16>
    %3 = arith.extf %2 : vector<8x384xbf16> to vector<8x384xf32>
    %c1 = arith.constant 1 : index
    %c0_4 = arith.constant 0 : index
    %c0_5 = arith.constant 0 : index
    %4 = vector.load %arg0[%c1, %c0_4, %c0_5] : memref<4x8x384xbf16, #tpu.memory_space<vmem>>, vector<1x8x384xbf16>
    %5 = vector.shape_cast %4 : vector<1x8x384xbf16> to vector<8x384xbf16>
    %6 = arith.extf %5 : vector<8x384xbf16> to vector<8x384xf32>
    %c2 = arith.constant 2 : index
    %c0_6 = arith.constant 0 : index
    %c0_7 = arith.constant 0 : index
    %7 = vector.load %arg0[%c2, %c0_6, %c0_7] : memref<4x8x384xbf16, #tpu.memory_space<vmem>>, vector<1x8x384xbf16>
    %8 = vector.shape_cast %7 : vector<1x8x384xbf16> to vector<8x384xbf16>
    %9 = arith.extf %8 : vector<8x384xbf16> to vector<8x384xf32>
    %c3 = arith.constant 3 : index
    %c0_8 = arith.constant 0 : index
    %c0_9 = arith.constant 0 : index
    %10 = vector.load %arg0[%c3, %c0_8, %c0_9] : memref<4x8x384xbf16, #tpu.memory_space<vmem>>, vector<1x8x384xbf16>
    %11 = vector.shape_cast %10 : vector<1x8x384xbf16> to vector<8x384xbf16>
    %12 = arith.extf %11 : vector<8x384xbf16> to vector<8x384xf32>
    %13 = vector.extract_strided_slice %12 {offsets = [0, 117], sizes = [8, 200], strides = [1, 1]} : vector<8x384xf32> to vector<8x200xf32>
    %14 = arith.truncf %13 : vector<8x200xf32> to vector<8x200xbf16>
    %c0_10 = arith.constant 0 : index
    %c0_11 = arith.constant 0 : index
    %c0_12 = arith.constant 0 : index
    %15 = vector.load %arg1[%c0_10, %c0_11, %c0_12] : memref<9x16x8xbf16, #tpu.memory_space<vmem>>, vector<1x16x8xbf16>
    %16 = vector.shape_cast %15 : vector<1x16x8xbf16> to vector<16x8xbf16>
    %cst = arith.constant dense<0.000000e+00> : vector<16x200xf32>
    %17 = tpu.matmul %16, %14, %cst {dimension_numbers = #tpu.dot_dimension_numbers<[1], [0], [0], [1], [0, 0, 1, 1], [], []>} : vector<16x8xbf16>, vector<8x200xbf16>, vector<16x200xf32> -> vector<16x200xf32>
    %18 = vector.extract_strided_slice %9 {offsets = [0, 118], sizes = [8, 200], strides = [1, 1]} : vector<8x384xf32> to vector<8x200xf32>
    %19 = arith.truncf %18 : vector<8x200xf32> to vector<8x200xbf16>
    %c1_13 = arith.constant 1 : index
    %c0_14 = arith.constant 0 : index
    %c0_15 = arith.constant 0 : index
    %20 = vector.load %arg1[%c1_13, %c0_14, %c0_15] : memref<9x16x8xbf16, #tpu.memory_space<vmem>>, vector<1x16x8xbf16>
    %21 = vector.shape_cast %20 : vector<1x16x8xbf16> to vector<16x8xbf16>
    %cst_16 = arith.constant dense<0.000000e+00> : vector<16x200xf32>
    %22 = tpu.matmul %21, %19, %cst_16 {dimension_numbers = #tpu.dot_dimension_numbers<[1], [0], [0], [1], [0, 0, 1, 1], [], []>} : vector<16x8xbf16>, vector<8x200xbf16>, vector<16x200xf32> -> vector<16x200xf32>
    %23 = arith.addf %17, %22 : vector<16x200xf32>
    %24 = vector.extract_strided_slice %12 {offsets = [0, 118], sizes = [8, 200], strides = [1, 1]} : vector<8x384xf32> to vector<8x200xf32>
    %25 = arith.truncf %24 : vector<8x200xf32> to vector<8x200xbf16>
    %c2_17 = arith.constant 2 : index
    %c0_18 = arith.constant 0 : index
    %c0_19 = arith.constant 0 : index
    %26 = vector.load %arg1[%c2_17, %c0_18, %c0_19] : memref<9x16x8xbf16, #tpu.memory_space<vmem>>, vector<1x16x8xbf16>
    %27 = vector.shape_cast %26 : vector<1x16x8xbf16> to vector<16x8xbf16>
    %cst_20 = arith.constant dense<0.000000e+00> : vector<16x200xf32>
    %28 = tpu.matmul %27, %25, %cst_20 {dimension_numbers = #tpu.dot_dimension_numbers<[1], [0], [0], [1], [0, 0, 1, 1], [], []>} : vector<16x8xbf16>, vector<8x200xbf16>, vector<16x200xf32> -> vector<16x200xf32>
    %29 = arith.addf %23, %28 : vector<16x200xf32>
    %30 = vector.extract_strided_slice %6 {offsets = [0, 127], sizes = [8, 200], strides = [1, 1]} : vector<8x384xf32> to vector<8x200xf32>
    %31 = arith.truncf %30 : vector<8x200xf32> to vector<8x200xbf16>
    %c3_21 = arith.constant 3 : index
    %c0_22 = arith.constant 0 : index
    %c0_23 = arith.constant 0 : index
    %32 = vector.load %arg1[%c3_21, %c0_22, %c0_23] : memref<9x16x8xbf16, #tpu.memory_space<vmem>>, vector<1x16x8xbf16>
    %33 = vector.shape_cast %32 : vector<1x16x8xbf16> to vector<16x8xbf16>
    %cst_24 = arith.constant dense<0.000000e+00> : vector<16x200xf32>
    %34 = tpu.matmul %33, %31, %cst_24 {dimension_numbers = #tpu.dot_dimension_numbers<[1], [0], [0], [1], [0, 0, 1, 1], [], []>} : vector<16x8xbf16>, vector<8x200xbf16>, vector<16x200xf32> -> vector<16x200xf32>
    %35 = arith.addf %29, %34 : vector<16x200xf32>
    %36 = vector.extract_strided_slice %3 {offsets = [0, 128], sizes = [8, 200], strides = [1, 1]} : vector<8x384xf32> to vector<8x200xf32>
    %37 = arith.truncf %36 : vector<8x200xf32> to vector<8x200xbf16>
    %c4 = arith.constant 4 : index
    %c0_25 = arith.constant 0 : index
    %c0_26 = arith.constant 0 : index
    %38 = vector.load %arg1[%c4, %c0_25, %c0_26] : memref<9x16x8xbf16, #tpu.memory_space<vmem>>, vector<1x16x8xbf16>
    %39 = vector.shape_cast %38 : vector<1x16x8xbf16> to vector<16x8xbf16>
    %cst_27 = arith.constant dense<0.000000e+00> : vector<16x200xf32>
    %40 = tpu.matmul %39, %37, %cst_27 {dimension_numbers = #tpu.dot_dimension_numbers<[1], [0], [0], [1], [0, 0, 1, 1], [], []>} : vector<16x8xbf16>, vector<8x200xbf16>, vector<16x200xf32> -> vector<16x200xf32>
    %41 = arith.addf %35, %40 : vector<16x200xf32>
    %42 = vector.extract_strided_slice %6 {offsets = [0, 128], sizes = [8, 200], strides = [1, 1]} : vector<8x384xf32> to vector<8x200xf32>
    %43 = arith.truncf %42 : vector<8x200xf32> to vector<8x200xbf16>
    %c5 = arith.constant 5 : index
    %c0_28 = arith.constant 0 : index
    %c0_29 = arith.constant 0 : index
    %44 = vector.load %arg1[%c5, %c0_28, %c0_29] : memref<9x16x8xbf16, #tpu.memory_space<vmem>>, vector<1x16x8xbf16>
    %45 = vector.shape_cast %44 : vector<1x16x8xbf16> to vector<16x8xbf16>
    %cst_30 = arith.constant dense<0.000000e+00> : vector<16x200xf32>
    %46 = tpu.matmul %45, %43, %cst_30 {dimension_numbers = #tpu.dot_dimension_numbers<[1], [0], [0], [1], [0, 0, 1, 1], [], []>} : vector<16x8xbf16>, vector<8x200xbf16>, vector<16x200xf32> -> vector<16x200xf32>
    %47 = arith.addf %41, %46 : vector<16x200xf32>
    %48 = vector.extract_strided_slice %12 {offsets = [0, 127], sizes = [8, 200], strides = [1, 1]} : vector<8x384xf32> to vector<8x200xf32>
    %49 = arith.truncf %48 : vector<8x200xf32> to vector<8x200xbf16>
    %c6 = arith.constant 6 : index
    %c0_31 = arith.constant 0 : index
    %c0_32 = arith.constant 0 : index
    %50 = vector.load %arg1[%c6, %c0_31, %c0_32] : memref<9x16x8xbf16, #tpu.memory_space<vmem>>, vector<1x16x8xbf16>
    %51 = vector.shape_cast %50 : vector<1x16x8xbf16> to vector<16x8xbf16>
    %cst_33 = arith.constant dense<0.000000e+00> : vector<16x200xf32>
    %52 = tpu.matmul %51, %49, %cst_33 {dimension_numbers = #tpu.dot_dimension_numbers<[1], [0], [0], [1], [0, 0, 1, 1], [], []>} : vector<16x8xbf16>, vector<8x200xbf16>, vector<16x200xf32> -> vector<16x200xf32>
    %53 = arith.addf %47, %52 : vector<16x200xf32>
    %54 = vector.extract_strided_slice %9 {offsets = [0, 128], sizes = [8, 200], strides = [1, 1]} : vector<8x384xf32> to vector<8x200xf32>
    %55 = arith.truncf %54 : vector<8x200xf32> to vector<8x200xbf16>
    %c7 = arith.constant 7 : index
    %c0_34 = arith.constant 0 : index
    %c0_35 = arith.constant 0 : index
    %56 = vector.load %arg1[%c7, %c0_34, %c0_35] : memref<9x16x8xbf16, #tpu.memory_space<vmem>>, vector<1x16x8xbf16>
    %57 = vector.shape_cast %56 : vector<1x16x8xbf16> to vector<16x8xbf16>
    %cst_36 = arith.constant dense<0.000000e+00> : vector<16x200xf32>
    %58 = tpu.matmul %57, %55, %cst_36 {dimension_numbers = #tpu.dot_dimension_numbers<[1], [0], [0], [1], [0, 0, 1, 1], [], []>} : vector<16x8xbf16>, vector<8x200xbf16>, vector<16x200xf32> -> vector<16x200xf32>
    %59 = arith.addf %53, %58 : vector<16x200xf32>
    %60 = vector.extract_strided_slice %12 {offsets = [0, 128], sizes = [8, 200], strides = [1, 1]} : vector<8x384xf32> to vector<8x200xf32>
    %61 = arith.truncf %60 : vector<8x200xf32> to vector<8x200xbf16>
    %c8 = arith.constant 8 : index
    %c0_37 = arith.constant 0 : index
    %c0_38 = arith.constant 0 : index
    %62 = vector.load %arg1[%c8, %c0_37, %c0_38] : memref<9x16x8xbf16, #tpu.memory_space<vmem>>, vector<1x16x8xbf16>
    %63 = vector.shape_cast %62 : vector<1x16x8xbf16> to vector<16x8xbf16>
    %cst_39 = arith.constant dense<0.000000e+00> : vector<16x200xf32>
    %64 = tpu.matmul %63, %61, %cst_39 {dimension_numbers = #tpu.dot_dimension_numbers<[1], [0], [0], [1], [0, 0, 1, 1], [], []>} : vector<16x8xbf16>, vector<8x200xbf16>, vector<16x200xf32> -> vector<16x200xf32>
    %65 = arith.addf %59, %64 : vector<16x200xf32>
    %66 = vector.broadcast %0 : vector<1x200xf32> to vector<16x200xf32>
    %67 = arith.mulf %65, %66 : vector<16x200xf32>
    %cst_40 = arith.constant dense<0.000000e+00> : vector<16xf32>
    %68 = vector.multi_reduction <add>, %67, %cst_40 [1] : vector<16x200xf32> to vector<16xf32>
    %69 = vector.shape_cast %68 : vector<16xf32> to vector<16x1xf32>
    %70 = arith.mulf %65, %65 : vector<16x200xf32>
    %71 = vector.broadcast %0 : vector<1x200xf32> to vector<16x200xf32>
    %72 = arith.mulf %70, %71 : vector<16x200xf32>
    %cst_41 = arith.constant dense<0.000000e+00> : vector<16xf32>
    %73 = vector.multi_reduction <add>, %72, %cst_41 [1] : vector<16x200xf32> to vector<16xf32>
    %74 = vector.shape_cast %73 : vector<16xf32> to vector<16x1xf32>
    %cst_42 = arith.constant 7.812500e-03 : f32
    %75 = vector.broadcast %cst_42 : f32 to vector<16x1xf32>
    %76 = arith.mulf %69, %75 : vector<16x1xf32>
    %cst_43 = arith.constant 7.812500e-03 : f32
    %77 = vector.broadcast %cst_43 : f32 to vector<16x1xf32>
    %78 = arith.mulf %74, %77 : vector<16x1xf32>
    %79 = arith.mulf %76, %76 : vector<16x1xf32>
    %80 = arith.subf %78, %79 : vector<16x1xf32>
    %cst_44 = arith.constant 0.000000e+00 : f32
    %81 = vector.broadcast %cst_44 : f32 to vector<16x1xf32>
    %82 = arith.maximumf %80, %81 : vector<16x1xf32>
    %83 = vector.broadcast %76 : vector<16x1xf32> to vector<16x200xf32>
    %84 = arith.subf %65, %83 : vector<16x200xf32>
    %cst_45 = arith.constant 9.99999974E-6 : f32
    %85 = vector.broadcast %cst_45 : f32 to vector<16x1xf32>
    %86 = arith.addf %82, %85 : vector<16x1xf32>
    %87 = math.rsqrt %86 : vector<16x1xf32>
    %88 = vector.broadcast %87 : vector<16x1xf32> to vector<16x200xf32>
    %89 = arith.mulf %84, %88 : vector<16x200xf32>
    %c0_46 = arith.constant 0 : index
    %c0_47 = arith.constant 0 : index
    %90 = vector.load %arg2[%c0_46, %c0_47] : memref<16x1xf32, #tpu.memory_space<vmem>>, vector<16x1xf32>
    %91 = vector.broadcast %90 : vector<16x1xf32> to vector<16x200xf32>
    %92 = arith.mulf %89, %91 : vector<16x200xf32>
    %c0_48 = arith.constant 0 : index
    %c0_49 = arith.constant 0 : index
    %93 = vector.load %arg3[%c0_48, %c0_49] : memref<16x1xf32, #tpu.memory_space<vmem>>, vector<16x1xf32>
    %94 = vector.broadcast %93 : vector<16x1xf32> to vector<16x200xf32>
    %95 = arith.addf %92, %94 : vector<16x200xf32>
    %cst_50 = arith.constant 0.000000e+00 : f32
    %96 = vector.broadcast %cst_50 : f32 to vector<16x200xf32>
    %97 = arith.maximumf %95, %96 : vector<16x200xf32>
    %98 = vector.broadcast %0 : vector<1x200xf32> to vector<16x200xf32>
    %99 = arith.mulf %97, %98 : vector<16x200xf32>
    %cst_51 = arith.constant 0.000000e+00 : f32
    %100 = vector.broadcast %cst_51 : f32 to vector<16x456xf32>
    %c0_52 = arith.constant 0 : index
    %c0_53 = arith.constant 0 : index
    %101 = vector.load %arg12[%c0_52, %c0_53] : memref<16x456xf32, #tpu.memory_space<vmem>>, vector<16x456xf32>
    tpu.vector_store %arg12[%c0_52, %c0_53], %100 {strides = array<i32>} : memref<16x456xf32, #tpu.memory_space<vmem>>, vector<16x456xf32>,
    %c0_54 = arith.constant 0 : index
    %c128 = arith.constant 128 : index
    %102 = vector.load %arg12[%c0_54, %c128] : memref<16x456xf32, #tpu.memory_space<vmem>>, vector<16x200xf32>
    tpu.vector_store %arg12[%c0_54, %c128], %99 {strides = array<i32>} : memref<16x456xf32, #tpu.memory_space<vmem>>, vector<16x200xf32>,
    %c0_55 = arith.constant 0 : index
    %c0_56 = arith.constant 0 : index
    %103 = vector.load %arg12[%c0_55, %c0_56] : memref<16x456xf32, #tpu.memory_space<vmem>>, vector<16x456xf32>
    %104 = vector.extract_strided_slice %103 {offsets = [0, 117], sizes = [16, 200], strides = [1, 1]} : vector<16x456xf32> to vector<16x200xf32>
    %105 = arith.truncf %104 : vector<16x200xf32> to vector<16x200xbf16>
    %c0_57 = arith.constant 0 : index
    %c0_58 = arith.constant 0 : index
    %c0_59 = arith.constant 0 : index
    %106 = vector.load %arg4[%c0_57, %c0_58, %c0_59] : memref<9x16x16xbf16, #tpu.memory_space<vmem>>, vector<1x16x16xbf16>
    %107 = vector.shape_cast %106 : vector<1x16x16xbf16> to vector<16x16xbf16>
    %cst_60 = arith.constant dense<0.000000e+00> : vector<16x200xf32>
    %108 = tpu.matmul %107, %105, %cst_60 {dimension_numbers = #tpu.dot_dimension_numbers<[1], [0], [0], [1], [0, 0, 1, 1], [], []>} : vector<16x16xbf16>, vector<16x200xbf16>, vector<16x200xf32> -> vector<16x200xf32>
    %109 = vector.extract_strided_slice %103 {offsets = [0, 118], sizes = [16, 200], strides = [1, 1]} : vector<16x456xf32> to vector<16x200xf32>
    %110 = arith.truncf %109 : vector<16x200xf32> to vector<16x200xbf16>
    %c1_61 = arith.constant 1 : index
    %c0_62 = arith.constant 0 : index
    %c0_63 = arith.constant 0 : index
    %111 = vector.load %arg4[%c1_61, %c0_62, %c0_63] : memref<9x16x16xbf16, #tpu.memory_space<vmem>>, vector<1x16x16xbf16>
    %112 = vector.shape_cast %111 : vector<1x16x16xbf16> to vector<16x16xbf16>
    %cst_64 = arith.constant dense<0.000000e+00> : vector<16x200xf32>
    %113 = tpu.matmul %112, %110, %cst_64 {dimension_numbers = #tpu.dot_dimension_numbers<[1], [0], [0], [1], [0, 0, 1, 1], [], []>} : vector<16x16xbf16>, vector<16x200xbf16>, vector<16x200xf32> -> vector<16x200xf32>
    %114 = arith.addf %108, %113 : vector<16x200xf32>
    %115 = vector.extract_strided_slice %103 {offsets = [0, 119], sizes = [16, 200], strides = [1, 1]} : vector<16x456xf32> to vector<16x200xf32>
    %116 = arith.truncf %115 : vector<16x200xf32> to vector<16x200xbf16>
    %c2_65 = arith.constant 2 : index
    %c0_66 = arith.constant 0 : index
    %c0_67 = arith.constant 0 : index
    %117 = vector.load %arg4[%c2_65, %c0_66, %c0_67] : memref<9x16x16xbf16, #tpu.memory_space<vmem>>, vector<1x16x16xbf16>
    %118 = vector.shape_cast %117 : vector<1x16x16xbf16> to vector<16x16xbf16>
    %cst_68 = arith.constant dense<0.000000e+00> : vector<16x200xf32>
    %119 = tpu.matmul %118, %116, %cst_68 {dimension_numbers = #tpu.dot_dimension_numbers<[1], [0], [0], [1], [0, 0, 1, 1], [], []>} : vector<16x16xbf16>, vector<16x200xbf16>, vector<16x200xf32> -> vector<16x200xf32>
    %120 = arith.addf %114, %119 : vector<16x200xf32>
    %121 = vector.extract_strided_slice %103 {offsets = [0, 127], sizes = [16, 200], strides = [1, 1]} : vector<16x456xf32> to vector<16x200xf32>
    %122 = arith.truncf %121 : vector<16x200xf32> to vector<16x200xbf16>
    %c3_69 = arith.constant 3 : index
    %c0_70 = arith.constant 0 : index
    %c0_71 = arith.constant 0 : index
    %123 = vector.load %arg4[%c3_69, %c0_70, %c0_71] : memref<9x16x16xbf16, #tpu.memory_space<vmem>>, vector<1x16x16xbf16>
    %124 = vector.shape_cast %123 : vector<1x16x16xbf16> to vector<16x16xbf16>
    %cst_72 = arith.constant dense<0.000000e+00> : vector<16x200xf32>
    %125 = tpu.matmul %124, %122, %cst_72 {dimension_numbers = #tpu.dot_dimension_numbers<[1], [0], [0], [1], [0, 0, 1, 1], [], []>} : vector<16x16xbf16>, vector<16x200xbf16>, vector<16x200xf32> -> vector<16x200xf32>
    %126 = arith.addf %120, %125 : vector<16x200xf32>
    %127 = vector.extract_strided_slice %103 {offsets = [0, 128], sizes = [16, 200], strides = [1, 1]} : vector<16x456xf32> to vector<16x200xf32>
    %128 = arith.truncf %127 : vector<16x200xf32> to vector<16x200xbf16>
    %c4_73 = arith.constant 4 : index
    %c0_74 = arith.constant 0 : index
    %c0_75 = arith.constant 0 : index
    %129 = vector.load %arg4[%c4_73, %c0_74, %c0_75] : memref<9x16x16xbf16, #tpu.memory_space<vmem>>, vector<1x16x16xbf16>
    %130 = vector.shape_cast %129 : vector<1x16x16xbf16> to vector<16x16xbf16>
    %cst_76 = arith.constant dense<0.000000e+00> : vector<16x200xf32>
    %131 = tpu.matmul %130, %128, %cst_76 {dimension_numbers = #tpu.dot_dimension_numbers<[1], [0], [0], [1], [0, 0, 1, 1], [], []>} : vector<16x16xbf16>, vector<16x200xbf16>, vector<16x200xf32> -> vector<16x200xf32>
    %132 = arith.addf %126, %131 : vector<16x200xf32>
    %133 = vector.extract_strided_slice %103 {offsets = [0, 129], sizes = [16, 200], strides = [1, 1]} : vector<16x456xf32> to vector<16x200xf32>
    %134 = arith.truncf %133 : vector<16x200xf32> to vector<16x200xbf16>
    %c5_77 = arith.constant 5 : index
    %c0_78 = arith.constant 0 : index
    %c0_79 = arith.constant 0 : index
    %135 = vector.load %arg4[%c5_77, %c0_78, %c0_79] : memref<9x16x16xbf16, #tpu.memory_space<vmem>>, vector<1x16x16xbf16>
    %136 = vector.shape_cast %135 : vector<1x16x16xbf16> to vector<16x16xbf16>
    %cst_80 = arith.constant dense<0.000000e+00> : vector<16x200xf32>
    %137 = tpu.matmul %136, %134, %cst_80 {dimension_numbers = #tpu.dot_dimension_numbers<[1], [0], [0], [1], [0, 0, 1, 1], [], []>} : vector<16x16xbf16>, vector<16x200xbf16>, vector<16x200xf32> -> vector<16x200xf32>
    %138 = arith.addf %132, %137 : vector<16x200xf32>
    %139 = vector.extract_strided_slice %103 {offsets = [0, 137], sizes = [16, 200], strides = [1, 1]} : vector<16x456xf32> to vector<16x200xf32>
    %140 = arith.truncf %139 : vector<16x200xf32> to vector<16x200xbf16>
    %c6_81 = arith.constant 6 : index
    %c0_82 = arith.constant 0 : index
    %c0_83 = arith.constant 0 : index
    %141 = vector.load %arg4[%c6_81, %c0_82, %c0_83] : memref<9x16x16xbf16, #tpu.memory_space<vmem>>, vector<1x16x16xbf16>
    %142 = vector.shape_cast %141 : vector<1x16x16xbf16> to vector<16x16xbf16>
    %cst_84 = arith.constant dense<0.000000e+00> : vector<16x200xf32>
    %143 = tpu.matmul %142, %140, %cst_84 {dimension_numbers = #tpu.dot_dimension_numbers<[1], [0], [0], [1], [0, 0, 1, 1], [], []>} : vector<16x16xbf16>, vector<16x200xbf16>, vector<16x200xf32> -> vector<16x200xf32>
    %144 = arith.addf %138, %143 : vector<16x200xf32>
    %145 = vector.extract_strided_slice %103 {offsets = [0, 138], sizes = [16, 200], strides = [1, 1]} : vector<16x456xf32> to vector<16x200xf32>
    %146 = arith.truncf %145 : vector<16x200xf32> to vector<16x200xbf16>
    %c7_85 = arith.constant 7 : index
    %c0_86 = arith.constant 0 : index
    %c0_87 = arith.constant 0 : index
    %147 = vector.load %arg4[%c7_85, %c0_86, %c0_87] : memref<9x16x16xbf16, #tpu.memory_space<vmem>>, vector<1x16x16xbf16>
    %148 = vector.shape_cast %147 : vector<1x16x16xbf16> to vector<16x16xbf16>
    %cst_88 = arith.constant dense<0.000000e+00> : vector<16x200xf32>
    %149 = tpu.matmul %148, %146, %cst_88 {dimension_numbers = #tpu.dot_dimension_numbers<[1], [0], [0], [1], [0, 0, 1, 1], [], []>} : vector<16x16xbf16>, vector<16x200xbf16>, vector<16x200xf32> -> vector<16x200xf32>
    %150 = arith.addf %144, %149 : vector<16x200xf32>
    %151 = vector.extract_strided_slice %103 {offsets = [0, 139], sizes = [16, 200], strides = [1, 1]} : vector<16x456xf32> to vector<16x200xf32>
    %152 = arith.truncf %151 : vector<16x200xf32> to vector<16x200xbf16>
    %c8_89 = arith.constant 8 : index
    %c0_90 = arith.constant 0 : index
    %c0_91 = arith.constant 0 : index
    %153 = vector.load %arg4[%c8_89, %c0_90, %c0_91] : memref<9x16x16xbf16, #tpu.memory_space<vmem>>, vector<1x16x16xbf16>
    %154 = vector.shape_cast %153 : vector<1x16x16xbf16> to vector<16x16xbf16>
    %cst_92 = arith.constant dense<0.000000e+00> : vector<16x200xf32>
    %155 = tpu.matmul %154, %152, %cst_92 {dimension_numbers = #tpu.dot_dimension_numbers<[1], [0], [0], [1], [0, 0, 1, 1], [], []>} : vector<16x16xbf16>, vector<16x200xbf16>, vector<16x200xf32> -> vector<16x200xf32>
    %156 = arith.addf %150, %155 : vector<16x200xf32>
    %157 = vector.broadcast %0 : vector<1x200xf32> to vector<16x200xf32>
    %158 = arith.mulf %156, %157 : vector<16x200xf32>
    %cst_93 = arith.constant dense<0.000000e+00> : vector<16xf32>
    %159 = vector.multi_reduction <add>, %158, %cst_93 [1] : vector<16x200xf32> to vector<16xf32>
    %160 = vector.shape_cast %159 : vector<16xf32> to vector<16x1xf32>
    %161 = arith.mulf %156, %156 : vector<16x200xf32>
    %162 = vector.broadcast %0 : vector<1x200xf32> to vector<16x200xf32>
    %163 = arith.mulf %161, %162 : vector<16x200xf32>
    %cst_94 = arith.constant dense<0.000000e+00> : vector<16xf32>
    %164 = vector.multi_reduction <add>, %163, %cst_94 [1] : vector<16x200xf32> to vector<16xf32>
    %165 = vector.shape_cast %164 : vector<16xf32> to vector<16x1xf32>
    %cst_95 = arith.constant 7.812500e-03 : f32
    %166 = vector.broadcast %cst_95 : f32 to vector<16x1xf32>
    %167 = arith.mulf %160, %166 : vector<16x1xf32>
    %cst_96 = arith.constant 7.812500e-03 : f32
    %168 = vector.broadcast %cst_96 : f32 to vector<16x1xf32>
    %169 = arith.mulf %165, %168 : vector<16x1xf32>
    %170 = arith.mulf %167, %167 : vector<16x1xf32>
    %171 = arith.subf %169, %170 : vector<16x1xf32>
    %cst_97 = arith.constant 0.000000e+00 : f32
    %172 = vector.broadcast %cst_97 : f32 to vector<16x1xf32>
    %173 = arith.maximumf %171, %172 : vector<16x1xf32>
    %174 = vector.broadcast %167 : vector<16x1xf32> to vector<16x200xf32>
    %175 = arith.subf %156, %174 : vector<16x200xf32>
    %cst_98 = arith.constant 9.99999974E-6 : f32
    %176 = vector.broadcast %cst_98 : f32 to vector<16x1xf32>
    %177 = arith.addf %173, %176 : vector<16x1xf32>
    %178 = math.rsqrt %177 : vector<16x1xf32>
    %179 = vector.broadcast %178 : vector<16x1xf32> to vector<16x200xf32>
    %180 = arith.mulf %175, %179 : vector<16x200xf32>
    %c0_99 = arith.constant 0 : index
    %c0_100 = arith.constant 0 : index
    %181 = vector.load %arg5[%c0_99, %c0_100] : memref<16x1xf32, #tpu.memory_space<vmem>>, vector<16x1xf32>
    %182 = vector.broadcast %181 : vector<16x1xf32> to vector<16x200xf32>
    %183 = arith.mulf %180, %182 : vector<16x200xf32>
    %c0_101 = arith.constant 0 : index
    %c0_102 = arith.constant 0 : index
    %184 = vector.load %arg6[%c0_101, %c0_102] : memref<16x1xf32, #tpu.memory_space<vmem>>, vector<16x1xf32>
    %185 = vector.broadcast %184 : vector<16x1xf32> to vector<16x200xf32>
    %186 = arith.addf %183, %185 : vector<16x200xf32>
    %187 = vector.broadcast %0 : vector<1x200xf32> to vector<16x200xf32>
    %188 = arith.mulf %186, %187 : vector<16x200xf32>
    %189 = vector.extract_strided_slice %3 {offsets = [0, 128], sizes = [8, 200], strides = [1, 1]} : vector<8x384xf32> to vector<8x200xf32>
    %190 = arith.truncf %189 : vector<8x200xf32> to vector<8x200xbf16>
    %c0_103 = arith.constant 0 : index
    %c0_104 = arith.constant 0 : index
    %c0_105 = arith.constant 0 : index
    %191 = vector.load %arg7[%c0_103, %c0_104, %c0_105] : memref<1x16x8xbf16, #tpu.memory_space<vmem>>, vector<1x16x8xbf16>
    %192 = vector.shape_cast %191 : vector<1x16x8xbf16> to vector<16x8xbf16>
    %cst_106 = arith.constant dense<0.000000e+00> : vector<16x200xf32>
    %193 = tpu.matmul %192, %190, %cst_106 {dimension_numbers = #tpu.dot_dimension_numbers<[1], [0], [0], [1], [0, 0, 1, 1], [], []>} : vector<16x8xbf16>, vector<8x200xbf16>, vector<16x200xf32> -> vector<16x200xf32>
    %194 = vector.broadcast %0 : vector<1x200xf32> to vector<16x200xf32>
    %195 = arith.mulf %193, %194 : vector<16x200xf32>
    %cst_107 = arith.constant dense<0.000000e+00> : vector<16xf32>
    %196 = vector.multi_reduction <add>, %195, %cst_107 [1] : vector<16x200xf32> to vector<16xf32>
    %197 = vector.shape_cast %196 : vector<16xf32> to vector<16x1xf32>
    %198 = arith.mulf %193, %193 : vector<16x200xf32>
    %199 = vector.broadcast %0 : vector<1x200xf32> to vector<16x200xf32>
    %200 = arith.mulf %198, %199 : vector<16x200xf32>
    %cst_108 = arith.constant dense<0.000000e+00> : vector<16xf32>
    %201 = vector.multi_reduction <add>, %200, %cst_108 [1] : vector<16x200xf32> to vector<16xf32>
    %202 = vector.shape_cast %201 : vector<16xf32> to vector<16x1xf32>
    %cst_109 = arith.constant 7.812500e-03 : f32
    %203 = vector.broadcast %cst_109 : f32 to vector<16x1xf32>
    %204 = arith.mulf %197, %203 : vector<16x1xf32>
    %cst_110 = arith.constant 7.812500e-03 : f32
    %205 = vector.broadcast %cst_110 : f32 to vector<16x1xf32>
    %206 = arith.mulf %202, %205 : vector<16x1xf32>
    %207 = arith.mulf %204, %204 : vector<16x1xf32>
    %208 = arith.subf %206, %207 : vector<16x1xf32>
    %cst_111 = arith.constant 0.000000e+00 : f32
    %209 = vector.broadcast %cst_111 : f32 to vector<16x1xf32>
    %210 = arith.maximumf %208, %209 : vector<16x1xf32>
    %211 = vector.broadcast %204 : vector<16x1xf32> to vector<16x200xf32>
    %212 = arith.subf %193, %211 : vector<16x200xf32>
    %cst_112 = arith.constant 9.99999974E-6 : f32
    %213 = vector.broadcast %cst_112 : f32 to vector<16x1xf32>
    %214 = arith.addf %210, %213 : vector<16x1xf32>
    %215 = math.rsqrt %214 : vector<16x1xf32>
    %216 = vector.broadcast %215 : vector<16x1xf32> to vector<16x200xf32>
    %217 = arith.mulf %212, %216 : vector<16x200xf32>
    %c0_113 = arith.constant 0 : index
    %c0_114 = arith.constant 0 : index
    %218 = vector.load %arg8[%c0_113, %c0_114] : memref<16x1xf32, #tpu.memory_space<vmem>>, vector<16x1xf32>
    %219 = vector.broadcast %218 : vector<16x1xf32> to vector<16x200xf32>
    %220 = arith.mulf %217, %219 : vector<16x200xf32>
    %c0_115 = arith.constant 0 : index
    %c0_116 = arith.constant 0 : index
    %221 = vector.load %arg9[%c0_115, %c0_116] : memref<16x1xf32, #tpu.memory_space<vmem>>, vector<16x1xf32>
    %222 = vector.broadcast %221 : vector<16x1xf32> to vector<16x200xf32>
    %223 = arith.addf %220, %222 : vector<16x200xf32>
    %224 = vector.broadcast %0 : vector<1x200xf32> to vector<16x200xf32>
    %225 = arith.mulf %223, %224 : vector<16x200xf32>
    %226 = arith.addf %188, %225 : vector<16x200xf32>
    %cst_117 = arith.constant 0.000000e+00 : f32
    %227 = vector.broadcast %cst_117 : f32 to vector<16x200xf32>
    %228 = arith.maximumf %226, %227 : vector<16x200xf32>
    %229 = vector.broadcast %0 : vector<1x200xf32> to vector<16x200xf32>
    %230 = arith.mulf %228, %229 : vector<16x200xf32>
    %cst_118 = arith.constant 0.000000e+00 : bf16
    %231 = vector.broadcast %cst_118 : bf16 to vector<16x384xbf16>
    %c0_119 = arith.constant 0 : index
    %c0_120 = arith.constant 0 : index
    %232 = vector.load %arg11[%c0_119, %c0_120] : memref<16x384xbf16, #tpu.memory_space<vmem>>, vector<16x384xbf16>
    tpu.vector_store %arg11[%c0_119, %c0_120], %231 {strides = array<i32>} : memref<16x384xbf16, #tpu.memory_space<vmem>>, vector<16x384xbf16>,
    %233 = arith.truncf %230 : vector<16x200xf32> to vector<16x200xbf16>
    %c0_121 = arith.constant 0 : index
    %c128_122 = arith.constant 128 : index
    %234 = vector.load %arg11[%c0_121, %c128_122] : memref<16x384xbf16, #tpu.memory_space<vmem>>, vector<16x200xbf16>
    tpu.vector_store %arg11[%c0_121, %c128_122], %233 {strides = array<i32>} : memref<16x384xbf16, #tpu.memory_space<vmem>>, vector<16x200xbf16>,
    return
  }
}

module attributes {stable_mosaic.version = 11 : i64} {
  func.func @kernel(%arg0: memref<4x16x256xbf16, #tpu.memory_space<vmem>>, %arg1: memref<9x32x16xbf16, #tpu.memory_space<vmem>>, %arg2: memref<32x1xf32, #tpu.memory_space<vmem>>, %arg3: memref<32x1xf32, #tpu.memory_space<vmem>>, %arg4: memref<9x32x32xbf16, #tpu.memory_space<vmem>>, %arg5: memref<32x1xf32, #tpu.memory_space<vmem>>, %arg6: memref<32x1xf32, #tpu.memory_space<vmem>>, %arg7: memref<1x32x16xbf16, #tpu.memory_space<vmem>>, %arg8: memref<32x1xf32, #tpu.memory_space<vmem>>, %arg9: memref<32x1xf32, #tpu.memory_space<vmem>>, %arg10: memref<1x72xf32, #tpu.memory_space<vmem>>, %arg11: memref<72x2xf32, #tpu.memory_space<vmem>>, %arg12: memref<10x32xf32, #tpu.memory_space<vmem>>, %arg13: memref<10x1xf32, #tpu.memory_space<vmem>>, %arg14: memref<10x2xf32, #tpu.memory_space<vmem>>, %arg15: memref<32x328xf32, #tpu.memory_space<vmem>>) attributes {dimension_semantics = [], scalar_prefetch = 0 : i64, scratch_operands = 1 : i64, tpu.core_type = #tpu.core_type<tc>} {
    %c0 = arith.constant 0 : index
    %c0_0 = arith.constant 0 : index
    %0 = vector.load %arg10[%c0, %c0_0] : memref<1x72xf32, #tpu.memory_space<vmem>>, vector<1x72xf32>
    %c0_1 = arith.constant 0 : index
    %c0_2 = arith.constant 0 : index
    %c0_3 = arith.constant 0 : index
    %1 = vector.load %arg0[%c0_1, %c0_2, %c0_3] : memref<4x16x256xbf16, #tpu.memory_space<vmem>>, vector<1x16x256xbf16>
    %2 = vector.shape_cast %1 : vector<1x16x256xbf16> to vector<16x256xbf16>
    %3 = arith.extf %2 : vector<16x256xbf16> to vector<16x256xf32>
    %c1 = arith.constant 1 : index
    %c0_4 = arith.constant 0 : index
    %c0_5 = arith.constant 0 : index
    %4 = vector.load %arg0[%c1, %c0_4, %c0_5] : memref<4x16x256xbf16, #tpu.memory_space<vmem>>, vector<1x16x256xbf16>
    %5 = vector.shape_cast %4 : vector<1x16x256xbf16> to vector<16x256xbf16>
    %6 = arith.extf %5 : vector<16x256xbf16> to vector<16x256xf32>
    %c2 = arith.constant 2 : index
    %c0_6 = arith.constant 0 : index
    %c0_7 = arith.constant 0 : index
    %7 = vector.load %arg0[%c2, %c0_6, %c0_7] : memref<4x16x256xbf16, #tpu.memory_space<vmem>>, vector<1x16x256xbf16>
    %8 = vector.shape_cast %7 : vector<1x16x256xbf16> to vector<16x256xbf16>
    %9 = arith.extf %8 : vector<16x256xbf16> to vector<16x256xf32>
    %c3 = arith.constant 3 : index
    %c0_8 = arith.constant 0 : index
    %c0_9 = arith.constant 0 : index
    %10 = vector.load %arg0[%c3, %c0_8, %c0_9] : memref<4x16x256xbf16, #tpu.memory_space<vmem>>, vector<1x16x256xbf16>
    %11 = vector.shape_cast %10 : vector<1x16x256xbf16> to vector<16x256xbf16>
    %12 = arith.extf %11 : vector<16x256xbf16> to vector<16x256xf32>
    %13 = vector.extract_strided_slice %12 {offsets = [0, 121], sizes = [16, 72], strides = [1, 1]} : vector<16x256xf32> to vector<16x72xf32>
    %14 = arith.truncf %13 : vector<16x72xf32> to vector<16x72xbf16>
    %c0_10 = arith.constant 0 : index
    %c0_11 = arith.constant 0 : index
    %c0_12 = arith.constant 0 : index
    %15 = vector.load %arg1[%c0_10, %c0_11, %c0_12] : memref<9x32x16xbf16, #tpu.memory_space<vmem>>, vector<1x32x16xbf16>
    %16 = vector.shape_cast %15 : vector<1x32x16xbf16> to vector<32x16xbf16>
    %cst = arith.constant dense<0.000000e+00> : vector<32x72xf32>
    %17 = tpu.matmul %16, %14, %cst {dimension_numbers = #tpu.dot_dimension_numbers<[1], [0], [0], [1], [0, 0, 1, 1], [], []>} : vector<32x16xbf16>, vector<16x72xbf16>, vector<32x72xf32> -> vector<32x72xf32>
    %18 = vector.extract_strided_slice %9 {offsets = [0, 122], sizes = [16, 72], strides = [1, 1]} : vector<16x256xf32> to vector<16x72xf32>
    %19 = arith.truncf %18 : vector<16x72xf32> to vector<16x72xbf16>
    %c1_13 = arith.constant 1 : index
    %c0_14 = arith.constant 0 : index
    %c0_15 = arith.constant 0 : index
    %20 = vector.load %arg1[%c1_13, %c0_14, %c0_15] : memref<9x32x16xbf16, #tpu.memory_space<vmem>>, vector<1x32x16xbf16>
    %21 = vector.shape_cast %20 : vector<1x32x16xbf16> to vector<32x16xbf16>
    %cst_16 = arith.constant dense<0.000000e+00> : vector<32x72xf32>
    %22 = tpu.matmul %21, %19, %cst_16 {dimension_numbers = #tpu.dot_dimension_numbers<[1], [0], [0], [1], [0, 0, 1, 1], [], []>} : vector<32x16xbf16>, vector<16x72xbf16>, vector<32x72xf32> -> vector<32x72xf32>
    %23 = arith.addf %17, %22 : vector<32x72xf32>
    %24 = vector.extract_strided_slice %12 {offsets = [0, 122], sizes = [16, 72], strides = [1, 1]} : vector<16x256xf32> to vector<16x72xf32>
    %25 = arith.truncf %24 : vector<16x72xf32> to vector<16x72xbf16>
    %c2_17 = arith.constant 2 : index
    %c0_18 = arith.constant 0 : index
    %c0_19 = arith.constant 0 : index
    %26 = vector.load %arg1[%c2_17, %c0_18, %c0_19] : memref<9x32x16xbf16, #tpu.memory_space<vmem>>, vector<1x32x16xbf16>
    %27 = vector.shape_cast %26 : vector<1x32x16xbf16> to vector<32x16xbf16>
    %cst_20 = arith.constant dense<0.000000e+00> : vector<32x72xf32>
    %28 = tpu.matmul %27, %25, %cst_20 {dimension_numbers = #tpu.dot_dimension_numbers<[1], [0], [0], [1], [0, 0, 1, 1], [], []>} : vector<32x16xbf16>, vector<16x72xbf16>, vector<32x72xf32> -> vector<32x72xf32>
    %29 = arith.addf %23, %28 : vector<32x72xf32>
    %30 = vector.extract_strided_slice %6 {offsets = [0, 127], sizes = [16, 72], strides = [1, 1]} : vector<16x256xf32> to vector<16x72xf32>
    %31 = arith.truncf %30 : vector<16x72xf32> to vector<16x72xbf16>
    %c3_21 = arith.constant 3 : index
    %c0_22 = arith.constant 0 : index
    %c0_23 = arith.constant 0 : index
    %32 = vector.load %arg1[%c3_21, %c0_22, %c0_23] : memref<9x32x16xbf16, #tpu.memory_space<vmem>>, vector<1x32x16xbf16>
    %33 = vector.shape_cast %32 : vector<1x32x16xbf16> to vector<32x16xbf16>
    %cst_24 = arith.constant dense<0.000000e+00> : vector<32x72xf32>
    %34 = tpu.matmul %33, %31, %cst_24 {dimension_numbers = #tpu.dot_dimension_numbers<[1], [0], [0], [1], [0, 0, 1, 1], [], []>} : vector<32x16xbf16>, vector<16x72xbf16>, vector<32x72xf32> -> vector<32x72xf32>
    %35 = arith.addf %29, %34 : vector<32x72xf32>
    %36 = vector.extract_strided_slice %3 {offsets = [0, 128], sizes = [16, 72], strides = [1, 1]} : vector<16x256xf32> to vector<16x72xf32>
    %37 = arith.truncf %36 : vector<16x72xf32> to vector<16x72xbf16>
    %c4 = arith.constant 4 : index
    %c0_25 = arith.constant 0 : index
    %c0_26 = arith.constant 0 : index
    %38 = vector.load %arg1[%c4, %c0_25, %c0_26] : memref<9x32x16xbf16, #tpu.memory_space<vmem>>, vector<1x32x16xbf16>
    %39 = vector.shape_cast %38 : vector<1x32x16xbf16> to vector<32x16xbf16>
    %cst_27 = arith.constant dense<0.000000e+00> : vector<32x72xf32>
    %40 = tpu.matmul %39, %37, %cst_27 {dimension_numbers = #tpu.dot_dimension_numbers<[1], [0], [0], [1], [0, 0, 1, 1], [], []>} : vector<32x16xbf16>, vector<16x72xbf16>, vector<32x72xf32> -> vector<32x72xf32>
    %41 = arith.addf %35, %40 : vector<32x72xf32>
    %42 = vector.extract_strided_slice %6 {offsets = [0, 128], sizes = [16, 72], strides = [1, 1]} : vector<16x256xf32> to vector<16x72xf32>
    %43 = arith.truncf %42 : vector<16x72xf32> to vector<16x72xbf16>
    %c5 = arith.constant 5 : index
    %c0_28 = arith.constant 0 : index
    %c0_29 = arith.constant 0 : index
    %44 = vector.load %arg1[%c5, %c0_28, %c0_29] : memref<9x32x16xbf16, #tpu.memory_space<vmem>>, vector<1x32x16xbf16>
    %45 = vector.shape_cast %44 : vector<1x32x16xbf16> to vector<32x16xbf16>
    %cst_30 = arith.constant dense<0.000000e+00> : vector<32x72xf32>
    %46 = tpu.matmul %45, %43, %cst_30 {dimension_numbers = #tpu.dot_dimension_numbers<[1], [0], [0], [1], [0, 0, 1, 1], [], []>} : vector<32x16xbf16>, vector<16x72xbf16>, vector<32x72xf32> -> vector<32x72xf32>
    %47 = arith.addf %41, %46 : vector<32x72xf32>
    %48 = vector.extract_strided_slice %12 {offsets = [0, 127], sizes = [16, 72], strides = [1, 1]} : vector<16x256xf32> to vector<16x72xf32>
    %49 = arith.truncf %48 : vector<16x72xf32> to vector<16x72xbf16>
    %c6 = arith.constant 6 : index
    %c0_31 = arith.constant 0 : index
    %c0_32 = arith.constant 0 : index
    %50 = vector.load %arg1[%c6, %c0_31, %c0_32] : memref<9x32x16xbf16, #tpu.memory_space<vmem>>, vector<1x32x16xbf16>
    %51 = vector.shape_cast %50 : vector<1x32x16xbf16> to vector<32x16xbf16>
    %cst_33 = arith.constant dense<0.000000e+00> : vector<32x72xf32>
    %52 = tpu.matmul %51, %49, %cst_33 {dimension_numbers = #tpu.dot_dimension_numbers<[1], [0], [0], [1], [0, 0, 1, 1], [], []>} : vector<32x16xbf16>, vector<16x72xbf16>, vector<32x72xf32> -> vector<32x72xf32>
    %53 = arith.addf %47, %52 : vector<32x72xf32>
    %54 = vector.extract_strided_slice %9 {offsets = [0, 128], sizes = [16, 72], strides = [1, 1]} : vector<16x256xf32> to vector<16x72xf32>
    %55 = arith.truncf %54 : vector<16x72xf32> to vector<16x72xbf16>
    %c7 = arith.constant 7 : index
    %c0_34 = arith.constant 0 : index
    %c0_35 = arith.constant 0 : index
    %56 = vector.load %arg1[%c7, %c0_34, %c0_35] : memref<9x32x16xbf16, #tpu.memory_space<vmem>>, vector<1x32x16xbf16>
    %57 = vector.shape_cast %56 : vector<1x32x16xbf16> to vector<32x16xbf16>
    %cst_36 = arith.constant dense<0.000000e+00> : vector<32x72xf32>
    %58 = tpu.matmul %57, %55, %cst_36 {dimension_numbers = #tpu.dot_dimension_numbers<[1], [0], [0], [1], [0, 0, 1, 1], [], []>} : vector<32x16xbf16>, vector<16x72xbf16>, vector<32x72xf32> -> vector<32x72xf32>
    %59 = arith.addf %53, %58 : vector<32x72xf32>
    %60 = vector.extract_strided_slice %12 {offsets = [0, 128], sizes = [16, 72], strides = [1, 1]} : vector<16x256xf32> to vector<16x72xf32>
    %61 = arith.truncf %60 : vector<16x72xf32> to vector<16x72xbf16>
    %c8 = arith.constant 8 : index
    %c0_37 = arith.constant 0 : index
    %c0_38 = arith.constant 0 : index
    %62 = vector.load %arg1[%c8, %c0_37, %c0_38] : memref<9x32x16xbf16, #tpu.memory_space<vmem>>, vector<1x32x16xbf16>
    %63 = vector.shape_cast %62 : vector<1x32x16xbf16> to vector<32x16xbf16>
    %cst_39 = arith.constant dense<0.000000e+00> : vector<32x72xf32>
    %64 = tpu.matmul %63, %61, %cst_39 {dimension_numbers = #tpu.dot_dimension_numbers<[1], [0], [0], [1], [0, 0, 1, 1], [], []>} : vector<32x16xbf16>, vector<16x72xbf16>, vector<32x72xf32> -> vector<32x72xf32>
    %65 = arith.addf %59, %64 : vector<32x72xf32>
    %66 = vector.broadcast %0 : vector<1x72xf32> to vector<32x72xf32>
    %67 = arith.mulf %65, %66 : vector<32x72xf32>
    %cst_40 = arith.constant dense<0.000000e+00> : vector<32xf32>
    %68 = vector.multi_reduction <add>, %67, %cst_40 [1] : vector<32x72xf32> to vector<32xf32>
    %69 = vector.shape_cast %68 : vector<32xf32> to vector<32x1xf32>
    %70 = arith.mulf %65, %65 : vector<32x72xf32>
    %71 = vector.broadcast %0 : vector<1x72xf32> to vector<32x72xf32>
    %72 = arith.mulf %70, %71 : vector<32x72xf32>
    %cst_41 = arith.constant dense<0.000000e+00> : vector<32xf32>
    %73 = vector.multi_reduction <add>, %72, %cst_41 [1] : vector<32x72xf32> to vector<32xf32>
    %74 = vector.shape_cast %73 : vector<32xf32> to vector<32x1xf32>
    %cst_42 = arith.constant 3.125000e-02 : f32
    %75 = vector.broadcast %cst_42 : f32 to vector<32x1xf32>
    %76 = arith.mulf %69, %75 : vector<32x1xf32>
    %cst_43 = arith.constant 3.125000e-02 : f32
    %77 = vector.broadcast %cst_43 : f32 to vector<32x1xf32>
    %78 = arith.mulf %74, %77 : vector<32x1xf32>
    %79 = arith.mulf %76, %76 : vector<32x1xf32>
    %80 = arith.subf %78, %79 : vector<32x1xf32>
    %cst_44 = arith.constant 0.000000e+00 : f32
    %81 = vector.broadcast %cst_44 : f32 to vector<32x1xf32>
    %82 = arith.maximumf %80, %81 : vector<32x1xf32>
    %83 = vector.broadcast %76 : vector<32x1xf32> to vector<32x72xf32>
    %84 = arith.subf %65, %83 : vector<32x72xf32>
    %cst_45 = arith.constant 9.99999974E-6 : f32
    %85 = vector.broadcast %cst_45 : f32 to vector<32x1xf32>
    %86 = arith.addf %82, %85 : vector<32x1xf32>
    %87 = math.rsqrt %86 : vector<32x1xf32>
    %88 = vector.broadcast %87 : vector<32x1xf32> to vector<32x72xf32>
    %89 = arith.mulf %84, %88 : vector<32x72xf32>
    %c0_46 = arith.constant 0 : index
    %c0_47 = arith.constant 0 : index
    %90 = vector.load %arg2[%c0_46, %c0_47] : memref<32x1xf32, #tpu.memory_space<vmem>>, vector<32x1xf32>
    %91 = vector.broadcast %90 : vector<32x1xf32> to vector<32x72xf32>
    %92 = arith.mulf %89, %91 : vector<32x72xf32>
    %c0_48 = arith.constant 0 : index
    %c0_49 = arith.constant 0 : index
    %93 = vector.load %arg3[%c0_48, %c0_49] : memref<32x1xf32, #tpu.memory_space<vmem>>, vector<32x1xf32>
    %94 = vector.broadcast %93 : vector<32x1xf32> to vector<32x72xf32>
    %95 = arith.addf %92, %94 : vector<32x72xf32>
    %cst_50 = arith.constant 0.000000e+00 : f32
    %96 = vector.broadcast %cst_50 : f32 to vector<32x72xf32>
    %97 = arith.maximumf %95, %96 : vector<32x72xf32>
    %98 = vector.broadcast %0 : vector<1x72xf32> to vector<32x72xf32>
    %99 = arith.mulf %97, %98 : vector<32x72xf32>
    %cst_51 = arith.constant 0.000000e+00 : f32
    %100 = vector.broadcast %cst_51 : f32 to vector<32x328xf32>
    %c0_52 = arith.constant 0 : index
    %c0_53 = arith.constant 0 : index
    %101 = vector.load %arg15[%c0_52, %c0_53] : memref<32x328xf32, #tpu.memory_space<vmem>>, vector<32x328xf32>
    tpu.vector_store %arg15[%c0_52, %c0_53], %100 {strides = array<i32>} : memref<32x328xf32, #tpu.memory_space<vmem>>, vector<32x328xf32>,
    %c0_54 = arith.constant 0 : index
    %c128 = arith.constant 128 : index
    %102 = vector.load %arg15[%c0_54, %c128] : memref<32x328xf32, #tpu.memory_space<vmem>>, vector<32x72xf32>
    tpu.vector_store %arg15[%c0_54, %c128], %99 {strides = array<i32>} : memref<32x328xf32, #tpu.memory_space<vmem>>, vector<32x72xf32>,
    %c0_55 = arith.constant 0 : index
    %c0_56 = arith.constant 0 : index
    %103 = vector.load %arg15[%c0_55, %c0_56] : memref<32x328xf32, #tpu.memory_space<vmem>>, vector<32x328xf32>
    %104 = vector.extract_strided_slice %103 {offsets = [0, 121], sizes = [32, 72], strides = [1, 1]} : vector<32x328xf32> to vector<32x72xf32>
    %105 = arith.truncf %104 : vector<32x72xf32> to vector<32x72xbf16>
    %c0_57 = arith.constant 0 : index
    %c0_58 = arith.constant 0 : index
    %c0_59 = arith.constant 0 : index
    %106 = vector.load %arg4[%c0_57, %c0_58, %c0_59] : memref<9x32x32xbf16, #tpu.memory_space<vmem>>, vector<1x32x32xbf16>
    %107 = vector.shape_cast %106 : vector<1x32x32xbf16> to vector<32x32xbf16>
    %cst_60 = arith.constant dense<0.000000e+00> : vector<32x72xf32>
    %108 = tpu.matmul %107, %105, %cst_60 {dimension_numbers = #tpu.dot_dimension_numbers<[1], [0], [0], [1], [0, 0, 1, 1], [], []>} : vector<32x32xbf16>, vector<32x72xbf16>, vector<32x72xf32> -> vector<32x72xf32>
    %109 = vector.extract_strided_slice %103 {offsets = [0, 122], sizes = [32, 72], strides = [1, 1]} : vector<32x328xf32> to vector<32x72xf32>
    %110 = arith.truncf %109 : vector<32x72xf32> to vector<32x72xbf16>
    %c1_61 = arith.constant 1 : index
    %c0_62 = arith.constant 0 : index
    %c0_63 = arith.constant 0 : index
    %111 = vector.load %arg4[%c1_61, %c0_62, %c0_63] : memref<9x32x32xbf16, #tpu.memory_space<vmem>>, vector<1x32x32xbf16>
    %112 = vector.shape_cast %111 : vector<1x32x32xbf16> to vector<32x32xbf16>
    %cst_64 = arith.constant dense<0.000000e+00> : vector<32x72xf32>
    %113 = tpu.matmul %112, %110, %cst_64 {dimension_numbers = #tpu.dot_dimension_numbers<[1], [0], [0], [1], [0, 0, 1, 1], [], []>} : vector<32x32xbf16>, vector<32x72xbf16>, vector<32x72xf32> -> vector<32x72xf32>
    %114 = arith.addf %108, %113 : vector<32x72xf32>
    %115 = vector.extract_strided_slice %103 {offsets = [0, 123], sizes = [32, 72], strides = [1, 1]} : vector<32x328xf32> to vector<32x72xf32>
    %116 = arith.truncf %115 : vector<32x72xf32> to vector<32x72xbf16>
    %c2_65 = arith.constant 2 : index
    %c0_66 = arith.constant 0 : index
    %c0_67 = arith.constant 0 : index
    %117 = vector.load %arg4[%c2_65, %c0_66, %c0_67] : memref<9x32x32xbf16, #tpu.memory_space<vmem>>, vector<1x32x32xbf16>
    %118 = vector.shape_cast %117 : vector<1x32x32xbf16> to vector<32x32xbf16>
    %cst_68 = arith.constant dense<0.000000e+00> : vector<32x72xf32>
    %119 = tpu.matmul %118, %116, %cst_68 {dimension_numbers = #tpu.dot_dimension_numbers<[1], [0], [0], [1], [0, 0, 1, 1], [], []>} : vector<32x32xbf16>, vector<32x72xbf16>, vector<32x72xf32> -> vector<32x72xf32>
    %120 = arith.addf %114, %119 : vector<32x72xf32>
    %121 = vector.extract_strided_slice %103 {offsets = [0, 127], sizes = [32, 72], strides = [1, 1]} : vector<32x328xf32> to vector<32x72xf32>
    %122 = arith.truncf %121 : vector<32x72xf32> to vector<32x72xbf16>
    %c3_69 = arith.constant 3 : index
    %c0_70 = arith.constant 0 : index
    %c0_71 = arith.constant 0 : index
    %123 = vector.load %arg4[%c3_69, %c0_70, %c0_71] : memref<9x32x32xbf16, #tpu.memory_space<vmem>>, vector<1x32x32xbf16>
    %124 = vector.shape_cast %123 : vector<1x32x32xbf16> to vector<32x32xbf16>
    %cst_72 = arith.constant dense<0.000000e+00> : vector<32x72xf32>
    %125 = tpu.matmul %124, %122, %cst_72 {dimension_numbers = #tpu.dot_dimension_numbers<[1], [0], [0], [1], [0, 0, 1, 1], [], []>} : vector<32x32xbf16>, vector<32x72xbf16>, vector<32x72xf32> -> vector<32x72xf32>
    %126 = arith.addf %120, %125 : vector<32x72xf32>
    %127 = vector.extract_strided_slice %103 {offsets = [0, 128], sizes = [32, 72], strides = [1, 1]} : vector<32x328xf32> to vector<32x72xf32>
    %128 = arith.truncf %127 : vector<32x72xf32> to vector<32x72xbf16>
    %c4_73 = arith.constant 4 : index
    %c0_74 = arith.constant 0 : index
    %c0_75 = arith.constant 0 : index
    %129 = vector.load %arg4[%c4_73, %c0_74, %c0_75] : memref<9x32x32xbf16, #tpu.memory_space<vmem>>, vector<1x32x32xbf16>
    %130 = vector.shape_cast %129 : vector<1x32x32xbf16> to vector<32x32xbf16>
    %cst_76 = arith.constant dense<0.000000e+00> : vector<32x72xf32>
    %131 = tpu.matmul %130, %128, %cst_76 {dimension_numbers = #tpu.dot_dimension_numbers<[1], [0], [0], [1], [0, 0, 1, 1], [], []>} : vector<32x32xbf16>, vector<32x72xbf16>, vector<32x72xf32> -> vector<32x72xf32>
    %132 = arith.addf %126, %131 : vector<32x72xf32>
    %133 = vector.extract_strided_slice %103 {offsets = [0, 129], sizes = [32, 72], strides = [1, 1]} : vector<32x328xf32> to vector<32x72xf32>
    %134 = arith.truncf %133 : vector<32x72xf32> to vector<32x72xbf16>
    %c5_77 = arith.constant 5 : index
    %c0_78 = arith.constant 0 : index
    %c0_79 = arith.constant 0 : index
    %135 = vector.load %arg4[%c5_77, %c0_78, %c0_79] : memref<9x32x32xbf16, #tpu.memory_space<vmem>>, vector<1x32x32xbf16>
    %136 = vector.shape_cast %135 : vector<1x32x32xbf16> to vector<32x32xbf16>
    %cst_80 = arith.constant dense<0.000000e+00> : vector<32x72xf32>
    %137 = tpu.matmul %136, %134, %cst_80 {dimension_numbers = #tpu.dot_dimension_numbers<[1], [0], [0], [1], [0, 0, 1, 1], [], []>} : vector<32x32xbf16>, vector<32x72xbf16>, vector<32x72xf32> -> vector<32x72xf32>
    %138 = arith.addf %132, %137 : vector<32x72xf32>
    %139 = vector.extract_strided_slice %103 {offsets = [0, 133], sizes = [32, 72], strides = [1, 1]} : vector<32x328xf32> to vector<32x72xf32>
    %140 = arith.truncf %139 : vector<32x72xf32> to vector<32x72xbf16>
    %c6_81 = arith.constant 6 : index
    %c0_82 = arith.constant 0 : index
    %c0_83 = arith.constant 0 : index
    %141 = vector.load %arg4[%c6_81, %c0_82, %c0_83] : memref<9x32x32xbf16, #tpu.memory_space<vmem>>, vector<1x32x32xbf16>
    %142 = vector.shape_cast %141 : vector<1x32x32xbf16> to vector<32x32xbf16>
    %cst_84 = arith.constant dense<0.000000e+00> : vector<32x72xf32>
    %143 = tpu.matmul %142, %140, %cst_84 {dimension_numbers = #tpu.dot_dimension_numbers<[1], [0], [0], [1], [0, 0, 1, 1], [], []>} : vector<32x32xbf16>, vector<32x72xbf16>, vector<32x72xf32> -> vector<32x72xf32>
    %144 = arith.addf %138, %143 : vector<32x72xf32>
    %145 = vector.extract_strided_slice %103 {offsets = [0, 134], sizes = [32, 72], strides = [1, 1]} : vector<32x328xf32> to vector<32x72xf32>
    %146 = arith.truncf %145 : vector<32x72xf32> to vector<32x72xbf16>
    %c7_85 = arith.constant 7 : index
    %c0_86 = arith.constant 0 : index
    %c0_87 = arith.constant 0 : index
    %147 = vector.load %arg4[%c7_85, %c0_86, %c0_87] : memref<9x32x32xbf16, #tpu.memory_space<vmem>>, vector<1x32x32xbf16>
    %148 = vector.shape_cast %147 : vector<1x32x32xbf16> to vector<32x32xbf16>
    %cst_88 = arith.constant dense<0.000000e+00> : vector<32x72xf32>
    %149 = tpu.matmul %148, %146, %cst_88 {dimension_numbers = #tpu.dot_dimension_numbers<[1], [0], [0], [1], [0, 0, 1, 1], [], []>} : vector<32x32xbf16>, vector<32x72xbf16>, vector<32x72xf32> -> vector<32x72xf32>
    %150 = arith.addf %144, %149 : vector<32x72xf32>
    %151 = vector.extract_strided_slice %103 {offsets = [0, 135], sizes = [32, 72], strides = [1, 1]} : vector<32x328xf32> to vector<32x72xf32>
    %152 = arith.truncf %151 : vector<32x72xf32> to vector<32x72xbf16>
    %c8_89 = arith.constant 8 : index
    %c0_90 = arith.constant 0 : index
    %c0_91 = arith.constant 0 : index
    %153 = vector.load %arg4[%c8_89, %c0_90, %c0_91] : memref<9x32x32xbf16, #tpu.memory_space<vmem>>, vector<1x32x32xbf16>
    %154 = vector.shape_cast %153 : vector<1x32x32xbf16> to vector<32x32xbf16>
    %cst_92 = arith.constant dense<0.000000e+00> : vector<32x72xf32>
    %155 = tpu.matmul %154, %152, %cst_92 {dimension_numbers = #tpu.dot_dimension_numbers<[1], [0], [0], [1], [0, 0, 1, 1], [], []>} : vector<32x32xbf16>, vector<32x72xbf16>, vector<32x72xf32> -> vector<32x72xf32>
    %156 = arith.addf %150, %155 : vector<32x72xf32>
    %157 = vector.broadcast %0 : vector<1x72xf32> to vector<32x72xf32>
    %158 = arith.mulf %156, %157 : vector<32x72xf32>
    %cst_93 = arith.constant dense<0.000000e+00> : vector<32xf32>
    %159 = vector.multi_reduction <add>, %158, %cst_93 [1] : vector<32x72xf32> to vector<32xf32>
    %160 = vector.shape_cast %159 : vector<32xf32> to vector<32x1xf32>
    %161 = arith.mulf %156, %156 : vector<32x72xf32>
    %162 = vector.broadcast %0 : vector<1x72xf32> to vector<32x72xf32>
    %163 = arith.mulf %161, %162 : vector<32x72xf32>
    %cst_94 = arith.constant dense<0.000000e+00> : vector<32xf32>
    %164 = vector.multi_reduction <add>, %163, %cst_94 [1] : vector<32x72xf32> to vector<32xf32>
    %165 = vector.shape_cast %164 : vector<32xf32> to vector<32x1xf32>
    %cst_95 = arith.constant 3.125000e-02 : f32
    %166 = vector.broadcast %cst_95 : f32 to vector<32x1xf32>
    %167 = arith.mulf %160, %166 : vector<32x1xf32>
    %cst_96 = arith.constant 3.125000e-02 : f32
    %168 = vector.broadcast %cst_96 : f32 to vector<32x1xf32>
    %169 = arith.mulf %165, %168 : vector<32x1xf32>
    %170 = arith.mulf %167, %167 : vector<32x1xf32>
    %171 = arith.subf %169, %170 : vector<32x1xf32>
    %cst_97 = arith.constant 0.000000e+00 : f32
    %172 = vector.broadcast %cst_97 : f32 to vector<32x1xf32>
    %173 = arith.maximumf %171, %172 : vector<32x1xf32>
    %174 = vector.broadcast %167 : vector<32x1xf32> to vector<32x72xf32>
    %175 = arith.subf %156, %174 : vector<32x72xf32>
    %cst_98 = arith.constant 9.99999974E-6 : f32
    %176 = vector.broadcast %cst_98 : f32 to vector<32x1xf32>
    %177 = arith.addf %173, %176 : vector<32x1xf32>
    %178 = math.rsqrt %177 : vector<32x1xf32>
    %179 = vector.broadcast %178 : vector<32x1xf32> to vector<32x72xf32>
    %180 = arith.mulf %175, %179 : vector<32x72xf32>
    %c0_99 = arith.constant 0 : index
    %c0_100 = arith.constant 0 : index
    %181 = vector.load %arg5[%c0_99, %c0_100] : memref<32x1xf32, #tpu.memory_space<vmem>>, vector<32x1xf32>
    %182 = vector.broadcast %181 : vector<32x1xf32> to vector<32x72xf32>
    %183 = arith.mulf %180, %182 : vector<32x72xf32>
    %c0_101 = arith.constant 0 : index
    %c0_102 = arith.constant 0 : index
    %184 = vector.load %arg6[%c0_101, %c0_102] : memref<32x1xf32, #tpu.memory_space<vmem>>, vector<32x1xf32>
    %185 = vector.broadcast %184 : vector<32x1xf32> to vector<32x72xf32>
    %186 = arith.addf %183, %185 : vector<32x72xf32>
    %187 = vector.broadcast %0 : vector<1x72xf32> to vector<32x72xf32>
    %188 = arith.mulf %186, %187 : vector<32x72xf32>
    %189 = vector.extract_strided_slice %3 {offsets = [0, 128], sizes = [16, 72], strides = [1, 1]} : vector<16x256xf32> to vector<16x72xf32>
    %190 = arith.truncf %189 : vector<16x72xf32> to vector<16x72xbf16>
    %c0_103 = arith.constant 0 : index
    %c0_104 = arith.constant 0 : index
    %c0_105 = arith.constant 0 : index
    %191 = vector.load %arg7[%c0_103, %c0_104, %c0_105] : memref<1x32x16xbf16, #tpu.memory_space<vmem>>, vector<1x32x16xbf16>
    %192 = vector.shape_cast %191 : vector<1x32x16xbf16> to vector<32x16xbf16>
    %cst_106 = arith.constant dense<0.000000e+00> : vector<32x72xf32>
    %193 = tpu.matmul %192, %190, %cst_106 {dimension_numbers = #tpu.dot_dimension_numbers<[1], [0], [0], [1], [0, 0, 1, 1], [], []>} : vector<32x16xbf16>, vector<16x72xbf16>, vector<32x72xf32> -> vector<32x72xf32>
    %194 = vector.broadcast %0 : vector<1x72xf32> to vector<32x72xf32>
    %195 = arith.mulf %193, %194 : vector<32x72xf32>
    %cst_107 = arith.constant dense<0.000000e+00> : vector<32xf32>
    %196 = vector.multi_reduction <add>, %195, %cst_107 [1] : vector<32x72xf32> to vector<32xf32>
    %197 = vector.shape_cast %196 : vector<32xf32> to vector<32x1xf32>
    %198 = arith.mulf %193, %193 : vector<32x72xf32>
    %199 = vector.broadcast %0 : vector<1x72xf32> to vector<32x72xf32>
    %200 = arith.mulf %198, %199 : vector<32x72xf32>
    %cst_108 = arith.constant dense<0.000000e+00> : vector<32xf32>
    %201 = vector.multi_reduction <add>, %200, %cst_108 [1] : vector<32x72xf32> to vector<32xf32>
    %202 = vector.shape_cast %201 : vector<32xf32> to vector<32x1xf32>
    %cst_109 = arith.constant 3.125000e-02 : f32
    %203 = vector.broadcast %cst_109 : f32 to vector<32x1xf32>
    %204 = arith.mulf %197, %203 : vector<32x1xf32>
    %cst_110 = arith.constant 3.125000e-02 : f32
    %205 = vector.broadcast %cst_110 : f32 to vector<32x1xf32>
    %206 = arith.mulf %202, %205 : vector<32x1xf32>
    %207 = arith.mulf %204, %204 : vector<32x1xf32>
    %208 = arith.subf %206, %207 : vector<32x1xf32>
    %cst_111 = arith.constant 0.000000e+00 : f32
    %209 = vector.broadcast %cst_111 : f32 to vector<32x1xf32>
    %210 = arith.maximumf %208, %209 : vector<32x1xf32>
    %211 = vector.broadcast %204 : vector<32x1xf32> to vector<32x72xf32>
    %212 = arith.subf %193, %211 : vector<32x72xf32>
    %cst_112 = arith.constant 9.99999974E-6 : f32
    %213 = vector.broadcast %cst_112 : f32 to vector<32x1xf32>
    %214 = arith.addf %210, %213 : vector<32x1xf32>
    %215 = math.rsqrt %214 : vector<32x1xf32>
    %216 = vector.broadcast %215 : vector<32x1xf32> to vector<32x72xf32>
    %217 = arith.mulf %212, %216 : vector<32x72xf32>
    %c0_113 = arith.constant 0 : index
    %c0_114 = arith.constant 0 : index
    %218 = vector.load %arg8[%c0_113, %c0_114] : memref<32x1xf32, #tpu.memory_space<vmem>>, vector<32x1xf32>
    %219 = vector.broadcast %218 : vector<32x1xf32> to vector<32x72xf32>
    %220 = arith.mulf %217, %219 : vector<32x72xf32>
    %c0_115 = arith.constant 0 : index
    %c0_116 = arith.constant 0 : index
    %221 = vector.load %arg9[%c0_115, %c0_116] : memref<32x1xf32, #tpu.memory_space<vmem>>, vector<32x1xf32>
    %222 = vector.broadcast %221 : vector<32x1xf32> to vector<32x72xf32>
    %223 = arith.addf %220, %222 : vector<32x72xf32>
    %224 = vector.broadcast %0 : vector<1x72xf32> to vector<32x72xf32>
    %225 = arith.mulf %223, %224 : vector<32x72xf32>
    %226 = arith.addf %188, %225 : vector<32x72xf32>
    %cst_117 = arith.constant 0.000000e+00 : f32
    %227 = vector.broadcast %cst_117 : f32 to vector<32x72xf32>
    %228 = arith.maximumf %226, %227 : vector<32x72xf32>
    %229 = vector.broadcast %0 : vector<1x72xf32> to vector<32x72xf32>
    %230 = arith.mulf %228, %229 : vector<32x72xf32>
    %c0_118 = arith.constant 0 : index
    %c0_119 = arith.constant 0 : index
    %231 = vector.load %arg11[%c0_118, %c0_119] : memref<72x2xf32, #tpu.memory_space<vmem>>, vector<72x2xf32>
    %cst_120 = arith.constant dense<0.000000e+00> : vector<32x2xf32>
    %232 = tpu.matmul %230, %231, %cst_120 {dimension_numbers = #tpu.dot_dimension_numbers<[1], [0], [0], [1], [0, 0, 1, 1], [], []>} : vector<32x72xf32>, vector<72x2xf32>, vector<32x2xf32> -> vector<32x2xf32>
    %c0_121 = arith.constant 0 : index
    %c0_122 = arith.constant 0 : index
    %233 = vector.load %arg12[%c0_121, %c0_122] : memref<10x32xf32, #tpu.memory_space<vmem>>, vector<10x32xf32>
    %cst_123 = arith.constant dense<0.000000e+00> : vector<10x2xf32>
    %234 = tpu.matmul %233, %232, %cst_123 {dimension_numbers = #tpu.dot_dimension_numbers<[1], [0], [0], [1], [0, 0, 1, 1], [], []>} : vector<10x32xf32>, vector<32x2xf32>, vector<10x2xf32> -> vector<10x2xf32>
    %c0_124 = arith.constant 0 : index
    %c0_125 = arith.constant 0 : index
    %235 = vector.load %arg13[%c0_124, %c0_125] : memref<10x1xf32, #tpu.memory_space<vmem>>, vector<10x1xf32>
    %236 = vector.broadcast %235 : vector<10x1xf32> to vector<10x2xf32>
    %237 = arith.addf %234, %236 : vector<10x2xf32>
    %c0_126 = arith.constant 0 : index
    %c0_127 = arith.constant 0 : index
    %238 = vector.load %arg14[%c0_126, %c0_127] : memref<10x2xf32, #tpu.memory_space<vmem>>, vector<10x2xf32>
    tpu.vector_store %arg14[%c0_126, %c0_127], %237 {strides = array<i32>} : memref<10x2xf32, #tpu.memory_space<vmem>>, vector<10x2xf32>,
    return
  }
}

</mosaic_0001>

<bundles_post_ra>
// kernel: _lambda_.4
= control target key start
LH: loop header
LB: loop body
LE: loop exit
PB: predicated region body
PF: predicated region fallthrough
CT: control target
= control target key end

     0   :  { %s1961_s22 = smov 18   ;;  %v1962_v11 = vmov 0   ;;  %s1964_s23 = smov 19   ;;  %vm74_vm0 = vcmask 1040384   ;;  %vm64_vm1 = vcmask 146432   ;;  %vm75_vm2 = vcmask 1041408   ;;  %s2384_s0 = inlined_call_operand.vmem [shape: bf16[3,896], index: 0, kind: input, shape index: {}]   ;;  %s2385_s1 = inlined_call_operand.vmem [shape: bf16[9,8,3], index: 1, kind: input, shape index: {}]   ;;  %s2386_s4 = inlined_call_operand.vmem [shape: f32[1,648], index: 4, kind: input, shape index: {}]   ;;  %s2387_s3 = inlined_call_operand.vmem [shape: f32[8,1], index: 3, kind: input, shape index: {}]   ;;  %s2388_s2 = inlined_call_operand.vmem [shape: f32[8,1], index: 2, kind: input, shape index: {}]   ;;  %s2389_s5 = inlined_call_operand.vmem [shape: bf16[8,896], index: 5, kind: output, shape index: {}]  }
   0x1   :  { %v22_v0 = vld [vmem:[%s2384_s0] sm:$0xff]  ;;  %v2007_v1 = vld [vmem:[%s2384_s0 + $0x8] sm:$0x3f]  ;;  %128 = vmatprep.mubr.bf16.mxu1 %v1962_v11  ;;  %454 = vmatprep.mubr.bf16.mxu0 %v1962_v11  ;;  %s1963_s0 = smov 17   ;;  %s1965_s24 = smov 1   ;;  %v1970_v23 = vmov 65535   ;;  %1728 = vst [vmem:[%s2389_s5] sm:$0xff] %v1962_v11 }
   0x2   :  { %v2010_v2 = vunpack.c.l.bf16 %v2007_v1  ;;  %v1766_v3 = vcombine.low %v22_v0, %v22_v0  ;;  %v24_v4 = vunpack.c.l.bf16 %v22_v0  ;;  %v25_v5 = vunpack.c.h.bf16 %v22_v0  ;;  %1953 = vset.pattern.permute.xlu0 %v1962_v11  ;;  %1954 = vset.pattern.permute.xlu1 %v1962_v11  ;;  %s1966_s25 = smov 127   ;;  %s1967_s26 = smov 111   ;;  %v1769_v36 = vld [vmem:[%s2385_s1 + $0x4] sm:$0xf]  ;;  %v2089_v52 = vld [vmem:[%s2385_s1 + $0x8] sm:$0xf] }
   0x3   :  { %v2024_v13 = vcombine.high %v22_v0, %v22_v0  ;;  %v2032_v15 = vcombine.low %v2007_v1, %v2007_v1  ;;  %v2048_v16 = vcombine.high %v2007_v1, %v2007_v1  ;;  %v27_v17 = vunpack.c.h.bf16 %v2007_v1  ;;  %s1968_s27 = smov 110   ;;  %s1969_s28 = smov 109   ;;  %1729 = vst [vmem:[%s2389_s5 + $0x8] sm:$0xff] %v1962_v11  ;;  %1730 = vst [vmem:[%s2389_s5 + $0x10] sm:$0xff] %v1962_v11 }
   0x4   :  { %52 = vrot.lane.b32.xlu1 %v1766_v3, %s1961_s22  ;;  %v31_v6 = vcombine.high %v24_v4, %v24_v4  ;;  %v32_v7 = vcombine.high %v25_v5, %v25_v5  ;;  %v33_v8 = vcombine.high %v2010_v2, %v2010_v2  ;;  %v76_v24 = vsel %vm74_vm0, 4294967295, %v1970_v23  ;;  %1731 = vst [vmem:[%s2389_s5 + $0x18] sm:$0xf] %v1962_v11 }
   0x5   :  { %v2061_v26 = vsel %vm75_vm2, %v76_v24, 0  ;;  %vm70_vm3 = vcmask 23552   ;;  %vm395_vm4 = vcmask 138240   ;;  %vm231_vm5 = vcmask 154624   ;;  %v2128_v24 = vld [vmem:[%s2385_s1 + $0xc] sm:$0xf] }
   0x6   :  { %v2014_v9 = vpack.c.bf16 %v32_v7, %v32_v7  ;;  %v2016_v10 = vpack.c.bf16 %v31_v6, %v31_v6  ;;  %v2022_v12 = vpack.c.bf16 %v33_v8, %v33_v8  ;;  %v1943_v14 = vpack.i.bf16 %v32_v7, %v25_v5 }
   0x7   :  { %v1918_v18 = vpack.i.bf16 %v27_v17, %v33_v8  ;;  %v1948_v19 = vpack.i.bf16 %v33_v8, %v2010_v2  ;;  %vm570_vm6 = vcmask 7168   ;;  %vm891_vm7 = vcmask 1039360  }
   0x8   :  { %58 = vrot.lane.b32.xlu1 %v2014_v9, %s1961_s22  ;;  %54 = vrot.lane.b32.xlu0 %v2016_v10, %s1961_s22  ;;  %vm1073_vm8 = vcmask 908288   ;;  %vm1255_vm9 = vcmask 900096   ;;  %vm1437_vm10 = vcmask 891904   ;;  %vm1648_vm11 = vcmask 64512  }
   0x9   :  { %vm1758_vm12 = vcmask 1043456   ;;  %vm1759_vm13 = vcmask 64516  }
   0xa   :  { %vm1760_vm14 = vmor %vm1759_vm13, %vm1758_vm12 }
   0xc   :  { %62 = vrot.lane.b32.xlu1 %v2022_v12, %s1961_s22  ;;  %56 = vrot.lane.b32.xlu0 %v2024_v13, %s1961_s22 }
  0x10   :  { %387 = vrot.lane.b32.xlu1 %v2024_v13, %s1963_s0  ;;  %60 = vrot.lane.b32.xlu0 %v2032_v15, %s1961_s22 }
  0x14   :  { %221 = vrot.lane.b32.xlu1 %v2016_v10, %s1964_s23  ;;  %385 = vrot.lane.b32.xlu0 %v2016_v10, %s1963_s0 }
  0x18   :  { %219 = vrot.lane.b32.xlu1 %v1766_v3, %s1964_s23  ;;  %383 = vrot.lane.b32.xlu0 %v1766_v3, %s1963_s0 }
  0x1c   :  { %393 = vrot.lane.b32.xlu1 %v2022_v12, %s1963_s0  ;;  %223 = vrot.lane.b32.xlu0 %v2024_v13, %s1964_s23 }
  0x20   :  { %227 = vrot.lane.b32.xlu1 %v2032_v15, %s1964_s23  ;;  %391 = vrot.lane.b32.xlu0 %v2032_v15, %s1963_s0 }
  0x24   :  { %560 = vrot.lane.b32.xlu1 %v2024_v13, %s1965_s24  ;;  %225 = vrot.lane.b32.xlu0 %v2014_v9, %s1964_s23 }
  0x28   :  { %229 = vrot.lane.b32.xlu1 %v2022_v12, %s1964_s23  ;;  %558 = vrot.lane.b32.xlu0 %v2016_v10, %s1965_s24 }
  0x2c   :  { %568 = vrot.lane.b32.xlu1 %v2048_v16, %s1965_s24  ;;  %556 = vrot.lane.b32.xlu0 %v1766_v3, %s1965_s24 }
  0x30   :  { %389 = vrot.lane.b32.xlu1 %v2014_v9, %s1963_s0  ;;  %566 = vrot.lane.b32.xlu0 %v2022_v12, %s1965_s24 }
  0x34   :  { %564 = vrot.lane.b32.xlu0 %v2032_v15, %s1965_s24  ;;  %1914 = vrot.lane.b32.xlu1 %v1943_v14, %s1966_s25 }
  0x38   :  { %562 = vrot.lane.b32.xlu0 %v2014_v9, %s1965_s24  ;;  %1919 = vrot.lane.b32.xlu1 %v1918_v18, %s1966_s25 }
  0x3c   :  { %879 = vrot.lane.b32.xlu0 %v31_v6, %s1966_s25  ;;  %1061 = vrot.lane.b32.xlu1 %v31_v6, %s1967_s26 }
  0x40   :  { %1924 = vrot.lane.b32.xlu0 %v1943_v14, %s1967_s26  ;;  %1929 = vrot.lane.b32.xlu1 %v1918_v18, %s1967_s26 }
  0x44   :  { %885 = vrot.lane.b32.xlu0 %v2010_v2, %s1966_s25  ;;  %1934 = vrot.lane.b32.xlu1 %v1943_v14, %s1968_s27 }
  0x48   :  { %1067 = vrot.lane.b32.xlu0 %v2010_v2, %s1967_s26  ;;  %1939 = vrot.lane.b32.xlu1 %v1918_v18, %s1968_s27 }
  0x4c   :  { %1243 = vrot.lane.b32.xlu0 %v31_v6, %s1968_s27  ;;  %1944 = vrot.lane.b32.xlu1 %v1943_v14, %s1969_s28 }
  0x50   :  { %1249 = vrot.lane.b32.xlu0 %v2010_v2, %s1968_s27  ;;  %1949 = vrot.lane.b32.xlu1 %v1948_v19, %s1969_s28 }
  0x54   :  { %1425 = vrot.lane.b32.xlu0 %v31_v6, %s1969_s28  ;;  %v43_v6 = vld [vmem:[%s2385_s1] sm:$0xf] }
  0x58   :  { %1435 = vrot.lane.b32.xlu0 %v27_v17, %s1969_s28 }
  0x76   :  { %v53_v20 = vpop.permute.xlu1 %52 }
  0x7a   :  { %v59_v21 = vpop.permute.xlu1 %58  ;;  %v55_v22 = vpop.permute.xlu0 %54 }
  0x7b   :  { %v65_v25 = vsel %vm64_vm1, %v53_v20, %v55_v22 }
  0x7c   :  { %v79_v31 = vand.u32 %v2061_v26, %v65_v25 }
  0x7e   :  { %v63_v27 = vpop.permute.xlu1 %62  ;;  %v57_v28 = vpop.permute.xlu0 %56 }
  0x7f   :  { %v66_v29 = vsel %vm64_vm1, %v55_v22, %v57_v28  ;;  %v67_v32 = vsel %vm64_vm1, %v57_v28, %v59_v21  ;;  %v94_v37 = vand.u32 %v2061_v26, %v63_v27 }
  0x80   :  { %v82_v30 = vand.u32 %v2061_v26, %v66_v29  ;;  %v85_v39 = vand.u32 %v2061_v26, %v67_v32 }
  0x82   :  { %v2067_v33 = vpop.permute.xlu1 %387  ;;  %96 = vmatprep.subr.bf16.mxu1 %v82_v30  ;;  %v61_v34 = vpop.permute.xlu0 %60 }
  0x83   :  { %v68_v35 = vsel %vm64_vm1, %v59_v21, %v61_v34  ;;  %97 = vmatpush1.bf16.msra.mxu1 %v79_v31  ;;  %v69_v44 = vsel %vm64_vm1, %v61_v34, %v63_v27 }
  0x84   :  { %v88_v38 = vand.u32 %v2061_v26, %v68_v35  ;;  %v91_v49 = vand.u32 %v2061_v26, %v69_v44  ;;  %v736_v35 = vand.u32 %v2024_v13, %v2061_v26  ;;  %v748_v44 = vand.u32 %v2048_v16, %v2061_v26 }
  0x86   :  { %v222_v40 = vpop.permute.xlu1 %221  ;;  %1770 = vmatmul.mubr.msk.bf16.vlgmr.msra.gmra.mrb[0].mxu1 %vm70_vm3, %v1769_v36  ;;  %137 = vmatprep.subr.bf16.mxu1 %v88_v38  ;;  %v386_v41 = vpop.permute.xlu0 %385 }
  0x87   :  { %138 = vmatpush1.bf16.msra.mxu1 %v85_v39  ;;  %v397_v42 = vsel %vm395_vm4, %v386_v41, %v2067_v33  ;;  %169 = vmatprep.mubr.bf16.mxu1 %v1962_v11 }
  0x88   :  { %178 = vmatprep.subr.bf16.mxu1 %v94_v37  ;;  %v408_v43 = vand.u32 %v397_v42, %v2061_v26 }
  0x8a   :  { %v220_v45 = vpop.permute.xlu1 %219  ;;  %422 = vmatprep.subr.bf16.mxu0 %v408_v43  ;;  %v384_v46 = vpop.permute.xlu0 %383 }
  0x8b   :  { %v396_v47 = vsel %vm395_vm4, %v384_v46, %v386_v41  ;;  %v232_v56 = vsel %vm231_vm5, %v220_v45, %v222_v40  ;;  %v733_v41 = vand.u32 %v2061_v26, %v2016_v10 }
  0x8c   :  { %v405_v48 = vand.u32 %v396_v47, %v2061_v26  ;;  %v241_v61 = vand.u32 %v232_v56, %v2061_v26  ;;  %v2170_v47 = vld [vmem:[%s2385_s1 + $0x10] sm:$0xf] }
  0x8e   :  { %v394_v50 = vpop.permute.xlu1 %393  ;;  %1771 = vmatmul.mubr.msk.bf16.vlgmr.msra.gmra.mrb[4].mxu1 %vm70_vm3, %v1769_v36  ;;  %423 = vmatpush1.bf16.msra.mxu0 %v405_v48  ;;  %v224_v51 = vpop.permute.xlu0 %223 }
  0x8f   :  { %v420_v53 = vand.u32 %v394_v50, %v2061_v26  ;;  %179 = vmatpush1.bf16.msra.mxu1 %v91_v49  ;;  %v233_v54 = vsel %vm231_vm5, %v222_v40, %v224_v51  ;;  %210 = vmatprep.mubr.bf16.mxu1 %v1962_v11  ;;  %v745_v49 = vand.u32 %v2061_v26, %v2022_v12 }
  0x90   :  { %v244_v55 = vand.u32 %v233_v54, %v2061_v26 }
  0x91   :  { %1777 = vmatmul.mubr.msk.bf16.vlgmr.msra.gmra.mrb[0].mxu0 %vm70_vm3, %v2089_v52  ;;  %504 = vmatprep.subr.bf16.mxu0 %v420_v53 }
  0x92   :  { %v228_v57 = vpop.permute.xlu1 %227  ;;  %258 = vmatprep.subr.bf16.mxu1 %v244_v55  ;;  %v392_v58 = vpop.permute.xlu0 %391  ;;  %536 = vmatprep.mubr.bf16.mxu0 %v1962_v11  ;;  %v742_v55 = vand.u32 %v2032_v15, %v2061_v26 }
  0x93   :  { %v400_v59 = vsel %vm395_vm4, %v392_v58, %v394_v50 }
  0x94   :  { %v417_v60 = vand.u32 %v400_v59, %v2061_v26 }
  0x96   :  { %v2102_v62 = vpop.permute.xlu1 %560  ;;  %1772 = vmatmul.mubr.msk.bf16.vlgmr.msra.gmra.mrb[8].mxu1 %vm70_vm3, %v1769_v36  ;;  %505 = vmatpush1.bf16.msra.mxu0 %v417_v60  ;;  %v226_v63 = vpop.permute.xlu0 %225 }
  0x97   :  { %259 = vmatpush1.bf16.msra.mxu1 %v241_v61  ;;  %v235_v0 = vsel %vm231_vm5, %v226_v63, %v228_v57  ;;  %290 = vmatprep.mubr.bf16.mxu1 %v1962_v11  ;;  %v234_v2 = vsel %vm231_vm5, %v224_v51, %v226_v63 }
  0x98   :  { %v250_v1 = vand.u32 %v235_v0, %v2061_v26  ;;  %v247_v14 = vand.u32 %v234_v2, %v2061_v26 }
  0x99   :  { %1779 = vmatmul.mubr.msk.bf16.vlgmr.msra.gmra.mrb[4].mxu0 %vm70_vm3, %v2089_v52 }
  0x9a   :  { %v230_v3 = vpop.permute.xlu1 %229  ;;  %299 = vmatprep.subr.bf16.mxu1 %v250_v1  ;;  %v559_v4 = vpop.permute.xlu0 %558  ;;  %630 = vmatprep.mubr.bf16.mxu0 %v1962_v11 }
  0x9b   :  { %v572_v5 = vsel %vm570_vm6, %v559_v4, %v2102_v62  ;;  %v256_v7 = vand.u32 %v230_v3, %v2061_v26  ;;  %v236_v21 = vsel %vm231_vm5, %v228_v57, %v230_v3 }
  0x9c   :  { %v584_v8 = vand.u32 %v572_v5, %v2061_v26  ;;  %v253_v30 = vand.u32 %v236_v21, %v2061_v26 }
  0x9e   :  { %v569_v17 = vpop.permute.xlu1 %568  ;;  %1773 = vmatmul.mubr.msk.bf16.vlgmr.msra.gmra.mrb[0].mxu1 %vm70_vm3, %v43_v6  ;;  %598 = vmatprep.subr.bf16.mxu0 %v584_v8  ;;  %v557_v18 = vpop.permute.xlu0 %556  ;;  %v2207_v8 = vld [vmem:[%s2385_s1 + $0x14] sm:$0xf] }
  0x9f   :  { %300 = vmatpush1.bf16.msra.mxu1 %v247_v14  ;;  %v571_v19 = vsel %vm570_vm6, %v557_v18, %v559_v4  ;;  %331 = vmatprep.mubr.bf16.mxu1 %v1962_v11  ;;  %v739_v4 = vand.u32 %v2061_v26, %v2014_v9 }
  0xa0   :  { %v581_v20 = vand.u32 %v571_v19, %v2061_v26  ;;  %340 = vmatprep.subr.bf16.mxu1 %v256_v7 }
  0xa2   :  { %v390_v22 = vpop.permute.xlu1 %389  ;;  %599 = vmatpush1.bf16.msra.mxu0 %v581_v20  ;;  %v567_v23 = vpop.permute.xlu0 %566 }
  0xa3   :  { %v399_v25 = vsel %vm395_vm4, %v390_v22, %v392_v58  ;;  %v576_v27 = vsel %vm570_vm6, %v567_v23, %v569_v17  ;;  %v398_v39 = vsel %vm395_vm4, %v2067_v33, %v390_v22 }
  0xa4   :  { %v414_v28 = vand.u32 %v399_v25, %v2061_v26  ;;  %v596_v29 = vand.u32 %v576_v27, %v2061_v26  ;;  %v411_v43 = vand.u32 %v398_v39, %v2061_v26 }
  0xa5   :  { %1782 = vmatmul.mubr.msk.bf16.vlgmr.msra.gmra.mrb[0].mxu0 %vm70_vm3, %v2128_v24 }
  0xa6   :  { %1774 = vmatmul.mubr.msk.bf16.vlgmr.msra.gmra.mrb[4].mxu1 %vm70_vm3, %v43_v6  ;;  %680 = vmatprep.subr.bf16.mxu0 %v596_v29  ;;  %v565_v31 = vpop.permute.xlu0 %564  ;;  %v2138_v32 = vpop.permute.xlu1 %1914 }
  0xa7   :  { %341 = vmatpush1.bf16.msra.mxu1 %v253_v30  ;;  %v575_v34 = vsel %vm570_vm6, %v565_v31, %v567_v23  ;;  %712 = vmatprep.mubr.bf16.mxu0 %v1962_v11  ;;  %v1917_v37 = vunpack.i.h.bf16 %v2138_v32  ;;  %v1916_v38 = vunpack.i.l.bf16 %v2138_v32 }
  0xa8   :  { %v593_v36 = vand.u32 %v575_v34, %v2061_v26  ;;  %463 = vmatprep.subr.bf16.mxu1 %v414_v28  ;;  %372 = vmatprep.mubr.bf16.mxu1 %v1962_v11 }
  0xa9   :  { %v893_v33 = vsel %vm891_vm7, %v1916_v38, %v1917_v37 }
  0xaa   :  { %681 = vmatpush1.bf16.msra.mxu0 %v593_v36  ;;  %v563_v40 = vpop.permute.xlu0 %562  ;;  %v904_v45 = vpack.c.bf16 %v893_v33, %v893_v33  ;;  %v1920_v46 = vpop.permute.xlu1 %1919  ;;  %v1793_v33 = vld [vmem:[%s2385_s1 + $0x18] sm:$0xf] }
  0xab   :  { %v574_v13 = vsel %vm570_vm6, %v563_v40, %v565_v31  ;;  %750 = vmatprep.subr.bf16.mxu0 %v736_v35  ;;  %v573_v16 = vsel %vm570_vm6, %v2102_v62, %v563_v40  ;;  %v1922_v51 = vunpack.i.h.bf16 %v1920_v46  ;;  %v1921_v57 = vunpack.i.l.bf16 %v1920_v46 }
  0xac   :  { %v590_v42 = vand.u32 %v574_v13, %v2061_v26  ;;  %v918_v53 = vand.u32 %v904_v45, %v2061_v26  ;;  %v587_v54 = vand.u32 %v573_v16, %v2061_v26 }
  0xad   :  { %1784 = vmatmul.mubr.msk.bf16.vlgmr.msra.gmra.mrb[4].mxu0 %vm70_vm3, %v2128_v24  ;;  %v908_v12 = vpack.c.bf16 %v1922_v51, %v1922_v51  ;;  %v896_v62 = vsel %vm891_vm7, %v1921_v57, %v1922_v51 }
  0xae   :  { %1775 = vmatmul.mubr.msk.bf16.vlgmr.msra.gmra.mrb[8].mxu1 %vm70_vm3, %v43_v6  ;;  %751 = vmatpush1.bf16.msra.mxu0 %v733_v41  ;;  %v880_v10 = vpop.permute.xlu0 %879  ;;  %v1062_v61 = vpop.permute.xlu1 %1061  ;;  %v907_v2 = vpack.c.bf16 %v896_v62, %v896_v62 }
  0xaf   :  { %464 = vmatpush1.bf16.msra.mxu1 %v411_v43  ;;  %782 = vmatprep.mubr.bf16.mxu0 %v1962_v11  ;;  %v892_v50 = vsel %vm891_vm7, %v880_v10, %v1916_v38  ;;  %v930_v63 = vand.u32 %v908_v12, %v2061_v26 }
  0xb0   :  { %639 = vmatprep.subr.bf16.mxu1 %v590_v42  ;;  %495 = vmatprep.mubr.bf16.mxu1 %v1962_v11  ;;  %v903_v56 = vpack.c.bf16 %v892_v50, %v892_v50  ;;  %v927_v14 = vand.u32 %v907_v2, %v2061_v26 }
  0xb1   :  { %832 = vmatprep.subr.bf16.mxu0 %v748_v44 }
  0xb2   :  { %v2172_v48 = vpop.permute.xlu0 %1924  ;;  %v1930_v3 = vpop.permute.xlu1 %1929 }
  0xb3   :  { %v1927_v58 = vunpack.i.h.bf16 %v2172_v48  ;;  %v1926_v59 = vunpack.i.l.bf16 %v2172_v48  ;;  %v1931_v7 = vunpack.i.l.bf16 %v1930_v3  ;;  %v1932_v20 = vunpack.i.h.bf16 %v1930_v3  ;;  %v1797_v3 = vld [vmem:[%s2385_s1 + $0x1c] sm:$0xf] }
  0xb5   :  { %1786 = vmatmul.mubr.msk.bf16.vlgmr.msra.gmra.mrb[0].mxu0 %vm70_vm3, %v2170_v47  ;;  %v1075_v1 = vsel %vm1073_vm8, %v1926_v59, %v1927_v58  ;;  %v1074_v17 = vsel %vm1073_vm8, %v1062_v61, %v1926_v59  ;;  %v1090_v30 = vpack.c.bf16 %v1932_v20, %v1932_v20  ;;  %v1078_v32 = vsel %vm1073_vm8, %v1931_v7, %v1932_v20 }
  0xb6   :  { %1778 = vmatmul.mubr.msk.bf16.vlgmr.msra.gmra.mrb[4].mxu1 %vm70_vm3, %v2089_v52  ;;  %833 = vmatpush1.bf16.msra.mxu0 %v745_v49  ;;  %v886_v60 = vpop.permute.xlu0 %885  ;;  %v915_v52 = vand.u32 %v903_v56, %v2061_v26  ;;  %v1086_v5 = vpack.c.bf16 %v1075_v1, %v1075_v1  ;;  %v2213_v19 = vpop.permute.xlu1 %1934  ;;  %v1085_v23 = vpack.c.bf16 %v1074_v17, %v1074_v17 }
  0xb7   :  { %640 = vmatpush1.bf16.msra.mxu1 %v587_v54  ;;  %864 = vmatprep.mubr.bf16.mxu0 %v1962_v11  ;;  %v895_v15 = vsel %vm891_vm7, %v886_v60, %v1921_v57  ;;  %v894_v22 = vsel %vm891_vm7, %v1917_v37, %v886_v60  ;;  %v1937_v25 = vunpack.i.h.bf16 %v2213_v19  ;;  %v1936_v27 = vunpack.i.l.bf16 %v2213_v19 }
  0xb8   :  { %932 = vmatprep.subr.bf16.mxu0 %v918_v53  ;;  %671 = vmatprep.mubr.bf16.mxu1 %v1962_v11  ;;  %v906_v0 = vpack.c.bf16 %v895_v15, %v895_v15  ;;  %v1100_v9 = vand.u32 %v1086_v5, %v2061_v26  ;;  %v905_v29 = vpack.c.bf16 %v894_v22, %v894_v22 }
  0xb9   :  { %791 = vmatprep.subr.bf16.mxu1 %v742_v55  ;;  %v1097_v31 = vand.u32 %v1085_v23, %v2061_v26  ;;  %v1257_v36 = vsel %vm1255_vm9, %v1936_v27, %v1937_v25  ;;  %v1112_v38 = vand.u32 %v1090_v30, %v2061_v26  ;;  %v1089_v40 = vpack.c.bf16 %v1078_v32, %v1078_v32 }
  0xba   :  { %v924_v6 = vand.u32 %v906_v0, %v2061_v26  ;;  %v1068_v18 = vpop.permute.xlu0 %1067  ;;  %v1940_v34 = vpop.permute.xlu1 %1939  ;;  %v921_v37 = vand.u32 %v905_v29, %v2061_v26  ;;  %v1268_v13 = vpack.c.bf16 %v1257_v36, %v1257_v36  ;;  %v1608_v36 = vlaneseq }
  0xbb   :  { %v1077_v21 = vsel %vm1073_vm8, %v1068_v18, %v1931_v7  ;;  %v1941_v39 = vunpack.i.l.bf16 %v1940_v34  ;;  %v1076_v44 = vsel %vm1073_vm8, %v1927_v58, %v1068_v18  ;;  %v1109_v10 = vand.u32 %v1089_v40, %v2061_v26  ;;  %v21_v40 = vld [vmem:[%s2386_s4] sm:$0x3f] }
  0xbc   :  { %v1088_v28 = vpack.c.bf16 %v1077_v21, %v1077_v21  ;;  %v1942_v46 = vunpack.i.h.bf16 %v1940_v34  ;;  %v1282_v16 = vand.u32 %v1268_v13, %v2061_v26  ;;  %v1087_v49 = vpack.c.bf16 %v1076_v44, %v1076_v44 }
  0xbd   :  { %1788 = vmatmul.mubr.msk.bf16.vlgmr.msra.gmra.mrb[4].mxu0 %vm70_vm3, %v2170_v47 }
  0xbe   :  { %933 = vmatpush1.bf16.msra.mxu0 %v915_v52  ;;  %964 = vmatprep.mubr.bf16.mxu0 %v1962_v11  ;;  %v1106_v35 = vand.u32 %v1088_v28, %v2061_v26  ;;  %v1945_v42 = vpop.permute.xlu1 %1944  ;;  %v1272_v48 = vpack.c.bf16 %v1942_v46, %v1942_v46  ;;  %v1103_v54 = vand.u32 %v1087_v49, %v2061_v26 }
  0xbf   :  { %1014 = vmatprep.subr.bf16.mxu0 %v930_v63  ;;  %v1947_v55 = vunpack.i.h.bf16 %v1945_v42  ;;  %v1946_v56 = vunpack.i.l.bf16 %v1945_v42  ;;  %v1260_v59 = vsel %vm1255_vm9, %v1941_v39, %v1942_v46 }
  0xc0   :  { %v1294_v60 = vand.u32 %v1272_v48, %v2061_v26  ;;  %v1271_v52 = vpack.c.bf16 %v1260_v59, %v1260_v59 }
  0xc1   :  { %v1439_v61 = vsel %vm1437_vm10, %v1946_v56, %v1947_v55 }
  0xc2   :  { %1783 = vmatmul.mubr.msk.bf16.vlgmr.msra.gmra.mrb[4].mxu1 %vm70_vm3, %v2128_v24  ;;  %v1244_v24 = vpop.permute.xlu0 %1243  ;;  %v1950_v51 = vpop.permute.xlu1 %1949  ;;  %v1450_v0 = vpack.c.bf16 %v1439_v61, %v1439_v61 }
  0xc3   :  { %792 = vmatpush1.bf16.msra.mxu1 %v739_v4  ;;  %823 = vmatprep.mubr.bf16.mxu1 %v1962_v11  ;;  %v1256_v45 = vsel %vm1255_vm9, %v1244_v24, %v1936_v27  ;;  %v1952_v57 = vunpack.i.h.bf16 %v1950_v51  ;;  %v1951_v58 = vunpack.i.l.bf16 %v1950_v51  ;;  %v1291_v4 = vand.u32 %v1271_v52, %v2061_v26  ;;  %v1801_v27 = vld [vmem:[%s2385_s1 + $0x20] sm:$0xf] }
  0xc4   :  { %973 = vmatprep.subr.bf16.mxu1 %v924_v6  ;;  %v1267_v50 = vpack.c.bf16 %v1256_v45, %v1256_v45  ;;  %v1464_v7 = vand.u32 %v1450_v0, %v2061_v26 }
  0xc5   :  { %1790 = vmatmul.mubr.msk.bf16.vlgmr.msra.gmra.mrb[0].mxu0 %vm70_vm3, %v2207_v8  ;;  %v1441_v62 = vsel %vm1437_vm10, %v1951_v58, %v1952_v57  ;;  %v1440_v18 = vsel %vm1437_vm10, %v1947_v55, %v1951_v58 }
  0xc6   :  { %1015 = vmatpush1.bf16.msra.mxu0 %v927_v14  ;;  %1046 = vmatprep.mubr.bf16.mxu0 %v1962_v11  ;;  %v1250_v41 = vpop.permute.xlu0 %1249  ;;  %v1279_v12 = vand.u32 %v1267_v50, %v2061_v26  ;;  %v1452_v2 = vpack.c.bf16 %v1441_v62, %v1441_v62  ;;  %v1451_v20 = vpack.c.bf16 %v1440_v18, %v1440_v18 }
  0xc7   :  { %1114 = vmatprep.subr.bf16.mxu0 %v1100_v9  ;;  %v1259_v43 = vsel %vm1255_vm9, %v1250_v41, %v1941_v39  ;;  %v1258_v15 = vsel %vm1255_vm9, %v1937_v25, %v1250_v41 }
  0xc8   :  { %v1269_v1 = vpack.c.bf16 %v1258_v15, %v1258_v15  ;;  %v1470_v14 = vand.u32 %v1452_v2, %v2061_v26  ;;  %v1467_v24 = vand.u32 %v1451_v20, %v2061_v26 }
  0xca   :  { %v1426_v63 = vpop.permute.xlu0 %1425 }
  0xcb   :  { %v1438_v5 = vsel %vm1437_vm10, %v1426_v63, %v1946_v56 }
  0xcc   :  { %v1449_v17 = vpack.c.bf16 %v1438_v5, %v1438_v5 }
  0xcd   :  { %1792 = vmatmul.mubr.msk.bf16.vlgmr.msra.gmra.mrb[4].mxu0 %vm70_vm3, %v2207_v8 }
  0xce   :  { %1115 = vmatpush1.bf16.msra.mxu0 %v1097_v31  ;;  %1787 = vmatmul.mubr.msk.bf16.vlgmr.msra.gmra.mrb[4].mxu1 %vm70_vm3, %v2170_v47  ;;  %v1270_v47 = vpack.c.bf16 %v1259_v43, %v1259_v43  ;;  %v1436_v6 = vpop.permute.xlu0 %1435  ;;  %v1461_v19 = vand.u32 %v1449_v17, %v2061_v26 }
  0xcf   :  { %974 = vmatpush1.bf16.msra.mxu1 %v921_v37  ;;  %1146 = vmatprep.mubr.bf16.mxu0 %v1962_v11  ;;  %v1454_v9 = vpack.c.bf16 %v1436_v6, %v1436_v6  ;;  %v1442_v21 = vsel %vm1437_vm10, %v1952_v57, %v1436_v6  ;;  %v1609_v37 = vshrl.u32 %v1608_v36, 7 }
  0xd0   :  { %1005 = vmatprep.mubr.bf16.mxu1 %v1962_v11  ;;  %1155 = vmatprep.subr.bf16.mxu1 %v1106_v35  ;;  %v1288_v53 = vand.u32 %v1270_v47, %v2061_v26  ;;  %v1453_v23 = vpack.c.bf16 %v1442_v21, %v1442_v21 }
  0xd1   :  { %1196 = vmatprep.subr.bf16.mxu0 %v1112_v38  ;;  %v1476_v22 = vand.u32 %v1454_v9, %v2061_v26  ;;  %v1610_v38 = vsub.s32 0, %v1609_v37  ;;  %v1614_v39 = vsub.s32 1, %v1609_v37  ;;  %v1618_v45 = vsub.s32 2, %v1609_v37 }
  0xd2   :  { %v1473_v25 = vand.u32 %v1453_v23, %v2061_v26  ;;  %v1622_v47 = vsub.s32 3, %v1609_v37  ;;  %v1626_v50 = vsub.s32 4, %v1609_v37  ;;  %v1630_v48 = vsub.s32 5, %v1609_v37 }
  0xd3   :  { %v2295_v43 = vrot.slane %v21_v40, %v1610_v38 }
  0xd4   :  { %v2317_v59 = vrot.slane %v21_v40, %v1626_v50  ;;  %v2321_v15 = vrot.slane %v21_v40, %v1630_v48 }
  0xd5   :  { %1794 = vmatmul.mubr.msk.bf16.vlgmr.msra.gmra.mrb[0].mxu0 %vm70_vm3, %v1793_v33 }
  0xd6   :  { %1197 = vmatpush1.bf16.msra.mxu0 %v1109_v10  ;;  %1228 = vmatprep.mubr.bf16.mxu0 %v1962_v11 }
  0xd7   :  { %1296 = vmatprep.subr.bf16.mxu0 %v1282_v16 }
  0xda   :  { %1791 = vmatmul.mubr.msk.bf16.vlgmr.msra.gmra.mrb[4].mxu1 %vm70_vm3, %v2207_v8  ;;  %v1285_v8 = vand.u32 %v1269_v1, %v2061_v26 }
  0xdb   :  { %1156 = vmatpush1.bf16.msra.mxu1 %v1103_v54  ;;  %1187 = vmatprep.mubr.bf16.mxu1 %v1962_v11  ;;  %v2309_v54 = vrot.slane %v21_v40, %v1618_v45 }
  0xdc   :  { %1337 = vmatprep.subr.bf16.mxu1 %v1288_v53 }
  0xdd   :  { %1796 = vmatmul.mubr.msk.bf16.vlgmr.msra.gmra.mrb[4].mxu0 %vm70_vm3, %v1793_v33 }
  0xde   :  { %1297 = vmatpush1.bf16.msra.mxu0 %v1279_v12  ;;  %1328 = vmatprep.mubr.bf16.mxu0 %v1962_v11  ;;  %v2313_v12 = vrot.slane %v21_v40, %v1622_v47 }
  0xdf   :  { %1378 = vmatprep.subr.bf16.mxu0 %v1294_v60 }
  0xe5   :  { %1798 = vmatmul.mubr.msk.bf16.vlgmr.msra.gmra.mrb[0].mxu0 %vm70_vm3, %v1797_v3 }
  0xe6   :  { %1795 = vmatmul.mubr.msk.bf16.vlgmr.msra.gmra.mrb[4].mxu1 %vm70_vm3, %v1793_v33  ;;  %1379 = vmatpush1.bf16.msra.mxu0 %v1291_v4  ;;  %v2299_v33 = vrot.slane %v21_v40, %v1614_v39 }
  0xe7   :  { %1338 = vmatpush1.bf16.msra.mxu1 %v1285_v8  ;;  %1410 = vmatprep.mubr.bf16.mxu0 %v1962_v11 }
  0xe8   :  { %1478 = vmatprep.subr.bf16.mxu0 %v1464_v7  ;;  %1369 = vmatprep.mubr.bf16.mxu1 %v1962_v11 }
  0xe9   :  { %1519 = vmatprep.subr.bf16.mxu1 %v1470_v14 }
  0xed   :  { %1800 = vmatmul.mubr.msk.bf16.vlgmr.msra.gmra.mrb[4].mxu0 %vm70_vm3, %v1797_v3 }
  0xee   :  { %1479 = vmatpush1.bf16.msra.mxu0 %v1461_v19  ;;  %1510 = vmatprep.mubr.bf16.mxu0 %v1962_v11 }
  0xef   :  { %1560 = vmatprep.subr.bf16.mxu0 %v1476_v22 }
  0xf2   :  { %1799 = vmatmul.mubr.msk.bf16.vlgmr.msra.gmra.mrb[4].mxu1 %vm70_vm3, %v1797_v3 }
  0xf3   :  { %1520 = vmatpush1.bf16.msra.mxu1 %v1467_v24  ;;  %1551 = vmatprep.mubr.bf16.mxu1 %v1962_v11 }
  0xf5   :  { %1802 = vmatmul.mubr.msk.bf16.vlgmr.msra.gmra.mrb[0].mxu0 %vm70_vm3, %v1801_v27 }
  0xf6   :  { %1561 = vmatpush1.bf16.msra.mxu0 %v1473_v25  ;;  %1592 = vmatprep.mubr.bf16.mxu0 %v1962_v11 }
  0xfd   :  { %1804 = vmatmul.mubr.msk.bf16.vlgmr.msra.gmra.mrb[4].mxu0 %vm70_vm3, %v1801_v27 }
  0xfe   :  { %1803 = vmatmul.mubr.msk.bf16.vlgmr.msra.gmra.mrb[4].mxu1 %vm70_vm3, %v1801_v27 }
 0x171   :  { %v292_v28 = vpop.f32.mrb[0].mxu1 }
 0x172   :  { %v294_v26 = vpop.f32.mrb[1].mxu1 }
 0x173   :  { %v296_v29 = vpop.f32.mrb[2].mxu1 }
 0x174   :  { %v297_v30 = vpop.f32.mrb[3].mxu1 }
 0x181   :  { %v374_v31 = vpop.f32.mrb[8].mxu1 }
 0x182   :  { %v376_v34 = vpop.f32.mrb[9].mxu1 }
 0x183   :  { %v378_v32 = vpop.f32.mrb[10].mxu1 }
 0x184   :  { %v379_v35 = vpop.f32.mrb[11].mxu1  ;;  %v1704_v32 = vld [vmem:[%s2387_s3] sm:$0xff] }
 0x185   :  { %v1692_v35 = vld [vmem:[%s2388_s2] sm:$0xff] }
 0x1c8   :  { %v1512_v41 = vpop.f32.mrb[0].mxu0 }
 0x1c9   :  { %v2293_v13 = vadd.f32 %v1512_v41, %v292_v28  ;;  %v1514_v42 = vpop.f32.mrb[1].mxu0 }
 0x1ca   :  { %v2297_v44 = vadd.f32 %v1514_v42, %v294_v26  ;;  %v1516_v10 = vpop.f32.mrb[2].mxu0 }
 0x1cb   :  { %v1653_v46 = vmul.f32 %v2293_v13, %v2293_v13  ;;  %v1517_v16 = vpop.f32.mrb[3].mxu0  ;;  %v1638_v51 = vmul.f32 %v2293_v13, %v2295_v43 }
 0x1cc   :  { %v1654_v49 = vmul.f32 %v2297_v44, %v2297_v44  ;;  %v1639_v53 = vmul.f32 %v2297_v44, %v2299_v33 }
 0x1cd   :  { %v1659_v55 = vmul.f32 %v1653_v46, %v2295_v43 }
 0x1ce   :  { %v1660_v56 = vmul.f32 %v1654_v49, %v2299_v33  ;;  %v1644_v52 = vadd.f32 %v1639_v53, %v1638_v51 }
 0x1d0   :  { %v1594_v57 = vpop.f32.mrb[4].mxu0  ;;  %v1665_v3 = vadd.f32 %v1660_v56, %v1659_v55 }
 0x1d1   :  { %v2315_v58 = vadd.f32 %v1594_v57, %v374_v31  ;;  %v2319_v60 = vpop.f32.mrb[4].mxu1  ;;  %v1596_v61 = vpop.f32.mrb[5].mxu0 }
 0x1d2   :  { %v1640_v62 = vmul.f32 %v2309_v54, %v2319_v60  ;;  %v1655_v63 = vmul.f32 %v2319_v60, %v2319_v60  ;;  %v2327_v0 = vadd.f32 %v1596_v61, %v376_v34  ;;  %v1555_v1 = vpop.f32.mrb[5].mxu1  ;;  %v1598_v2 = vpop.f32.mrb[6].mxu0 }
 0x1d3   :  { %v1641_v4 = vmul.f32 %v2313_v12, %v1555_v1  ;;  %v1656_v5 = vmul.f32 %v1555_v1, %v1555_v1  ;;  %v1557_v6 = vpop.f32.mrb[6].mxu1  ;;  %v1599_v7 = vpop.f32.mrb[7].mxu0  ;;  %v1657_v8 = vmul.f32 %v2315_v58, %v2315_v58  ;;  %v1642_v21 = vmul.f32 %v2315_v58, %v2317_v59 }
 0x1d4   :  { %v1645_v14 = vadd.f32 %v1644_v52, %v1640_v62  ;;  %v1661_v17 = vmul.f32 %v1655_v63, %v2309_v54  ;;  %v1658_v9 = vmul.f32 %v2327_v0, %v2327_v0  ;;  %v1558_v18 = vpop.f32.mrb[7].mxu1  ;;  %v1643_v20 = vmul.f32 %v2327_v0, %v2321_v15 }
 0x1d5   :  { %v1662_v19 = vmul.f32 %v1656_v5, %v2313_v12  ;;  %v1663_v27 = vmul.f32 %v1657_v8, %v2317_v59 }
 0x1d6   :  { %v1646_v22 = vadd.f32 %v1645_v14, %v1641_v4  ;;  %v1666_v23 = vadd.f32 %v1665_v3, %v1661_v17  ;;  %v1664_v24 = vmul.f32 %v1658_v9, %v2321_v15  ;;  %v1649_v26 = vsel %vm1648_vm11, %v1643_v20, 0.0 }
 0x1d8   :  { %v1647_v25 = vadd.f32 %v1646_v22, %v1642_v21  ;;  %v1667_v28 = vadd.f32 %v1666_v23, %v1662_v19  ;;  %v1669_v31 = vsel %vm1648_vm11, %v1664_v24, 0.0 }
 0x1da   :  { %v1650_v29 = vadd.f32 %v1649_v26, %v1647_v25  ;;  %v1668_v30 = vadd.f32 %v1667_v28, %v1663_v27 }
 0x1dc   :  { %1651 = vadd.xlane.f32.xlu1 %v1650_v29  ;;  %v1670_v34 = vadd.f32 %v1669_v31, %v1668_v30 }
 0x1de   :  { %1671 = vadd.xlane.f32.xlu0 %v1670_v34 }
 0x1ed   :  { %1707 = vperm.xlu1 %1954, %v1704_v32  }
 0x1f4   :  { %1695 = vperm.xlu0 %1953, %v1692_v35  }
 0x269   :  { %v1652_v36 = vpop.xlane.xlu1 %1651 }
 0x26a   :  { %v1673_v37 = vmul.f32 0.001953125, %v1652_v36 }
 0x26b   :  { %v1672_v38 = vpop.xlane.xlu0 %1671 }
 0x26c   :  { %v1674_v39 = vmul.f32 0.001953125, %v1672_v38  ;;  %v1675_v40 = vmul.f32 %v1673_v37, %v1673_v37  ;;  %v1678_v45 = vsub.f32 %v2293_v13, %v1673_v37  ;;  %v1679_v46 = vsub.f32 %v2297_v44, %v1673_v37 }
 0x26d   :  { %v1680_v16 = vsub.f32 %v2319_v60, %v1673_v37  ;;  %v1681_v47 = vsub.f32 %v1555_v1, %v1673_v37  ;;  %v1682_v11 = vsub.f32 %v2315_v58, %v1673_v37  ;;  %v1683_v48 = vsub.f32 %v2327_v0, %v1673_v37  ;;  %v1708_v52 = vpop.permute.xlu1 %1707 }
 0x26e   :  { %v1676_v41 = vsub.f32 %v1674_v39, %v1675_v40 }
 0x270   :  { %v1677_v42 = vmax.f32 %v1676_v41, 0.0 }
 0x272   :  { %v1684_v10 = vadd.f32 1e-05, %v1677_v42 }
 0x273   :  { %v1696_v50 = vpop.permute.xlu0 %1695 }
 0x274   :  { %1959 = vrsqrt.f32 %v1684_v10 }
 0x27e   :  { %v1960_v49 = vpop.eup %1959 }
 0x27f   :  { %v1686_v51 = vmul.f32 %v1960_v49, %v1678_v45  ;;  %v1687_v53 = vmul.f32 %v1960_v49, %v1679_v46  ;;  %v1688_v55 = vmul.f32 %v1960_v49, %v1680_v16  ;;  %v1689_v56 = vmul.f32 %v1960_v49, %v1681_v47 }
 0x280   :  { %v1690_v57 = vmul.f32 %v1960_v49, %v1682_v11  ;;  %v1691_v61 = vmul.f32 %v1960_v49, %v1683_v48 }
 0x281   :  { %v1698_v62 = vmul.f32 %v1696_v50, %v1686_v51  ;;  %v1699_v13 = vmul.f32 %v1696_v50, %v1687_v53  ;;  %v1700_v63 = vmul.f32 %v1696_v50, %v1688_v55  ;;  %v1701_v44 = vmul.f32 %v1696_v50, %v1689_v56 }
 0x282   :  { %v1702_v2 = vmul.f32 %v1696_v50, %v1690_v57  ;;  %v1703_v60 = vmul.f32 %v1696_v50, %v1691_v61 }
 0x283   :  { %v1710_v1 = vadd.f32 %v1708_v52, %v1698_v62  ;;  %v1711_v3 = vadd.f32 %v1708_v52, %v1699_v13  ;;  %v1712_v4 = vadd.f32 %v1708_v52, %v1700_v63  ;;  %v1713_v5 = vadd.f32 %v1708_v52, %v1701_v44 }
 0x284   :  { %v1714_v58 = vadd.f32 %v1708_v52, %v1702_v2  ;;  %v1715_v6 = vadd.f32 %v1708_v52, %v1703_v60 }
 0x285   :  { %v1716_v0 = vmax.f32 %v1710_v1, 0.0  ;;  %v1717_v7 = vmax.f32 %v1711_v3, 0.0  ;;  %v1718_v8 = vmax.f32 %v1712_v4, 0.0  ;;  %v1719_v14 = vmax.f32 %v1713_v5, 0.0 }
 0x286   :  { %v1720_v17 = vmax.f32 %v1714_v58, 0.0  ;;  %v1721_v9 = vmax.f32 %v1715_v6, 0.0 }
 0x287   :  { %v1722_v18 = vmul.f32 %v1716_v0, %v2295_v43  ;;  %v1723_v19 = vmul.f32 %v1717_v7, %v2299_v33  ;;  %v1724_v20 = vmul.f32 %v1718_v8, %v2309_v54  ;;  %v1725_v21 = vmul.f32 %v1719_v14, %v2313_v12 }
 0x288   :  { %v1726_v22 = vmul.f32 %v1720_v17, %v2317_v59  ;;  %v1727_v23 = vmul.f32 %v1721_v9, %v2321_v15 }
 0x289   :  { %v1808_v24 = vpack.c.bf16 %v1723_v19, %v1722_v18  ;;  %v1809_v25 = vpack.c.bf16 %v1725_v21, %v1724_v20 }
 0x28a   :  { %v1810_v27 = vpack.c.bf16 %v1727_v23, %v1726_v22 }
 0x28b   :  { %1756 = vst [vmem:[%s2389_s5 + $0x4] sm:$0xff] %v1808_v24  ;;  %1757 = vst [vmem:[%s2389_s5 + $0xc] sm:$0xff] %v1809_v25 }
 0x28c   :  { %1761 = vst.msk [vmem:[%s2389_s5 + $0x14] sm:$0xff] %vm1760_vm14, %v1810_v27 }

// kernel: _lambda_.5
= control target key start
LH: loop header
LB: loop body
LE: loop exit
PB: predicated region body
PF: predicated region fallthrough
CT: control target
= control target key end

     0   :  { %v3703_v2 = vmov 0   ;;  %s3704_s9 = smov 18   ;;  %s3705_s12 = smov 19   ;;  %vm69_vm0 = vcmask 146432   ;;  %vm79_vm1 = vcmask 1043456   ;;  %vm75_vm2 = vcmask 64512   ;;  %s4501_s0 = inlined_call_operand.vmem [shape: bf16[8,896], index: 0, kind: input, shape index: {}]   ;;  %s4502_s1 = inlined_call_operand.vmem [shape: bf16[9,8,8], index: 1, kind: input, shape index: {}]   ;;  %s4503_s7 = inlined_call_operand.vmem [shape: f32[1,648], index: 7, kind: input, shape index: {}]   ;;  %s4504_s3 = inlined_call_operand.vmem [shape: f32[8,1], index: 3, kind: input, shape index: {}]   ;;  %s4505_s2 = inlined_call_operand.vmem [shape: f32[8,1], index: 2, kind: input, shape index: {}]   ;;  %s4506_s4 = inlined_call_operand.vmem [shape: bf16[9,8,8], index: 4, kind: input, shape index: {}]   ;;  %s4507_s6 = inlined_call_operand.vmem [shape: f32[8,1], index: 6, kind: input, shape index: {}]   ;;  %s4508_s5 = inlined_call_operand.vmem [shape: f32[8,1], index: 5, kind: input, shape index: {}]   ;;  %s4509_s8 = inlined_call_operand.vmem [shape: bf16[8,896], index: 8, kind: output, shape index: {}]  }
   0x1   :  { %v32_v0 = vld [vmem:[%s4501_s0 + $0x8] sm:$0xff]  ;;  %v31_v1 = vld [vmem:[%s4501_s0] sm:$0xff]  ;;  %130 = vmatprep.mubr.bf16.mxu0 %v3703_v2  ;;  %3686 = vset.pattern.permute.xlu0 %v3703_v2  ;;  %v33_v7 = vld [vmem:[%s4501_s0 + $0x10] sm:$0xff]  ;;  %s3706_s13 = smov 17   ;;  %s3707_s14 = smov 1   ;;  %vm233_vm3 = vcmask 154624   ;;  %3310 = vst [vmem:[%s4509_s8] sm:$0xff] %v3703_v2 }
   0x2   :  { %v3767_v3 = vcombine.low %v32_v0, %v32_v0  ;;  %v3347_v4 = vcombine.low %v31_v1, %v31_v1  ;;  %3687 = vset.pattern.permute.xlu1 %v3703_v2  ;;  %1786 = vmatprep.mubr.bf16.mxu1 %v3703_v2  ;;  %v3773_v5 = vcombine.high %v31_v1, %v31_v1  ;;  %v34_v10 = vld [vmem:[%s4501_s0 + $0x18] sm:$0xf]  ;;  %s3708_s17 = smov 127   ;;  %s3709_s18 = smov 111   ;;  %v3353_v20 = vld [vmem:[%s4502_s1 + $0x4] sm:$0xf] }
   0x3   :  { %v3776_v6 = vcombine.high %v32_v0, %v32_v0  ;;  %v3785_v8 = vcombine.low %v33_v7, %v33_v7  ;;  %v3787_v9 = vcombine.high %v33_v7, %v33_v7  ;;  %v3829_v11 = vcombine.low %v34_v10, %v34_v10  ;;  %s3710_s19 = smov 110   ;;  %s3711_s20 = smov 109   ;;  %v48_v37 = vld [vmem:[%s4502_s1] sm:$0xf]  ;;  %v3366_v52 = vld [vmem:[%s4502_s1 + $0x8] sm:$0xf] }
   0x4   :  { %61 = vrot.lane.b32.xlu1 %v3767_v3, %s3704_s9  ;;  %57 = vrot.lane.b32.xlu0 %v3347_v4, %s3704_s9  ;;  %vm397_vm4 = vcmask 138240   ;;  %vm571_vm5 = vcmask 7168   ;;  %v3374_v10 = vld [vmem:[%s4502_s1 + $0xc] sm:$0xf]  ;;  %vm894_vm6 = vcmask 1039360   ;;  %vm1064_vm7 = vcmask 908288  }
   0x5   :  { %vm1234_vm8 = vcmask 900096   ;;  %vm1404_vm9 = vcmask 891904   ;;  %3311 = vst [vmem:[%s4509_s8 + $0x8] sm:$0xff] %v3703_v2  ;;  %3312 = vst [vmem:[%s4509_s8 + $0x10] sm:$0xff] %v3703_v2  ;;  %vm3340_vm10 = vcmask 64516  }
   0x6   :  { %3313 = vst [vmem:[%s4509_s8 + $0x18] sm:$0xf] %v3703_v2  ;;  %vm3341_vm11 = vmor %vm3340_vm10, %vm79_vm1 }
   0x8   :  { %63 = vrot.lane.b32.xlu1 %v3776_v6, %s3704_s9  ;;  %59 = vrot.lane.b32.xlu0 %v3773_v5, %s3704_s9 }
   0xc   :  { %65 = vrot.lane.b32.xlu0 %v3785_v8, %s3704_s9  ;;  %67 = vrot.lane.b32.xlu1 %v3787_v9, %s3704_s9 }
  0x10   :  { %221 = vrot.lane.b32.xlu0 %v3347_v4, %s3705_s12  ;;  %223 = vrot.lane.b32.xlu1 %v3773_v5, %s3705_s12 }
  0x14   :  { %225 = vrot.lane.b32.xlu0 %v3767_v3, %s3705_s12  ;;  %227 = vrot.lane.b32.xlu1 %v3776_v6, %s3705_s12 }
  0x18   :  { %229 = vrot.lane.b32.xlu0 %v3785_v8, %s3705_s12  ;;  %231 = vrot.lane.b32.xlu1 %v3787_v9, %s3705_s12 }
  0x1c   :  { %385 = vrot.lane.b32.xlu0 %v3347_v4, %s3706_s13  ;;  %387 = vrot.lane.b32.xlu1 %v3773_v5, %s3706_s13 }
  0x20   :  { %389 = vrot.lane.b32.xlu0 %v3767_v3, %s3706_s13  ;;  %391 = vrot.lane.b32.xlu1 %v3776_v6, %s3706_s13 }
  0x24   :  { %393 = vrot.lane.b32.xlu0 %v3785_v8, %s3706_s13  ;;  %395 = vrot.lane.b32.xlu1 %v3787_v9, %s3706_s13 }
  0x28   :  { %557 = vrot.lane.b32.xlu0 %v3347_v4, %s3707_s14  ;;  %559 = vrot.lane.b32.xlu1 %v3773_v5, %s3707_s14 }
  0x2c   :  { %561 = vrot.lane.b32.xlu0 %v3767_v3, %s3707_s14  ;;  %563 = vrot.lane.b32.xlu1 %v3776_v6, %s3707_s14 }
  0x30   :  { %565 = vrot.lane.b32.xlu0 %v3785_v8, %s3707_s14  ;;  %567 = vrot.lane.b32.xlu1 %v3787_v9, %s3707_s14 }
  0x34   :  { %569 = vrot.lane.b32.xlu0 %v3829_v11, %s3707_s14  ;;  %882 = vrot.lane.b32.xlu1 %v3773_v5, %s3708_s17 }
  0x38   :  { %886 = vrot.lane.b32.xlu1 %v3776_v6, %s3708_s17  ;;  %884 = vrot.lane.b32.xlu0 %v3767_v3, %s3708_s17 }
  0x3c   :  { %888 = vrot.lane.b32.xlu0 %v3785_v8, %s3708_s17  ;;  %890 = vrot.lane.b32.xlu1 %v3787_v9, %s3708_s17 }
  0x40   :  { %892 = vrot.lane.b32.xlu0 %v3829_v11, %s3708_s17  ;;  %1052 = vrot.lane.b32.xlu1 %v3773_v5, %s3709_s18 }
  0x44   :  { %1056 = vrot.lane.b32.xlu1 %v3776_v6, %s3709_s18  ;;  %1054 = vrot.lane.b32.xlu0 %v3767_v3, %s3709_s18 }
  0x48   :  { %1058 = vrot.lane.b32.xlu0 %v3785_v8, %s3709_s18  ;;  %1060 = vrot.lane.b32.xlu1 %v3787_v9, %s3709_s18 }
  0x4c   :  { %1062 = vrot.lane.b32.xlu0 %v3829_v11, %s3709_s18  ;;  %1222 = vrot.lane.b32.xlu1 %v3773_v5, %s3710_s19 }
  0x50   :  { %1226 = vrot.lane.b32.xlu1 %v3776_v6, %s3710_s19  ;;  %1224 = vrot.lane.b32.xlu0 %v3767_v3, %s3710_s19 }
  0x54   :  { %1228 = vrot.lane.b32.xlu0 %v3785_v8, %s3710_s19  ;;  %1230 = vrot.lane.b32.xlu1 %v3787_v9, %s3710_s19 }
  0x58   :  { %1232 = vrot.lane.b32.xlu0 %v3829_v11, %s3710_s19  ;;  %1392 = vrot.lane.b32.xlu1 %v3773_v5, %s3711_s20 }
  0x5c   :  { %1396 = vrot.lane.b32.xlu1 %v3776_v6, %s3711_s20  ;;  %1394 = vrot.lane.b32.xlu0 %v3767_v3, %s3711_s20 }
  0x60   :  { %1398 = vrot.lane.b32.xlu0 %v3785_v8, %s3711_s20  ;;  %1400 = vrot.lane.b32.xlu1 %v3787_v9, %s3711_s20 }
  0x64   :  { %1402 = vrot.lane.b32.xlu0 %v3829_v11, %s3711_s20 }
  0x76   :  { %v62_v12 = vpop.permute.xlu1 %61  ;;  %v58_v13 = vpop.permute.xlu0 %57 }
  0x7a   :  { %v64_v14 = vpop.permute.xlu1 %63  ;;  %v60_v15 = vpop.permute.xlu0 %59 }
  0x7b   :  { %v71_v16 = vsel %vm69_vm0, %v60_v15, %v62_v12  ;;  %v70_v17 = vsel %vm69_vm0, %v58_v13, %v60_v15  ;;  %v72_v19 = vsel %vm69_vm0, %v62_v12, %v64_v14 }
  0x7c   :  { %3354 = vmatprep.subr.msk.bf16.mxu0 %vm79_vm1, %v71_v16  ;;  %v81_v18 = vsel %vm79_vm1, %v70_v17, 0  ;;  %v87_v23 = vsel %vm79_vm1, %v72_v19, 0  ;;  %v734_v17 = vsel %vm79_vm1, %v3773_v5, 0  ;;  %v740_v19 = vsel %vm79_vm1, %v3776_v6, 0 }
  0x7d   :  { %99 = vmatpush1.bf16.msra.mxu0 %v81_v18  ;;  %v3381_v18 = vld [vmem:[%s4502_s1 + $0x10] sm:$0xf] }
  0x7e   :  { %v66_v21 = vpop.permute.xlu0 %65  ;;  %v68_v24 = vpop.permute.xlu1 %67 }
  0x7f   :  { %v73_v22 = vsel %vm69_vm0, %v64_v14, %v66_v21  ;;  %v74_v27 = vsel %vm69_vm0, %v66_v21, %v68_v24 }
  0x80   :  { %3355 = vmatmul.mubr.msk.bf16.vlgmr.msra.gmra.mrb[0].mxu0 %vm75_vm2, %v3353_v20  ;;  %3356 = vmatprep.subr.msk.bf16.mxu0 %vm79_vm1, %v73_v22  ;;  %v93_v30 = vsel %vm79_vm1, %v74_v27, 0 }
  0x81   :  { %140 = vmatpush1.bf16.msra.mxu0 %v87_v23  ;;  %171 = vmatprep.mubr.bf16.mxu0 %v3703_v2 }
  0x82   :  { %3358 = vmatprep.subr.msk.bf16.mxu0 %vm79_vm1, %v68_v24  ;;  %v222_v25 = vpop.permute.xlu0 %221  ;;  %v224_v26 = vpop.permute.xlu1 %223 }
  0x83   :  { %v234_v31 = vsel %vm233_vm3, %v222_v25, %v224_v26  ;;  %v3388_v25 = vld [vmem:[%s4502_s1 + $0x14] sm:$0xf] }
  0x84   :  { %v243_v33 = vsel %vm79_vm1, %v234_v31, 0 }
  0x86   :  { %v226_v28 = vpop.permute.xlu0 %225  ;;  %v228_v34 = vpop.permute.xlu1 %227 }
  0x87   :  { %v235_v29 = vsel %vm233_vm3, %v224_v26, %v226_v28  ;;  %v236_v36 = vsel %vm233_vm3, %v226_v28, %v228_v34 }
  0x88   :  { %3357 = vmatmul.mubr.msk.bf16.vlgmr.msra.gmra.mrb[4].mxu0 %vm75_vm2, %v3353_v20  ;;  %v249_v39 = vsel %vm79_vm1, %v236_v36, 0 }
  0x89   :  { %181 = vmatpush1.bf16.msra.mxu0 %v93_v30  ;;  %212 = vmatprep.mubr.bf16.mxu0 %v3703_v2 }
  0x8a   :  { %3360 = vmatprep.subr.msk.bf16.mxu0 %vm79_vm1, %v235_v29  ;;  %v230_v32 = vpop.permute.xlu0 %229  ;;  %v232_v40 = vpop.permute.xlu1 %231 }
  0x8b   :  { %v237_v35 = vsel %vm233_vm3, %v228_v34, %v230_v32  ;;  %v238_v43 = vsel %vm233_vm3, %v230_v32, %v232_v40 }
  0x8c   :  { %v255_v45 = vsel %vm79_vm1, %v238_v43, 0 }
  0x8e   :  { %v386_v38 = vpop.permute.xlu0 %385  ;;  %v388_v41 = vpop.permute.xlu1 %387 }
  0x8f   :  { %v398_v46 = vsel %vm397_vm4, %v386_v38, %v388_v41 }
  0x90   :  { %3359 = vmatmul.mubr.msk.bf16.vlgmr.msra.gmra.mrb[8].mxu0 %vm75_vm2, %v3353_v20  ;;  %v407_v48 = vsel %vm79_vm1, %v398_v46, 0 }
  0x91   :  { %261 = vmatpush1.bf16.msra.mxu0 %v243_v33  ;;  %292 = vmatprep.mubr.bf16.mxu0 %v3703_v2 }
  0x92   :  { %3362 = vmatprep.subr.msk.bf16.mxu0 %vm79_vm1, %v237_v35  ;;  %v390_v42 = vpop.permute.xlu0 %389  ;;  %v392_v49 = vpop.permute.xlu1 %391 }
  0x93   :  { %v399_v44 = vsel %vm397_vm4, %v388_v41, %v390_v42  ;;  %v400_v51 = vsel %vm397_vm4, %v390_v42, %v392_v49 }
  0x94   :  { %v413_v54 = vsel %vm79_vm1, %v400_v51, 0 }
  0x96   :  { %v394_v47 = vpop.permute.xlu0 %393  ;;  %v396_v55 = vpop.permute.xlu1 %395 }
  0x97   :  { %v401_v50 = vsel %vm397_vm4, %v392_v49, %v394_v47  ;;  %v402_v58 = vsel %vm397_vm4, %v394_v47, %v396_v55 }
  0x98   :  { %3361 = vmatmul.mubr.msk.bf16.vlgmr.msra.gmra.mrb[0].mxu0 %vm75_vm2, %v48_v37  ;;  %v419_v60 = vsel %vm79_vm1, %v402_v58, 0 }
  0x99   :  { %302 = vmatpush1.bf16.msra.mxu0 %v249_v39  ;;  %333 = vmatprep.mubr.bf16.mxu0 %v3703_v2 }
  0x9a   :  { %3364 = vmatprep.subr.msk.bf16.mxu0 %vm79_vm1, %v232_v40  ;;  %v558_v53 = vpop.permute.xlu0 %557  ;;  %v560_v56 = vpop.permute.xlu1 %559  ;;  %v3395_v40 = vld [vmem:[%s4502_s1 + $0x18] sm:$0xf] }
  0x9b   :  { %v572_v61 = vsel %vm571_vm5, %v558_v53, %v560_v56 }
  0x9c   :  { %v582_v63 = vsel %vm79_vm1, %v572_v61, 0 }
  0x9e   :  { %v562_v57 = vpop.permute.xlu0 %561  ;;  %v564_v0 = vpop.permute.xlu1 %563 }
  0x9f   :  { %v573_v59 = vsel %vm571_vm5, %v560_v56, %v562_v57  ;;  %v574_v7 = vsel %vm571_vm5, %v562_v57, %v564_v0 }
  0xa0   :  { %3363 = vmatmul.mubr.msk.bf16.vlgmr.msra.gmra.mrb[4].mxu0 %vm75_vm2, %v48_v37  ;;  %v588_v14 = vsel %vm79_vm1, %v574_v7, 0 }
  0xa1   :  { %343 = vmatpush1.bf16.msra.mxu0 %v255_v45  ;;  %374 = vmatprep.mubr.bf16.mxu0 %v3703_v2 }
  0xa2   :  { %3367 = vmatprep.subr.msk.bf16.mxu0 %vm79_vm1, %v399_v44  ;;  %v566_v62 = vpop.permute.xlu0 %565  ;;  %v568_v12 = vpop.permute.xlu1 %567 }
  0xa3   :  { %v575_v1 = vsel %vm571_vm5, %v564_v0, %v566_v62  ;;  %v576_v15 = vsel %vm571_vm5, %v566_v62, %v568_v12 }
  0xa4   :  { %v594_v16 = vsel %vm79_vm1, %v576_v15, 0 }
  0xa6   :  { %v570_v4 = vpop.permute.xlu0 %569  ;;  %v883_v20 = vpop.permute.xlu1 %882 }
  0xa7   :  { %v577_v13 = vsel %vm571_vm5, %v568_v12, %v570_v4 }
  0xa8   :  { %3365 = vmatmul.mubr.msk.bf16.vlgmr.msra.gmra.mrb[8].mxu0 %vm75_vm2, %v48_v37 }
  0xa9   :  { %425 = vmatpush1.bf16.msra.mxu0 %v407_v48  ;;  %456 = vmatprep.mubr.bf16.mxu0 %v3703_v2 }
  0xaa   :  { %3369 = vmatprep.subr.msk.bf16.mxu0 %vm79_vm1, %v401_v50  ;;  %v885_v5 = vpop.permute.xlu0 %884 }
  0xab   :  { %v895_v6 = vsel %vm894_vm6, %v883_v20, %v885_v5 }
  0xae   :  { %v889_v23 = vpop.permute.xlu0 %888 }
  0xb0   :  { %3368 = vmatmul.mubr.msk.bf16.vlgmr.msra.gmra.mrb[0].mxu0 %vm75_vm2, %v3366_v52 }
  0xb1   :  { %466 = vmatpush1.bf16.msra.mxu0 %v413_v54  ;;  %497 = vmatprep.mubr.bf16.mxu0 %v3703_v2 }
  0xb2   :  { %3371 = vmatprep.subr.msk.bf16.mxu0 %vm79_vm1, %v396_v55  ;;  %v893_v28 = vpop.permute.xlu0 %892  ;;  %v3402_v55 = vld [vmem:[%s4502_s1 + $0x1c] sm:$0xf] }
  0xb6   :  { %v1055_v30 = vpop.permute.xlu0 %1054 }
  0xb8   :  { %3370 = vmatmul.mubr.msk.bf16.vlgmr.msra.gmra.mrb[4].mxu0 %vm75_vm2, %v3366_v52 }
  0xb9   :  { %507 = vmatpush1.bf16.msra.mxu0 %v419_v60  ;;  %538 = vmatprep.mubr.bf16.mxu0 %v3703_v2 }
  0xba   :  { %3375 = vmatprep.subr.msk.bf16.mxu0 %vm79_vm1, %v573_v59  ;;  %v1059_v37 = vpop.permute.xlu0 %1058 }
  0xbe   :  { %v1063_v43 = vpop.permute.xlu0 %1062 }
  0xc0   :  { %3372 = vmatmul.mubr.msk.bf16.vlgmr.msra.gmra.mrb[8].mxu0 %vm75_vm2, %v3366_v52 }
  0xc1   :  { %600 = vmatpush1.bf16.msra.mxu0 %v582_v63  ;;  %631 = vmatprep.mubr.bf16.mxu0 %v3703_v2 }
  0xc2   :  { %3377 = vmatprep.subr.msk.bf16.mxu0 %vm79_vm1, %v575_v1  ;;  %v1225_v45 = vpop.permute.xlu0 %1224 }
  0xc6   :  { %v1229_v52 = vpop.permute.xlu0 %1228 }
  0xc8   :  { %3376 = vmatmul.mubr.msk.bf16.vlgmr.msra.gmra.mrb[0].mxu0 %vm75_vm2, %v3374_v10 }
  0xc9   :  { %641 = vmatpush1.bf16.msra.mxu0 %v588_v14  ;;  %672 = vmatprep.mubr.bf16.mxu0 %v3703_v2 }
  0xca   :  { %3379 = vmatprep.subr.msk.bf16.mxu0 %vm79_vm1, %v577_v13  ;;  %v1233_v58 = vpop.permute.xlu0 %1232  ;;  %v3409_v13 = vld [vmem:[%s4502_s1 + $0x20] sm:$0xf] }
  0xce   :  { %v1395_v60 = vpop.permute.xlu0 %1394 }
  0xd0   :  { %3378 = vmatmul.mubr.msk.bf16.vlgmr.msra.gmra.mrb[4].mxu0 %vm75_vm2, %v3374_v10 }
  0xd1   :  { %682 = vmatpush1.bf16.msra.mxu0 %v594_v16  ;;  %713 = vmatprep.mubr.bf16.mxu0 %v3703_v2 }
  0xd2   :  { %3382 = vmatprep.subr.msk.bf16.mxu0 %vm79_vm1, %v3767_v3  ;;  %v887_v3 = vpop.permute.xlu1 %886  ;;  %v1399_v7 = vpop.permute.xlu0 %1398 }
  0xd3   :  { %v896_v21 = vsel %vm894_vm6, %v885_v5, %v887_v3 }
  0xd6   :  { %v891_v22 = vpop.permute.xlu1 %890  ;;  %v1403_v15 = vpop.permute.xlu0 %1402 }
  0xd7   :  { %v898_v24 = vsel %vm894_vm6, %v889_v23, %v891_v22  ;;  %v899_v31 = vsel %vm894_vm6, %v891_v22, %v893_v28 }
  0xd8   :  { %3380 = vmatmul.mubr.msk.bf16.vlgmr.msra.gmra.mrb[8].mxu0 %vm75_vm2, %v3374_v10  ;;  %v916_v33 = vsel %vm79_vm1, %v899_v31, 0 }
  0xd9   :  { %752 = vmatpush1.bf16.msra.mxu0 %v734_v17  ;;  %783 = vmatprep.mubr.bf16.mxu0 %v3703_v2 }
  0xda   :  { %3384 = vmatprep.subr.msk.bf16.mxu0 %vm79_vm1, %v3785_v8  ;;  %v746_v8 = vsel %vm79_vm1, %v3787_v9, 0  ;;  %v897_v9 = vsel %vm894_vm6, %v887_v3, %v889_v23  ;;  %v1053_v26 = vpop.permute.xlu1 %1052  ;;  %v30_v3 = vld [vmem:[%s4503_s7] sm:$0x3f] }
  0xdb   :  { %v910_v27 = vsel %vm79_vm1, %v897_v9, 0  ;;  %v1065_v34 = vsel %vm1064_vm7, %v1053_v26, %v1055_v30 }
  0xdc   :  { %v1074_v36 = vsel %vm79_vm1, %v1065_v34, 0 }
  0xde   :  { %v1057_v29 = vpop.permute.xlu1 %1056 }
  0xdf   :  { %v1066_v32 = vsel %vm1064_vm7, %v1055_v30, %v1057_v29  ;;  %v1067_v39 = vsel %vm1064_vm7, %v1057_v29, %v1059_v37 }
  0xe0   :  { %3383 = vmatmul.mubr.msk.bf16.vlgmr.msra.gmra.mrb[0].mxu0 %vm75_vm2, %v3381_v18  ;;  %v1080_v42 = vsel %vm79_vm1, %v1067_v39, 0 }
  0xe1   :  { %793 = vmatpush1.bf16.msra.mxu0 %v740_v19  ;;  %824 = vmatprep.mubr.bf16.mxu0 %v3703_v2 }
  0xe2   :  { %3386 = vmatprep.subr.msk.bf16.mxu0 %vm79_vm1, %v3829_v11  ;;  %v904_v11 = vsel %vm79_vm1, %v895_v6, 0  ;;  %v1061_v35 = vpop.permute.xlu1 %1060 }
  0xe3   :  { %v1068_v38 = vsel %vm1064_vm7, %v1059_v37, %v1061_v35  ;;  %v1069_v46 = vsel %vm1064_vm7, %v1061_v35, %v1063_v43 }
  0xe4   :  { %v1086_v48 = vsel %vm79_vm1, %v1069_v46, 0 }
  0xe6   :  { %v1223_v41 = vpop.permute.xlu1 %1222 }
  0xe7   :  { %v1235_v49 = vsel %vm1234_vm8, %v1223_v41, %v1225_v45 }
  0xe8   :  { %3385 = vmatmul.mubr.msk.bf16.vlgmr.msra.gmra.mrb[4].mxu0 %vm75_vm2, %v3381_v18  ;;  %v1244_v51 = vsel %vm79_vm1, %v1235_v49, 0 }
  0xe9   :  { %834 = vmatpush1.bf16.msra.mxu0 %v746_v8  ;;  %865 = vmatprep.mubr.bf16.mxu0 %v3703_v2 }
  0xea   :  { %3389 = vmatprep.subr.msk.bf16.mxu0 %vm79_vm1, %v896_v21  ;;  %v1227_v44 = vpop.permute.xlu1 %1226 }
  0xeb   :  { %v1236_v47 = vsel %vm1234_vm8, %v1225_v45, %v1227_v44  ;;  %v1237_v54 = vsel %vm1234_vm8, %v1227_v44, %v1229_v52 }
  0xec   :  { %v1250_v57 = vsel %vm79_vm1, %v1237_v54, 0 }
  0xee   :  { %v1231_v50 = vpop.permute.xlu1 %1230 }
  0xef   :  { %v1238_v53 = vsel %vm1234_vm8, %v1229_v52, %v1231_v50  ;;  %v1239_v61 = vsel %vm1234_vm8, %v1231_v50, %v1233_v58 }
  0xf0   :  { %3387 = vmatmul.mubr.msk.bf16.vlgmr.msra.gmra.mrb[8].mxu0 %vm75_vm2, %v3381_v18  ;;  %v1256_v63 = vsel %vm79_vm1, %v1239_v61, 0  ;;  %v1561_v18 = vlaneseq }
  0xf1   :  { %922 = vmatpush1.bf16.msra.mxu0 %v904_v11  ;;  %953 = vmatprep.mubr.bf16.mxu0 %v3703_v2 }
  0xf2   :  { %3391 = vmatprep.subr.msk.bf16.mxu0 %vm79_vm1, %v898_v24  ;;  %v1393_v56 = vpop.permute.xlu1 %1392  ;;  %v1562_v19 = vshrl.u32 %v1561_v18, 7 }
  0xf3   :  { %v1405_v0 = vsel %vm1404_vm9, %v1393_v56, %v1395_v60 }
  0xf4   :  { %v1414_v4 = vsel %vm79_vm1, %v1405_v0, 0  ;;  %v1563_v20 = vsub.s32 0, %v1562_v19  ;;  %v1567_v5 = vsub.s32 1, %v1562_v19  ;;  %v1571_v24 = vsub.s32 2, %v1562_v19 }
  0xf5   :  { %v1579_v39 = vsub.s32 4, %v1562_v19 }
  0xf6   :  { %v1397_v59 = vpop.permute.xlu1 %1396  ;;  %v4065_v8 = vrot.slane %v30_v3, %v1563_v20  ;;  %v4067_v21 = vrot.slane %v30_v3, %v1567_v5 }
  0xf7   :  { %v1406_v62 = vsel %vm1404_vm9, %v1395_v60, %v1397_v59  ;;  %v1407_v12 = vsel %vm1404_vm9, %v1397_v59, %v1399_v7 }
  0xf8   :  { %3390 = vmatmul.mubr.msk.bf16.vlgmr.msra.gmra.mrb[0].mxu0 %vm75_vm2, %v3388_v25  ;;  %v1420_v14 = vsel %vm79_vm1, %v1407_v12, 0  ;;  %v1656_v12 = vld [vmem:[%s4504_s3] sm:$0xff] }
  0xf9   :  { %963 = vmatpush1.bf16.msra.mxu0 %v910_v27  ;;  %994 = vmatprep.mubr.bf16.mxu0 %v3703_v2  ;;  %v1575_v27 = vsub.s32 3, %v1562_v19 }
  0xfa   :  { %3393 = vmatprep.subr.msk.bf16.mxu0 %vm79_vm1, %v893_v28  ;;  %v1401_v1 = vpop.permute.xlu1 %1400 }
  0xfb   :  { %v1408_v10 = vsel %vm1404_vm9, %v1399_v7, %v1401_v1  ;;  %v1409_v16 = vsel %vm1404_vm9, %v1401_v1, %v1403_v15  ;;  %v4085_v34 = vrot.slane %v30_v3, %v1575_v27 }
  0xfc   :  { %v1426_v17 = vsel %vm79_vm1, %v1409_v16, 0 }
 0x100   :  { %3392 = vmatmul.mubr.msk.bf16.vlgmr.msra.gmra.mrb[4].mxu0 %vm75_vm2, %v3388_v25 }
 0x101   :  { %1004 = vmatpush1.bf16.msra.mxu0 %v916_v33  ;;  %1035 = vmatprep.mubr.bf16.mxu0 %v3703_v2 }
 0x102   :  { %3396 = vmatprep.subr.msk.bf16.mxu0 %vm79_vm1, %v1066_v32  ;;  %v4083_v32 = vrot.slane %v30_v3, %v1571_v24 }
 0x108   :  { %3394 = vmatmul.mubr.msk.bf16.vlgmr.msra.gmra.mrb[8].mxu0 %vm75_vm2, %v3388_v25 }
 0x109   :  { %1092 = vmatpush1.bf16.msra.mxu0 %v1074_v36  ;;  %1123 = vmatprep.mubr.bf16.mxu0 %v3703_v2 }
 0x10a   :  { %3398 = vmatprep.subr.msk.bf16.mxu0 %vm79_vm1, %v1068_v38 }
 0x110   :  { %3397 = vmatmul.mubr.msk.bf16.vlgmr.msra.gmra.mrb[0].mxu0 %vm75_vm2, %v3395_v40 }
 0x111   :  { %1133 = vmatpush1.bf16.msra.mxu0 %v1080_v42  ;;  %1164 = vmatprep.mubr.bf16.mxu0 %v3703_v2 }
 0x112   :  { %3400 = vmatprep.subr.msk.bf16.mxu0 %vm79_vm1, %v1063_v43  ;;  %v1583_v43 = vsub.s32 5, %v1562_v19 }
 0x118   :  { %3399 = vmatmul.mubr.msk.bf16.vlgmr.msra.gmra.mrb[4].mxu0 %vm75_vm2, %v3395_v40 }
 0x119   :  { %1174 = vmatpush1.bf16.msra.mxu0 %v1086_v48  ;;  %1205 = vmatprep.mubr.bf16.mxu0 %v3703_v2  ;;  %v4101_v48 = vrot.slane %v30_v3, %v1579_v39 }
 0x11a   :  { %3403 = vmatprep.subr.msk.bf16.mxu0 %vm79_vm1, %v1236_v47 }
 0x120   :  { %3401 = vmatmul.mubr.msk.bf16.vlgmr.msra.gmra.mrb[8].mxu0 %vm75_vm2, %v3395_v40 }
 0x121   :  { %1262 = vmatpush1.bf16.msra.mxu0 %v1244_v51  ;;  %1293 = vmatprep.mubr.bf16.mxu0 %v3703_v2  ;;  %v4103_v51 = vrot.slane %v30_v3, %v1583_v43 }
 0x122   :  { %3405 = vmatprep.subr.msk.bf16.mxu0 %vm79_vm1, %v1238_v53 }
 0x128   :  { %3404 = vmatmul.mubr.msk.bf16.vlgmr.msra.gmra.mrb[0].mxu0 %vm75_vm2, %v3402_v55 }
 0x129   :  { %1303 = vmatpush1.bf16.msra.mxu0 %v1250_v57  ;;  %1334 = vmatprep.mubr.bf16.mxu0 %v3703_v2 }
 0x12a   :  { %3407 = vmatprep.subr.msk.bf16.mxu0 %vm79_vm1, %v1233_v58 }
 0x130   :  { %3406 = vmatmul.mubr.msk.bf16.vlgmr.msra.gmra.mrb[4].mxu0 %vm75_vm2, %v3402_v55 }
 0x131   :  { %1344 = vmatpush1.bf16.msra.mxu0 %v1256_v63  ;;  %1375 = vmatprep.mubr.bf16.mxu0 %v3703_v2 }
 0x132   :  { %3410 = vmatprep.subr.msk.bf16.mxu0 %vm79_vm1, %v1406_v62 }
 0x138   :  { %3408 = vmatmul.mubr.msk.bf16.vlgmr.msra.gmra.mrb[8].mxu0 %vm75_vm2, %v3402_v55 }
 0x139   :  { %1432 = vmatpush1.bf16.msra.mxu0 %v1414_v4  ;;  %1463 = vmatprep.mubr.bf16.mxu0 %v3703_v2 }
 0x13a   :  { %3412 = vmatprep.subr.msk.bf16.mxu0 %vm79_vm1, %v1408_v10 }
 0x140   :  { %3411 = vmatmul.mubr.msk.bf16.vlgmr.msra.gmra.mrb[0].mxu0 %vm75_vm2, %v3409_v13 }
 0x141   :  { %1473 = vmatpush1.bf16.msra.mxu0 %v1420_v14  ;;  %1504 = vmatprep.mubr.bf16.mxu0 %v3703_v2  ;;  %v3712_v14 = vmov 0.0  }
 0x142   :  { %3414 = vmatprep.subr.msk.bf16.mxu0 %vm79_vm1, %v1403_v15  ;;  %1686 = vst [vmem:[#allocation2 + $0x30] sm:$0xff] %v3712_v14  ;;  %v3713_v15 = vmov 0.0|0.0  }
 0x148   :  { %3413 = vmatmul.mubr.msk.bf16.vlgmr.msra.gmra.mrb[4].mxu0 %vm75_vm2, %v3409_v13 }
 0x149   :  { %1514 = vmatpush1.bf16.msra.mxu0 %v1426_v17  ;;  %1545 = vmatprep.mubr.bf16.mxu0 %v3703_v2 }
 0x150   :  { %3415 = vmatmul.mubr.msk.bf16.vlgmr.msra.gmra.mrb[8].mxu0 %vm75_vm2, %v3409_v13  ;;  %v1644_v13 = vld [vmem:[%s4505_s2] sm:$0xff] }
 0x213   :  { %v4069_v6 = vpop.f32.mrb[0].mxu0 }
 0x214   :  { %v1591_v22 = vmul.f32 %v4065_v8, %v4069_v6  ;;  %v1605_v11 = vmul.f32 %v4069_v6, %v4069_v6  ;;  %v4075_v23 = vpop.f32.mrb[1].mxu0 }
 0x215   :  { %v1592_v9 = vmul.f32 %v4067_v21, %v4075_v23  ;;  %v1606_v25 = vmul.f32 %v4075_v23, %v4075_v23  ;;  %v1469_v26 = vpop.f32.mrb[2].mxu0 }
 0x216   :  { %v1611_v28 = vmul.f32 %v1605_v11, %v4065_v8  ;;  %v1470_v29 = vpop.f32.mrb[3].mxu0 }
 0x217   :  { %v1597_v30 = vadd.f32 %v1592_v9, %v1591_v22  ;;  %v1612_v31 = vmul.f32 %v1606_v25, %v4067_v21 }
 0x219   :  { %v1617_v33 = vadd.f32 %v1612_v31, %v1611_v28 }
 0x21b   :  { %v4087_v35 = vpop.f32.mrb[4].mxu0 }
 0x21c   :  { %v1593_v36 = vmul.f32 %v4083_v32, %v4087_v35  ;;  %v1607_v37 = vmul.f32 %v4087_v35, %v4087_v35  ;;  %v4093_v38 = vpop.f32.mrb[5].mxu0 }
 0x21d   :  { %v1594_v40 = vmul.f32 %v4085_v34, %v4093_v38  ;;  %v1608_v41 = vmul.f32 %v4093_v38, %v4093_v38  ;;  %v1510_v42 = vpop.f32.mrb[6].mxu0 }
 0x21e   :  { %v1598_v44 = vadd.f32 %v1597_v30, %v1593_v36  ;;  %v1613_v45 = vmul.f32 %v1607_v37, %v4083_v32  ;;  %v1511_v46 = vpop.f32.mrb[7].mxu0 }
 0x21f   :  { %v1614_v47 = vmul.f32 %v1608_v41, %v4085_v34 }
 0x220   :  { %v1599_v49 = vadd.f32 %v1598_v44, %v1594_v40  ;;  %v1618_v50 = vadd.f32 %v1617_v33, %v1613_v45 }
 0x222   :  { %v1619_v52 = vadd.f32 %v1618_v50, %v1614_v47 }
 0x223   :  { %v1547_v53 = vpop.f32.mrb[8].mxu0 }
 0x224   :  { %v1595_v54 = vmul.f32 %v4101_v48, %v1547_v53  ;;  %v1609_v55 = vmul.f32 %v1547_v53, %v1547_v53  ;;  %v1549_v56 = vpop.f32.mrb[9].mxu0 }
 0x225   :  { %v1596_v57 = vmul.f32 %v4103_v51, %v1549_v56  ;;  %v1610_v58 = vmul.f32 %v1549_v56, %v1549_v56  ;;  %v1551_v59 = vpop.f32.mrb[10].mxu0 }
 0x226   :  { %v1552_v60 = vpop.f32.mrb[11].mxu0  ;;  %v1600_v61 = vadd.f32 %v1599_v49, %v1595_v54  ;;  %v1615_v62 = vmul.f32 %v1609_v55, %v4101_v48 }
 0x227   :  { %v1601_v63 = vsel %vm75_vm2, %v1596_v57, 0.0  ;;  %v1616_v0 = vmul.f32 %v1610_v58, %v4103_v51 }
 0x228   :  { %v1602_v1 = vadd.f32 %v1601_v63, %v1600_v61  ;;  %v1620_v4 = vadd.f32 %v1619_v52, %v1615_v62 }
 0x229   :  { %v1621_v7 = vsel %vm75_vm2, %v1616_v0, 0.0 }
 0x22a   :  { %1603 = vadd.xlane.f32.xlu1 %v1602_v1  ;;  %v1622_v10 = vadd.f32 %v1621_v7, %v1620_v4 }
 0x22c   :  { %1623 = vadd.xlane.f32.xlu0 %v1622_v10 }
 0x23b   :  { %1659 = vperm.xlu1 %3687, %v1656_v12  }
 0x23f   :  { %1716 = vrot.lane.b32.xlu1 %v3713_v15, %s3704_s9 }
 0x242   :  { %1647 = vperm.xlu0 %3686, %v1644_v13  }
 0x2b7   :  { %v1604_v16 = vpop.xlane.xlu1 %1603 }
 0x2b8   :  { %v1625_v17 = vmul.f32 0.001953125, %v1604_v16 }
 0x2b9   :  { %v1624_v18 = vpop.xlane.xlu0 %1623 }
 0x2ba   :  { %v1626_v19 = vmul.f32 0.001953125, %v1624_v18  ;;  %v1627_v20 = vmul.f32 %v1625_v17, %v1625_v17  ;;  %v1630_v11 = vsub.f32 %v4069_v6, %v1625_v17  ;;  %v1631_v24 = vsub.f32 %v4075_v23, %v1625_v17 }
 0x2bb   :  { %v1632_v9 = vsub.f32 %v4087_v35, %v1625_v17  ;;  %v1633_v25 = vsub.f32 %v4093_v38, %v1625_v17  ;;  %v1634_v28 = vsub.f32 %v1547_v53, %v1625_v17  ;;  %v1635_v29 = vsub.f32 %v1549_v56, %v1625_v17  ;;  %v1660_v40 = vpop.permute.xlu1 %1659 }
 0x2bc   :  { %v1628_v3 = vsub.f32 %v1626_v19, %v1627_v20  ;;  %v3416_v19 = vld [vmem:[%s4506_s4 + $0x4] sm:$0xf] }
 0x2be   :  { %v1629_v5 = vmax.f32 %v1628_v3, 0.0 }
 0x2bf   :  { %v1717_v13 = vpop.permute.xlu1 %1716 }
 0x2c0   :  { %v1636_v22 = vadd.f32 1e-05, %v1629_v5 }
 0x2c1   :  { %v1648_v27 = vpop.permute.xlu0 %1647 }
 0x2c2   :  { %3695 = vrsqrt.f32 %v1636_v22 }
 0x2cc   :  { %v3696_v26 = vpop.eup %3695 }
 0x2cd   :  { %v1638_v30 = vmul.f32 %v3696_v26, %v1630_v11  ;;  %v1639_v31 = vmul.f32 %v3696_v26, %v1631_v24  ;;  %v1640_v33 = vmul.f32 %v3696_v26, %v1632_v9  ;;  %v1641_v36 = vmul.f32 %v3696_v26, %v1633_v25 }
 0x2ce   :  { %v1642_v37 = vmul.f32 %v3696_v26, %v1634_v28  ;;  %v1643_v39 = vmul.f32 %v3696_v26, %v1635_v29 }
 0x2cf   :  { %v1650_v41 = vmul.f32 %v1648_v27, %v1638_v30  ;;  %v1651_v42 = vmul.f32 %v1648_v27, %v1639_v31  ;;  %v1652_v6 = vmul.f32 %v1648_v27, %v1640_v33  ;;  %v1653_v43 = vmul.f32 %v1648_v27, %v1641_v36 }
 0x2d0   :  { %v1654_v23 = vmul.f32 %v1648_v27, %v1642_v37  ;;  %v1655_v44 = vmul.f32 %v1648_v27, %v1643_v39 }
 0x2d1   :  { %v1662_v35 = vadd.f32 %v1660_v40, %v1650_v41  ;;  %v1663_v45 = vadd.f32 %v1660_v40, %v1651_v42  ;;  %v1664_v38 = vadd.f32 %v1660_v40, %v1652_v6  ;;  %v1665_v46 = vadd.f32 %v1660_v40, %v1653_v43 }
 0x2d2   :  { %v1666_v47 = vadd.f32 %v1660_v40, %v1654_v23  ;;  %v1667_v49 = vadd.f32 %v1660_v40, %v1655_v44  ;;  %v1707_v40 = vld [vmem:[%s4506_s4] sm:$0xf] }
 0x2d3   :  { %v1668_v50 = vmax.f32 %v1662_v35, 0.0  ;;  %v1669_v52 = vmax.f32 %v1663_v45, 0.0  ;;  %v1670_v53 = vmax.f32 %v1664_v38, 0.0  ;;  %v1671_v54 = vmax.f32 %v1665_v46, 0.0 }
 0x2d4   :  { %v1672_v55 = vmax.f32 %v1666_v47, 0.0  ;;  %v1673_v56 = vmax.f32 %v1667_v49, 0.0 }
 0x2d5   :  { %v1674_v57 = vmul.f32 %v1668_v50, %v4065_v8  ;;  %v1675_v58 = vmul.f32 %v1669_v52, %v4067_v21  ;;  %v1676_v59 = vmul.f32 %v1670_v53, %v4083_v32  ;;  %v1677_v60 = vmul.f32 %v1671_v54, %v4085_v34  ;;  %v3429_v53 = vld [vmem:[%s4506_s4 + $0x8] sm:$0xf] }
 0x2d6   :  { %v1678_v61 = vmul.f32 %v1672_v55, %v4101_v48  ;;  %v1679_v62 = vmul.f32 %v1673_v56, %v4103_v51 }
 0x2d7   :  { %v4129_v63 = vpack.c.bf16 %v1674_v57, %v1674_v57  ;;  %v4136_v0 = vpack.c.bf16 %v1676_v59, %v1676_v59  ;;  %v4138_v1 = vpack.c.bf16 %v1675_v58, %v1675_v58  ;;  %v4150_v7 = vpack.c.bf16 %v1677_v60, %v1677_v60 }
 0x2d8   :  { %1693 = vst.msk [vmem:[#allocation2 + $0x30] sm:$0xff] %vm75_vm2, %v1679_v62  ;;  %v4144_v4 = vpack.c.bf16 %v1678_v61, %v1678_v61 }
 0x2d9   :  { %1879 = vrot.lane.b32.xlu0 %v4129_v63, %s3705_s12  ;;  %1718 = vrot.lane.b32.xlu1 %v4129_v63, %s3704_s9 }
 0x2dd   :  { %1883 = vrot.lane.b32.xlu0 %v4136_v0, %s3705_s12  ;;  %1720 = vrot.lane.b32.xlu1 %v4138_v1, %s3704_s9 }
 0x2df   :  { %v1700_v10 = vld [vmem:[#allocation2 + $0x30] sm:$0xff] }
 0x2e0   :  { %v4196_v12 = vpack.c.bf16 %v1700_v10, %v1700_v10 }
 0x2e1   :  { %1887 = vrot.lane.b32.xlu0 %v4144_v4, %s3705_s12  ;;  %1722 = vrot.lane.b32.xlu1 %v4136_v0, %s3704_s9 }
 0x2e5   :  { %2042 = vrot.lane.b32.xlu0 %v4129_v63, %s3706_s13  ;;  %1724 = vrot.lane.b32.xlu1 %v4150_v7, %s3704_s9 }
 0x2e9   :  { %2046 = vrot.lane.b32.xlu0 %v4136_v0, %s3706_s13  ;;  %1726 = vrot.lane.b32.xlu1 %v4144_v4, %s3704_s9 }
 0x2ed   :  { %2050 = vrot.lane.b32.xlu0 %v4144_v4, %s3706_s13  ;;  %1877 = vrot.lane.b32.xlu1 %v3713_v15, %s3705_s12 }
 0x2f1   :  { %2213 = vrot.lane.b32.xlu0 %v4129_v63, %s3707_s14  ;;  %1881 = vrot.lane.b32.xlu1 %v4138_v1, %s3705_s12 }
 0x2f5   :  { %2217 = vrot.lane.b32.xlu0 %v4136_v0, %s3707_s14  ;;  %1885 = vrot.lane.b32.xlu1 %v4150_v7, %s3705_s12 }
 0x2f9   :  { %2221 = vrot.lane.b32.xlu0 %v4144_v4, %s3707_s14  ;;  %2040 = vrot.lane.b32.xlu1 %v3713_v15, %s3706_s13 }
 0x2fd   :  { %2535 = vrot.lane.b32.xlu0 %v4129_v63, %s3708_s17  ;;  %2044 = vrot.lane.b32.xlu1 %v4138_v1, %s3706_s13 }
 0x301   :  { %2539 = vrot.lane.b32.xlu0 %v4136_v0, %s3708_s17  ;;  %2048 = vrot.lane.b32.xlu1 %v4150_v7, %s3706_s13 }
 0x305   :  { %2543 = vrot.lane.b32.xlu0 %v4144_v4, %s3708_s17  ;;  %2211 = vrot.lane.b32.xlu1 %v3713_v15, %s3707_s14 }
 0x309   :  { %2704 = vrot.lane.b32.xlu0 %v4129_v63, %s3709_s18  ;;  %2215 = vrot.lane.b32.xlu1 %v4138_v1, %s3707_s14 }
 0x30d   :  { %2708 = vrot.lane.b32.xlu0 %v4136_v0, %s3709_s18  ;;  %2219 = vrot.lane.b32.xlu1 %v4150_v7, %s3707_s14 }
 0x311   :  { %2712 = vrot.lane.b32.xlu0 %v4144_v4, %s3709_s18  ;;  %2223 = vrot.lane.b32.xlu1 %v4196_v12, %s3707_s14 }
 0x315   :  { %2873 = vrot.lane.b32.xlu0 %v4129_v63, %s3710_s19  ;;  %2537 = vrot.lane.b32.xlu1 %v4138_v1, %s3708_s17 }
 0x319   :  { %2877 = vrot.lane.b32.xlu0 %v4136_v0, %s3710_s19  ;;  %2541 = vrot.lane.b32.xlu1 %v4150_v7, %s3708_s17 }
 0x31d   :  { %2881 = vrot.lane.b32.xlu0 %v4144_v4, %s3710_s19  ;;  %2545 = vrot.lane.b32.xlu1 %v4196_v12, %s3708_s17 }
 0x321   :  { %3042 = vrot.lane.b32.xlu0 %v4129_v63, %s3711_s20  ;;  %2706 = vrot.lane.b32.xlu1 %v4138_v1, %s3709_s18 }
 0x325   :  { %3046 = vrot.lane.b32.xlu0 %v4136_v0, %s3711_s20  ;;  %2710 = vrot.lane.b32.xlu1 %v4150_v7, %s3709_s18 }
 0x329   :  { %3050 = vrot.lane.b32.xlu0 %v4144_v4, %s3711_s20  ;;  %2714 = vrot.lane.b32.xlu1 %v4196_v12, %s3709_s18 }
 0x32d   :  { %2875 = vrot.lane.b32.xlu1 %v4138_v1, %s3710_s19 }
 0x331   :  { %2879 = vrot.lane.b32.xlu1 %v4150_v7, %s3710_s19 }
 0x335   :  { %2883 = vrot.lane.b32.xlu1 %v4196_v12, %s3710_s19 }
 0x339   :  { %3044 = vrot.lane.b32.xlu1 %v4138_v1, %s3711_s20 }
 0x33d   :  { %3048 = vrot.lane.b32.xlu1 %v4150_v7, %s3711_s20 }
 0x341   :  { %3052 = vrot.lane.b32.xlu1 %v4196_v12, %s3711_s20 }
 0x34b   :  { %v1719_v14 = vpop.permute.xlu1 %1718  ;;  %v1880_v27 = vpop.permute.xlu0 %1879 }
 0x34c   :  { %v1728_v15 = vsel %vm69_vm0, %v1717_v13, %v1719_v14 }
 0x34d   :  { %v1737_v18 = vsel %vm79_vm1, %v1728_v15, 0 }
 0x34f   :  { %v1721_v16 = vpop.permute.xlu1 %1720  ;;  %v1884_v33 = vpop.permute.xlu0 %1883 }
 0x350   :  { %v1729_v17 = vsel %vm69_vm0, %v1719_v14, %v1721_v16 }
 0x351   :  { %3417 = vmatprep.subr.msk.bf16.mxu1 %vm79_vm1, %v1729_v17  ;;  %v3436_v17 = vld [vmem:[%s4506_s4 + $0xc] sm:$0xf] }
 0x352   :  { %1755 = vmatpush1.bf16.msra.mxu1 %v1737_v18 }
 0x353   :  { %v1723_v20 = vpop.permute.xlu1 %1722  ;;  %v1888_v6 = vpop.permute.xlu0 %1887 }
 0x354   :  { %v1730_v3 = vsel %vm69_vm0, %v1721_v16, %v1723_v20 }
 0x355   :  { %3418 = vmatmul.mubr.msk.bf16.vlgmr.msra.gmra.mrb[0].mxu1 %vm75_vm2, %v3416_v19  ;;  %v1743_v11 = vsel %vm79_vm1, %v1730_v3, 0 }
 0x356   :  { %1827 = vmatprep.mubr.bf16.mxu1 %v3703_v2 }
 0x357   :  { %v1725_v5 = vpop.permute.xlu1 %1724  ;;  %v2043_v44 = vpop.permute.xlu0 %2042 }
 0x358   :  { %v1731_v22 = vsel %vm69_vm0, %v1723_v20, %v1725_v5 }
 0x359   :  { %3419 = vmatprep.subr.msk.bf16.mxu1 %vm79_vm1, %v1731_v22 }
 0x35a   :  { %1796 = vmatpush1.bf16.msra.mxu1 %v1743_v11  ;;  %v2387_v11 = vsel %vm79_vm1, %v4129_v63, 0 }
 0x35b   :  { %v1727_v24 = vpop.permute.xlu1 %1726  ;;  %v2047_v47 = vpop.permute.xlu0 %2046 }
 0x35c   :  { %v1732_v9 = vsel %vm69_vm0, %v1725_v5, %v1727_v24  ;;  %3421 = vmatprep.subr.msk.bf16.mxu1 %vm79_vm1, %v1727_v24  ;;  %v3443_v24 = vld [vmem:[%s4506_s4 + $0x10] sm:$0xf] }
 0x35d   :  { %v1749_v25 = vsel %vm79_vm1, %v1732_v9, 0  ;;  %3420 = vmatmul.mubr.msk.bf16.vlgmr.msra.gmra.mrb[4].mxu1 %vm75_vm2, %v3416_v19 }
 0x35e   :  { %1837 = vmatpush1.bf16.msra.mxu1 %v1749_v25  ;;  %1868 = vmatprep.mubr.bf16.mxu1 %v3703_v2 }
 0x35f   :  { %v1878_v26 = vpop.permute.xlu1 %1877  ;;  %v2051_v56 = vpop.permute.xlu0 %2050 }
 0x360   :  { %v1889_v28 = vsel %vm233_vm3, %v1878_v26, %v1880_v27 }
 0x361   :  { %v1898_v31 = vsel %vm79_vm1, %v1889_v28, 0 }
 0x363   :  { %v1882_v29 = vpop.permute.xlu1 %1881  ;;  %v2214_v59 = vpop.permute.xlu0 %2213 }
 0x364   :  { %v1890_v30 = vsel %vm233_vm3, %v1880_v27, %v1882_v29  ;;  %v1891_v39 = vsel %vm233_vm3, %v1882_v29, %v1884_v33 }
 0x365   :  { %3422 = vmatmul.mubr.msk.bf16.vlgmr.msra.gmra.mrb[8].mxu1 %vm75_vm2, %v3416_v19  ;;  %3423 = vmatprep.subr.msk.bf16.mxu1 %vm79_vm1, %v1890_v30  ;;  %v1904_v41 = vsel %vm79_vm1, %v1891_v39, 0  ;;  %v3450_v30 = vld [vmem:[%s4506_s4 + $0x14] sm:$0xf] }
 0x366   :  { %1916 = vmatpush1.bf16.msra.mxu1 %v1898_v31  ;;  %1947 = vmatprep.mubr.bf16.mxu1 %v3703_v2 }
 0x367   :  { %v1886_v36 = vpop.permute.xlu1 %1885  ;;  %v2218_v13 = vpop.permute.xlu0 %2217 }
 0x368   :  { %v1892_v37 = vsel %vm233_vm3, %v1884_v33, %v1886_v36  ;;  %v1893_v43 = vsel %vm233_vm3, %v1886_v36, %v1888_v6 }
 0x369   :  { %3425 = vmatprep.subr.msk.bf16.mxu1 %vm79_vm1, %v1892_v37  ;;  %v1910_v35 = vsel %vm79_vm1, %v1893_v43, 0 }
 0x36b   :  { %v2041_v42 = vpop.permute.xlu1 %2040  ;;  %v2222_v19 = vpop.permute.xlu0 %2221 }
 0x36c   :  { %v2052_v38 = vsel %vm397_vm4, %v2041_v42, %v2043_v44 }
 0x36d   :  { %3424 = vmatmul.mubr.msk.bf16.vlgmr.msra.gmra.mrb[0].mxu1 %vm75_vm2, %v1707_v40  ;;  %v2061_v49 = vsel %vm79_vm1, %v2052_v38, 0  ;;  %v3457_v38 = vld [vmem:[%s4506_s4 + $0x18] sm:$0xf] }
 0x36e   :  { %1957 = vmatpush1.bf16.msra.mxu1 %v1904_v41  ;;  %1988 = vmatprep.mubr.bf16.mxu1 %v3703_v2 }
 0x36f   :  { %3427 = vmatprep.subr.msk.bf16.mxu1 %vm79_vm1, %v1888_v6  ;;  %v2045_v23 = vpop.permute.xlu1 %2044  ;;  %v2536_v9 = vpop.permute.xlu0 %2535 }
 0x370   :  { %v2053_v45 = vsel %vm397_vm4, %v2043_v44, %v2045_v23  ;;  %v2054_v52 = vsel %vm397_vm4, %v2045_v23, %v2047_v47 }
 0x371   :  { %v2067_v54 = vsel %vm79_vm1, %v2054_v52, 0 }
 0x373   :  { %v2049_v46 = vpop.permute.xlu1 %2048  ;;  %v2540_v25 = vpop.permute.xlu0 %2539 }
 0x374   :  { %v2055_v50 = vsel %vm397_vm4, %v2047_v47, %v2049_v46  ;;  %v2056_v57 = vsel %vm397_vm4, %v2049_v46, %v2051_v56 }
 0x375   :  { %3426 = vmatmul.mubr.msk.bf16.vlgmr.msra.gmra.mrb[4].mxu1 %vm75_vm2, %v1707_v40  ;;  %v2073_v60 = vsel %vm79_vm1, %v2056_v57, 0 }
 0x376   :  { %1998 = vmatpush1.bf16.msra.mxu1 %v1910_v35  ;;  %2029 = vmatprep.mubr.bf16.mxu1 %v3703_v2 }
 0x377   :  { %3430 = vmatprep.subr.msk.bf16.mxu1 %vm79_vm1, %v2053_v45  ;;  %v2212_v55 = vpop.permute.xlu1 %2211  ;;  %v2544_v28 = vpop.permute.xlu0 %2543 }
 0x378   :  { %v2225_v62 = vsel %vm571_vm5, %v2212_v55, %v2214_v59 }
 0x379   :  { %v2235_v14 = vsel %vm79_vm1, %v2225_v62, 0  ;;  %v3464_v62 = vld [vmem:[%s4506_s4 + $0x1c] sm:$0xf] }
 0x37b   :  { %v2216_v58 = vpop.permute.xlu1 %2215  ;;  %v2705_v36 = vpop.permute.xlu0 %2704 }
 0x37c   :  { %v2226_v61 = vsel %vm571_vm5, %v2214_v59, %v2216_v58  ;;  %v2227_v16 = vsel %vm571_vm5, %v2216_v58, %v2218_v13 }
 0x37d   :  { %3428 = vmatmul.mubr.msk.bf16.vlgmr.msra.gmra.mrb[8].mxu1 %vm75_vm2, %v1707_v40  ;;  %v2241_v20 = vsel %vm79_vm1, %v2227_v16, 0 }
 0x37e   :  { %2079 = vmatpush1.bf16.msra.mxu1 %v2061_v49  ;;  %2110 = vmatprep.mubr.bf16.mxu1 %v3703_v2 }
 0x37f   :  { %3432 = vmatprep.subr.msk.bf16.mxu1 %vm79_vm1, %v2055_v50  ;;  %v2220_v10 = vpop.permute.xlu1 %2219  ;;  %v2709_v40 = vpop.permute.xlu0 %2708 }
 0x380   :  { %v2228_v15 = vsel %vm571_vm5, %v2218_v13, %v2220_v10  ;;  %v2229_v5 = vsel %vm571_vm5, %v2220_v10, %v2222_v19 }
 0x381   :  { %v2247_v22 = vsel %vm79_vm1, %v2229_v5, 0 }
 0x383   :  { %v2224_v18 = vpop.permute.xlu1 %2223  ;;  %v2713_v23 = vpop.permute.xlu0 %2712 }
 0x384   :  { %v2230_v3 = vsel %vm571_vm5, %v2222_v19, %v2224_v18 }
 0x385   :  { %3431 = vmatmul.mubr.msk.bf16.vlgmr.msra.gmra.mrb[0].mxu1 %vm75_vm2, %v3429_v53 }
 0x386   :  { %2120 = vmatpush1.bf16.msra.mxu1 %v2067_v54  ;;  %2151 = vmatprep.mubr.bf16.mxu1 %v3703_v2 }
 0x387   :  { %3434 = vmatprep.subr.msk.bf16.mxu1 %vm79_vm1, %v2051_v56  ;;  %v2538_v63 = vpop.permute.xlu1 %2537  ;;  %v2874_v49 = vpop.permute.xlu0 %2873 }
 0x388   :  { %v2548_v26 = vsel %vm894_vm6, %v2538_v63, %v2540_v25 }
 0x38b   :  { %v2542_v27 = vpop.permute.xlu1 %2541 }
 0x38c   :  { %v2550_v29 = vsel %vm894_vm6, %v2542_v27, %v2544_v28 }
 0x38d   :  { %3433 = vmatmul.mubr.msk.bf16.vlgmr.msra.gmra.mrb[4].mxu1 %vm75_vm2, %v3429_v53 }
 0x38e   :  { %2161 = vmatpush1.bf16.msra.mxu1 %v2073_v60  ;;  %2192 = vmatprep.mubr.bf16.mxu1 %v3703_v2 }
 0x38f   :  { %3437 = vmatprep.subr.msk.bf16.mxu1 %vm79_vm1, %v2226_v61  ;;  %v2546_v33 = vpop.permute.xlu1 %2545 }
 0x390   :  { %v2551_v37 = vsel %vm894_vm6, %v2544_v28, %v2546_v33 }
 0x391   :  { %v2568_v41 = vsel %vm79_vm1, %v2551_v37, 0 }
 0x393   :  { %v2707_v39 = vpop.permute.xlu1 %2706 }
 0x394   :  { %v2717_v42 = vsel %vm1064_vm7, %v2707_v39, %v2709_v40  ;;  %v2716_v6 = vsel %vm1064_vm7, %v2705_v36, %v2707_v39 }
 0x395   :  { %3435 = vmatmul.mubr.msk.bf16.vlgmr.msra.gmra.mrb[8].mxu1 %vm75_vm2, %v3429_v53  ;;  %v2725_v44 = vsel %vm79_vm1, %v2716_v6, 0  ;;  %v2878_v53 = vpop.permute.xlu0 %2877 }
 0x396   :  { %2253 = vmatpush1.bf16.msra.mxu1 %v2235_v14  ;;  %2284 = vmatprep.mubr.bf16.mxu1 %v3703_v2 }
 0x397   :  { %3439 = vmatprep.subr.msk.bf16.mxu1 %vm79_vm1, %v2228_v15  ;;  %v2711_v43 = vpop.permute.xlu1 %2710 }
 0x398   :  { %v2719_v35 = vsel %vm1064_vm7, %v2711_v43, %v2713_v23  ;;  %v2718_v45 = vsel %vm1064_vm7, %v2709_v40, %v2711_v43 }
 0x399   :  { %v2731_v46 = vsel %vm79_vm1, %v2718_v45, 0  ;;  %v2882_v58 = vpop.permute.xlu0 %2881 }
 0x39b   :  { %v2715_v47 = vpop.permute.xlu1 %2714 }
 0x39c   :  { %v2720_v50 = vsel %vm1064_vm7, %v2713_v23, %v2715_v47 }
 0x39d   :  { %3438 = vmatmul.mubr.msk.bf16.vlgmr.msra.gmra.mrb[0].mxu1 %vm75_vm2, %v3436_v17  ;;  %v2737_v54 = vsel %vm79_vm1, %v2720_v50, 0  ;;  %v3043_v14 = vpop.permute.xlu0 %3042 }
 0x39e   :  { %2294 = vmatpush1.bf16.msra.mxu1 %v2241_v20  ;;  %2325 = vmatprep.mubr.bf16.mxu1 %v3703_v2 }
 0x39f   :  { %3441 = vmatprep.subr.msk.bf16.mxu1 %vm79_vm1, %v2230_v3  ;;  %v2876_v52 = vpop.permute.xlu1 %2875 }
 0x3a0   :  { %v2886_v55 = vsel %vm1234_vm8, %v2876_v52, %v2878_v53  ;;  %v2885_v56 = vsel %vm1234_vm8, %v2874_v49, %v2876_v52 }
 0x3a1   :  { %v2894_v59 = vsel %vm79_vm1, %v2885_v56, 0 }
 0x3a3   :  { %v2880_v57 = vpop.permute.xlu1 %2879 }
 0x3a4   :  { %v2888_v60 = vsel %vm1234_vm8, %v2880_v57, %v2882_v58  ;;  %v2887_v61 = vsel %vm1234_vm8, %v2878_v53, %v2880_v57 }
 0x3a5   :  { %3440 = vmatmul.mubr.msk.bf16.vlgmr.msra.gmra.mrb[4].mxu1 %vm75_vm2, %v3436_v17  ;;  %v2900_v10 = vsel %vm79_vm1, %v2887_v61, 0 }
 0x3a6   :  { %2335 = vmatpush1.bf16.msra.mxu1 %v2247_v22  ;;  %2366 = vmatprep.mubr.bf16.mxu1 %v3703_v2 }
 0x3a7   :  { %3444 = vmatprep.subr.msk.bf16.mxu1 %vm79_vm1, %v4138_v1  ;;  %v2393_v1 = vsel %vm79_vm1, %v4136_v0, 0  ;;  %v2547_v0 = vsel %vm894_vm6, %v2536_v9, %v2538_v63  ;;  %v2884_v13 = vpop.permute.xlu1 %2883 }
 0x3a8   :  { %v2889_v15 = vsel %vm1234_vm8, %v2882_v58, %v2884_v13 }
 0x3a9   :  { %v2906_v18 = vsel %vm79_vm1, %v2889_v15, 0 }
 0x3ab   :  { %v3045_v16 = vpop.permute.xlu1 %3044 }
 0x3ac   :  { %v3054_v20 = vsel %vm1404_vm9, %v3043_v14, %v3045_v16 }
 0x3ad   :  { %3442 = vmatmul.mubr.msk.bf16.vlgmr.msra.gmra.mrb[8].mxu1 %vm75_vm2, %v3436_v17  ;;  %v3047_v17 = vpop.permute.xlu0 %3046  ;;  %v3063_v22 = vsel %vm79_vm1, %v3054_v20, 0 }
 0x3ae   :  { %2405 = vmatpush1.bf16.msra.mxu1 %v2387_v11  ;;  %2436 = vmatprep.mubr.bf16.mxu1 %v3703_v2  ;;  %v3055_v19 = vsel %vm1404_vm9, %v3045_v16, %v3047_v17  ;;  %v3274_v16 = vld [vmem:[%s4507_s6] sm:$0xff] }
 0x3af   :  { %3446 = vmatprep.subr.msk.bf16.mxu1 %vm79_vm1, %v4150_v7  ;;  %v2399_v7 = vsel %vm79_vm1, %v4144_v4, 0  ;;  %v2549_v4 = vsel %vm894_vm6, %v2540_v25, %v2542_v27  ;;  %v3049_v3 = vpop.permute.xlu1 %3048 }
 0x3b0   :  { %v2562_v31 = vsel %vm79_vm1, %v2549_v4, 0 }
 0x3b1   :  { %v3051_v5 = vpop.permute.xlu0 %3050 }
 0x3b2   :  { %v3057_v11 = vsel %vm1404_vm9, %v3049_v3, %v3051_v5 }
 0x3b3   :  { %v3053_v63 = vpop.permute.xlu1 %3052 }
 0x3b4   :  { %v3058_v25 = vsel %vm1404_vm9, %v3051_v5, %v3053_v63 }
 0x3b5   :  { %3445 = vmatmul.mubr.msk.bf16.vlgmr.msra.gmra.mrb[0].mxu1 %vm75_vm2, %v3443_v24 }
 0x3b6   :  { %2446 = vmatpush1.bf16.msra.mxu1 %v2393_v1  ;;  %2477 = vmatprep.mubr.bf16.mxu1 %v3703_v2  ;;  %v3471_v1 = vld [vmem:[%s4506_s4 + $0x20] sm:$0xf] }
 0x3b7   :  { %3448 = vmatprep.subr.msk.bf16.mxu1 %vm79_vm1, %v4196_v12  ;;  %v2556_v12 = vsel %vm79_vm1, %v2547_v0, 0 }
 0x3bd   :  { %3447 = vmatmul.mubr.msk.bf16.vlgmr.msra.gmra.mrb[4].mxu1 %vm75_vm2, %v3443_v24 }
 0x3be   :  { %2487 = vmatpush1.bf16.msra.mxu1 %v2399_v7  ;;  %2518 = vmatprep.mubr.bf16.mxu1 %v3703_v2  ;;  %v3075_v7 = vsel %vm79_vm1, %v3058_v25, 0 }
 0x3bf   :  { %3451 = vmatprep.subr.msk.bf16.mxu1 %vm79_vm1, %v2548_v26 }
 0x3c5   :  { %3449 = vmatmul.mubr.msk.bf16.vlgmr.msra.gmra.mrb[8].mxu1 %vm75_vm2, %v3443_v24  ;;  %v3056_v24 = vsel %vm1404_vm9, %v3047_v17, %v3049_v3  ;;  %v3262_v17 = vld [vmem:[%s4508_s5] sm:$0xff] }
 0x3c6   :  { %2574 = vmatpush1.bf16.msra.mxu1 %v2556_v12  ;;  %2605 = vmatprep.mubr.bf16.mxu1 %v3703_v2  ;;  %v3069_v9 = vsel %vm79_vm1, %v3056_v24, 0 }
 0x3c7   :  { %3453 = vmatprep.subr.msk.bf16.mxu1 %vm79_vm1, %v2550_v29 }
 0x3cd   :  { %3452 = vmatmul.mubr.msk.bf16.vlgmr.msra.gmra.mrb[0].mxu1 %vm75_vm2, %v3450_v30 }
 0x3ce   :  { %2615 = vmatpush1.bf16.msra.mxu1 %v2562_v31  ;;  %2646 = vmatprep.mubr.bf16.mxu1 %v3703_v2 }
 0x3cf   :  { %3455 = vmatprep.subr.msk.bf16.mxu1 %vm79_vm1, %v2546_v33 }
 0x3d5   :  { %3454 = vmatmul.mubr.msk.bf16.vlgmr.msra.gmra.mrb[4].mxu1 %vm75_vm2, %v3450_v30 }
 0x3d6   :  { %2656 = vmatpush1.bf16.msra.mxu1 %v2568_v41  ;;  %2687 = vmatprep.mubr.bf16.mxu1 %v3703_v2 }
 0x3d7   :  { %3458 = vmatprep.subr.msk.bf16.mxu1 %vm79_vm1, %v2717_v42 }
 0x3dd   :  { %3456 = vmatmul.mubr.msk.bf16.vlgmr.msra.gmra.mrb[8].mxu1 %vm75_vm2, %v3450_v30 }
 0x3de   :  { %2743 = vmatpush1.bf16.msra.mxu1 %v2725_v44  ;;  %2774 = vmatprep.mubr.bf16.mxu1 %v3703_v2 }
 0x3df   :  { %3460 = vmatprep.subr.msk.bf16.mxu1 %vm79_vm1, %v2719_v35 }
 0x3e5   :  { %3459 = vmatmul.mubr.msk.bf16.vlgmr.msra.gmra.mrb[0].mxu1 %vm75_vm2, %v3457_v38 }
 0x3e6   :  { %2784 = vmatpush1.bf16.msra.mxu1 %v2731_v46  ;;  %2815 = vmatprep.mubr.bf16.mxu1 %v3703_v2 }
 0x3e7   :  { %3462 = vmatprep.subr.msk.bf16.mxu1 %vm79_vm1, %v2715_v47 }
 0x3ed   :  { %3461 = vmatmul.mubr.msk.bf16.vlgmr.msra.gmra.mrb[4].mxu1 %vm75_vm2, %v3457_v38 }
 0x3ee   :  { %2825 = vmatpush1.bf16.msra.mxu1 %v2737_v54  ;;  %2856 = vmatprep.mubr.bf16.mxu1 %v3703_v2 }
 0x3ef   :  { %3465 = vmatprep.subr.msk.bf16.mxu1 %vm79_vm1, %v2886_v55 }
 0x3f5   :  { %3463 = vmatmul.mubr.msk.bf16.vlgmr.msra.gmra.mrb[8].mxu1 %vm75_vm2, %v3457_v38 }
 0x3f6   :  { %2912 = vmatpush1.bf16.msra.mxu1 %v2894_v59  ;;  %2943 = vmatprep.mubr.bf16.mxu1 %v3703_v2 }
 0x3f7   :  { %3467 = vmatprep.subr.msk.bf16.mxu1 %vm79_vm1, %v2888_v60 }
 0x3fd   :  { %3466 = vmatmul.mubr.msk.bf16.vlgmr.msra.gmra.mrb[0].mxu1 %vm75_vm2, %v3464_v62 }
 0x3fe   :  { %2953 = vmatpush1.bf16.msra.mxu1 %v2900_v10  ;;  %2984 = vmatprep.mubr.bf16.mxu1 %v3703_v2 }
 0x3ff   :  { %3469 = vmatprep.subr.msk.bf16.mxu1 %vm79_vm1, %v2884_v13 }
 0x405   :  { %3468 = vmatmul.mubr.msk.bf16.vlgmr.msra.gmra.mrb[4].mxu1 %vm75_vm2, %v3464_v62 }
 0x406   :  { %2994 = vmatpush1.bf16.msra.mxu1 %v2906_v18  ;;  %3025 = vmatprep.mubr.bf16.mxu1 %v3703_v2 }
 0x407   :  { %3472 = vmatprep.subr.msk.bf16.mxu1 %vm79_vm1, %v3055_v19 }
 0x40d   :  { %3470 = vmatmul.mubr.msk.bf16.vlgmr.msra.gmra.mrb[8].mxu1 %vm75_vm2, %v3464_v62 }
 0x40e   :  { %3081 = vmatpush1.bf16.msra.mxu1 %v3063_v22  ;;  %3112 = vmatprep.mubr.bf16.mxu1 %v3703_v2 }
 0x40f   :  { %3474 = vmatprep.subr.msk.bf16.mxu1 %vm79_vm1, %v3057_v11 }
 0x415   :  { %3473 = vmatmul.mubr.msk.bf16.vlgmr.msra.gmra.mrb[0].mxu1 %vm75_vm2, %v3471_v1 }
 0x416   :  { %3122 = vmatpush1.bf16.msra.mxu1 %v3069_v9  ;;  %3153 = vmatprep.mubr.bf16.mxu1 %v3703_v2 }
 0x417   :  { %3476 = vmatprep.subr.msk.bf16.mxu1 %vm79_vm1, %v3053_v63 }
 0x41d   :  { %3475 = vmatmul.mubr.msk.bf16.vlgmr.msra.gmra.mrb[4].mxu1 %vm75_vm2, %v3471_v1 }
 0x41e   :  { %3163 = vmatpush1.bf16.msra.mxu1 %v3075_v7  ;;  %3194 = vmatprep.mubr.bf16.mxu1 %v3703_v2 }
 0x425   :  { %3477 = vmatmul.mubr.msk.bf16.vlgmr.msra.gmra.mrb[8].mxu1 %vm75_vm2, %v3471_v1 }
 0x4e8   :  { %v4419_v26 = vpop.f32.mrb[0].mxu1 }
 0x4e9   :  { %v3209_v0 = vmul.f32 %v4419_v26, %v4065_v8  ;;  %v3223_v27 = vmul.f32 %v4419_v26, %v4419_v26  ;;  %v4425_v28 = vpop.f32.mrb[1].mxu1 }
 0x4ea   :  { %v3210_v12 = vmul.f32 %v4425_v28, %v4067_v21  ;;  %v3224_v29 = vmul.f32 %v4425_v28, %v4425_v28  ;;  %v3118_v4 = vpop.f32.mrb[2].mxu1 }
 0x4eb   :  { %v3229_v30 = vmul.f32 %v3223_v27, %v4065_v8  ;;  %v3119_v31 = vpop.f32.mrb[3].mxu1 }
 0x4ec   :  { %v3215_v33 = vadd.f32 %v3210_v12, %v3209_v0  ;;  %v3230_v36 = vmul.f32 %v3224_v29, %v4067_v21 }
 0x4ee   :  { %v3235_v37 = vadd.f32 %v3230_v36, %v3229_v30  ;;  %v3699_v30 = vld [vmem:[%s4501_s0] sm:$0xff] }
 0x4ef   :  { %v36_v31 = vunpack.c.h.bf16 %v3699_v30 }
 0x4f0   :  { %v3155_v39 = vpop.f32.mrb[4].mxu1 }
 0x4f1   :  { %v3211_v40 = vmul.f32 %v3155_v39, %v4083_v32  ;;  %v3225_v41 = vmul.f32 %v3155_v39, %v3155_v39  ;;  %v3157_v42 = vpop.f32.mrb[5].mxu1 }
 0x4f2   :  { %v3212_v6 = vmul.f32 %v3157_v42, %v4085_v34  ;;  %v3226_v43 = vmul.f32 %v3157_v42, %v3157_v42  ;;  %v3159_v23 = vpop.f32.mrb[6].mxu1 }
 0x4f3   :  { %v3216_v44 = vadd.f32 %v3215_v33, %v3211_v40  ;;  %v3231_v35 = vmul.f32 %v3225_v41, %v4083_v32  ;;  %v3160_v45 = vpop.f32.mrb[7].mxu1  ;;  %v3701_v23 = vld [vmem:[%s4501_s0 + $0x10] sm:$0xff] }
 0x4f4   :  { %v3232_v38 = vmul.f32 %v3226_v43, %v4085_v34 }
 0x4f5   :  { %v3236_v46 = vadd.f32 %v3235_v37, %v3231_v35  ;;  %v3217_v47 = vadd.f32 %v3216_v44, %v3212_v6  ;;  %v39_v44 = vunpack.c.l.bf16 %v3701_v23 }
 0x4f7   :  { %v3237_v49 = vadd.f32 %v3236_v46, %v3232_v38 }
 0x4f8   :  { %v3196_v50 = vpop.f32.mrb[8].mxu1 }
 0x4f9   :  { %v3213_v52 = vmul.f32 %v3196_v50, %v4101_v48  ;;  %v3227_v53 = vmul.f32 %v3196_v50, %v3196_v50  ;;  %v3198_v54 = vpop.f32.mrb[9].mxu1 }
 0x4fa   :  { %v3214_v55 = vmul.f32 %v3198_v54, %v4103_v51  ;;  %v3228_v56 = vmul.f32 %v3198_v54, %v3198_v54  ;;  %v3200_v57 = vpop.f32.mrb[10].mxu1 }
 0x4fb   :  { %v3233_v58 = vmul.f32 %v3227_v53, %v4101_v48  ;;  %v3201_v59 = vpop.f32.mrb[11].mxu1  ;;  %v3218_v60 = vadd.f32 %v3217_v47, %v3213_v52  ;;  %v3702_v52 = vld [vmem:[%s4501_s0 + $0x18] sm:$0xf] }
 0x4fc   :  { %v3234_v61 = vmul.f32 %v3228_v56, %v4103_v51  ;;  %v3219_v62 = vsel %vm75_vm2, %v3214_v55, 0.0  ;;  %v41_v53 = vunpack.c.l.bf16 %v3702_v52 }
 0x4fd   :  { %v3220_v10 = vadd.f32 %v3219_v62, %v3218_v60  ;;  %v3238_v13 = vadd.f32 %v3237_v49, %v3233_v58 }
 0x4fe   :  { %v3239_v14 = vsel %vm75_vm2, %v3234_v61, 0.0 }
 0x4ff   :  { %3221 = vadd.xlane.f32.xlu0 %v3220_v10  ;;  %v3240_v15 = vadd.f32 %v3239_v14, %v3238_v13 }
 0x501   :  { %3241 = vadd.xlane.f32.xlu1 %v3240_v15 }
 0x512   :  { %3277 = vperm.xlu1 %3687, %v3274_v16  }
 0x515   :  { %3265 = vperm.xlu0 %3686, %v3262_v17  }
 0x58c   :  { %v3222_v18 = vpop.xlane.xlu0 %3221 }
 0x58d   :  { %v3243_v19 = vmul.f32 0.001953125, %v3222_v18 }
 0x58e   :  { %v3242_v20 = vpop.xlane.xlu1 %3241 }
 0x58f   :  { %v3244_v3 = vmul.f32 0.001953125, %v3242_v20  ;;  %v3245_v5 = vmul.f32 %v3243_v19, %v3243_v19  ;;  %v3248_v1 = vsub.f32 %v4419_v26, %v3243_v19  ;;  %v3249_v9 = vsub.f32 %v4425_v28, %v3243_v19  ;;  %v3700_v26 = vld [vmem:[%s4501_s0 + $0x8] sm:$0xff] }
 0x590   :  { %v3250_v63 = vsub.f32 %v3155_v39, %v3243_v19  ;;  %v3251_v25 = vsub.f32 %v3157_v42, %v3243_v19  ;;  %v3252_v0 = vsub.f32 %v3196_v50, %v3243_v19  ;;  %v3253_v27 = vsub.f32 %v3198_v54, %v3243_v19 }
 0x591   :  { %v3246_v22 = vsub.f32 %v3244_v3, %v3245_v5  ;;  %v37_v33 = vunpack.c.l.bf16 %v3700_v26  ;;  %v38_v43 = vunpack.c.h.bf16 %v3700_v26  ;;  %v40_v50 = vunpack.c.h.bf16 %v3701_v23 }
 0x592   :  { %v3278_v6 = vpop.permute.xlu1 %3277 }
 0x593   :  { %v3247_v11 = vmax.f32 %v3246_v22, 0.0 }
 0x594   :  { %v3266_v37 = vpop.permute.xlu0 %3265 }
 0x595   :  { %v3254_v24 = vadd.f32 1e-05, %v3247_v11 }
 0x597   :  { %3697 = vrsqrt.f32 %v3254_v24 }
 0x5a1   :  { %v3698_v7 = vpop.eup %3697 }
 0x5a2   :  { %v3256_v12 = vmul.f32 %v3698_v7, %v3248_v1  ;;  %v3257_v2 = vmul.f32 %v3698_v7, %v3249_v9  ;;  %v3258_v29 = vmul.f32 %v3698_v7, %v3250_v63  ;;  %v3259_v4 = vmul.f32 %v3698_v7, %v3251_v25 }
 0x5a3   :  { %v3260_v28 = vmul.f32 %v3698_v7, %v3252_v0  ;;  %v3261_v36 = vmul.f32 %v3698_v7, %v3253_v27 }
 0x5a4   :  { %v3268_v39 = vmul.f32 %v3266_v37, %v3256_v12  ;;  %v3269_v40 = vmul.f32 %v3266_v37, %v3257_v2  ;;  %v3270_v41 = vmul.f32 %v3266_v37, %v3258_v29  ;;  %v3271_v42 = vmul.f32 %v3266_v37, %v3259_v4 }
 0x5a5   :  { %v3272_v35 = vmul.f32 %v3266_v37, %v3260_v28  ;;  %v3273_v45 = vmul.f32 %v3266_v37, %v3261_v36 }
 0x5a6   :  { %v3280_v38 = vadd.f32 %v3278_v6, %v3268_v39  ;;  %v3281_v46 = vadd.f32 %v3278_v6, %v3269_v40  ;;  %v3282_v47 = vadd.f32 %v3278_v6, %v3270_v41  ;;  %v3283_v49 = vadd.f32 %v3278_v6, %v3271_v42 }
 0x5a7   :  { %v3284_v54 = vadd.f32 %v3278_v6, %v3272_v35  ;;  %v3285_v55 = vadd.f32 %v3278_v6, %v3273_v45 }
 0x5a8   :  { %v3286_v56 = vmul.f32 %v3280_v38, %v4065_v8  ;;  %v3287_v57 = vmul.f32 %v3281_v46, %v4067_v21  ;;  %v3288_v58 = vmul.f32 %v3282_v47, %v4083_v32  ;;  %v3289_v59 = vmul.f32 %v3283_v49, %v4085_v34 }
 0x5a9   :  { %v3290_v60 = vmul.f32 %v3284_v54, %v4101_v48  ;;  %v3291_v61 = vmul.f32 %v3285_v55, %v4103_v51 }
 0x5aa   :  { %v3292_v62 = vadd.f32 %v3286_v56, %v36_v31  ;;  %v3293_v10 = vadd.f32 %v3287_v57, %v37_v33  ;;  %v3294_v13 = vadd.f32 %v3288_v58, %v38_v43  ;;  %v3295_v14 = vadd.f32 %v3289_v59, %v39_v44 }
 0x5ab   :  { %v3296_v15 = vadd.f32 %v3290_v60, %v40_v50  ;;  %v3297_v16 = vadd.f32 %v3291_v61, %v41_v53 }
 0x5ac   :  { %v3298_v17 = vmax.f32 %v3292_v62, 0.0  ;;  %v3299_v18 = vmax.f32 %v3293_v10, 0.0  ;;  %v3300_v19 = vmax.f32 %v3294_v13, 0.0  ;;  %v3301_v20 = vmax.f32 %v3295_v14, 0.0 }
 0x5ad   :  { %v3302_v3 = vmax.f32 %v3296_v15, 0.0  ;;  %v3303_v5 = vmax.f32 %v3297_v16, 0.0 }
 0x5ae   :  { %v3304_v22 = vmul.f32 %v3298_v17, %v4065_v8  ;;  %v3305_v11 = vmul.f32 %v3299_v18, %v4067_v21  ;;  %v3306_v24 = vmul.f32 %v3300_v19, %v4083_v32  ;;  %v3307_v1 = vmul.f32 %v3301_v20, %v4085_v34 }
 0x5af   :  { %v3308_v9 = vmul.f32 %v3302_v3, %v4101_v48  ;;  %v3309_v63 = vmul.f32 %v3303_v5, %v4103_v51 }
 0x5b0   :  { %v3481_v25 = vpack.c.bf16 %v3305_v11, %v3304_v22  ;;  %v3482_v7 = vpack.c.bf16 %v3307_v1, %v3306_v24 }
 0x5b1   :  { %v3483_v0 = vpack.c.bf16 %v3309_v63, %v3308_v9 }
 0x5b2   :  { %3338 = vst [vmem:[%s4509_s8 + $0x4] sm:$0xff] %v3481_v25  ;;  %3339 = vst [vmem:[%s4509_s8 + $0xc] sm:$0xff] %v3482_v7 }
 0x5b3   :  { %3342 = vst.msk [vmem:[%s4509_s8 + $0x14] sm:$0xff] %vm3341_vm11, %v3483_v0 }

// kernel: _lambda_.6
= control target key start
LH: loop header
LB: loop body
LE: loop exit
PB: predicated region body
PF: predicated region fallthrough
CT: control target
= control target key end

     0   :  { %v1887_v2 = vmov 0   ;;  %s1888_s23 = smov 10   ;;  %s1889_s24 = smov 11   ;;  %vm87_vm0 = vcmask 80896   ;;  %vm94_vm1 = vcmask 1043456   ;;  %vm158_vm2 = vcmask 89088   ;;  %s2401_s0 = inlined_call_operand.vmem [shape: bf16[4,8,384], index: 0, kind: input, shape index: {}]   ;;  %s2402_s1 = inlined_call_operand.vmem [shape: bf16[9,16,8], index: 1, kind: input, shape index: {}]   ;;  %s2403_s7 = inlined_call_operand.vmem [shape: bf16[1,16,8], index: 7, kind: input, shape index: {}]   ;;  %s2404_s10 = inlined_call_operand.vmem [shape: f32[1,200], index: 10, kind: input, shape index: {}]   ;;  %s2405_s2 = inlined_call_operand.vmem [shape: f32[16,1], index: 2, kind: input, shape index: {}]   ;;  %s2406_s3 = inlined_call_operand.vmem [shape: f32[16,1], index: 3, kind: input, shape index: {}]   ;;  %s2407_s4 = inlined_call_operand.vmem [shape: bf16[9,16,16], index: 4, kind: input, shape index: {}]   ;;  %s2408_s5 = inlined_call_operand.vmem [shape: f32[16,1], index: 5, kind: input, shape index: {}]   ;;  %s2409_s8 = inlined_call_operand.vmem [shape: f32[16,1], index: 8, kind: input, shape index: {}]   ;;  %s2410_s6 = inlined_call_operand.vmem [shape: f32[16,1], index: 6, kind: input, shape index: {}]   ;;  %s2411_s9 = inlined_call_operand.vmem [shape: f32[16,1], index: 9, kind: input, shape index: {}]   ;;  %s2412_s11 = inlined_call_operand.vmem [shape: bf16[16,384], index: 11, kind: output, shape index: {}]  }
   0x1   :  { %v1670_v0 = vld [vmem:[%s2401_s0 + $0x18] sm:$0xff]  ;;  %v1964_v1 = vld [vmem:[%s2401_s0 + $0x20] ss:$0 sps:$4 sm:$0xff]   ;;  %133 = vmatprep.mubr.bf16.mxu0 %v1887_v2  ;;  %1844 = vset.pattern.permute.xlu1 %v1887_v2  ;;  %v1672_v4 = vld [vmem:[%s2401_s0 + $0x24] sm:$0xff]  ;;  %s1890_s29 = smov 1   ;;  %vm90_vm3 = vcmask 64512   ;;  %v695_v59 = vlaneseq  ;;  %1644 = vst [vmem:[%s2412_s11] sm:$0xff] %v1887_v2 }
   0x2   :  { %v1677_v3 = vcombine.low %v1670_v0, %v1670_v0  ;;  %1843 = vset.pattern.permute.xlu0 %v1887_v2  ;;  %876 = vmatprep.mubr.bf16.mxu1 %v1887_v2  ;;  %v1674_v5 = vcombine.low %v1672_v4, %v1672_v4  ;;  %v1975_v6 = vcombine.high %v1670_v0, %v1670_v0  ;;  %v1982_v7 = vld [vmem:[%s2401_s0 + $0x2c] ss:$0 sps:$4 sm:$0xff]   ;;  %v1853_v11 = vld [vmem:[%s2401_s0 + $0x14] ss:$0 sps:$4 sm:$0xff]   ;;  %v1855_v32 = vld [vmem:[%s2402_s1] sm:$0xff]   ;;  %vm305_vm4 = vcmask 7168  }
   0x3   :  { %85 = vrot.lane.b32.xlu1 %v1964_v1, %s1888_s23  ;;  %v1986_v8 = vcombine.high %v1672_v4, %v1672_v4  ;;  %v1668_v9 = vld [vmem:[%s2401_s0 + $0xc] sm:$0xff]  ;;  %v1858_v40 = vld [vmem:[%s2401_s0 + $0x8] ss:$0 sps:$4 sm:$0xff]   ;;  %v1859_v41 = vld [vmem:[%s2401_s0 + $0x4] ss:$0 sps:$4 sm:$0xff]   ;;  %v696_v60 = vshrl.u32 %v695_v59, 7 }
   0x4   :  { %81 = vrot.lane.b32.xlu0 %v1677_v3, %s1888_s23  ;;  %v1693_v10 = vcombine.low %v1668_v9, %v1668_v9  ;;  %v2004_v12 = vcombine.high %v1668_v9, %v1668_v9  ;;  %v1854_v20 = vld [vmem:[%s2402_s1 + $0x8] sm:$0xff]   ;;  %v1856_v38 = vld [vmem:[%s2402_s1 + $0x10] sm:$0xff]   ;;  %v1857_v42 = vld [vmem:[%s2402_s1 + $0x18] sm:$0xff]   ;;  %v378_v43 = vsel %vm94_vm1, %v1859_v41, 0  ;;  %v578_v54 = vsel %vm94_vm1, %v1975_v6, 0  ;;  %s1895_s0 = smov 119  }
   0x5   :  { %v1860_v45 = vld [vmem:[%s2402_s1 + $0x20] sm:$0xff]   ;;  %v1861_v51 = vld [vmem:[%s2402_s1 + $0x28] sm:$0xff]   ;;  %v1862_v53 = vld [vmem:[%s2402_s1 + $0x30] sm:$0xff]   ;;  %v642_v56 = vsel %vm94_vm1, %v1986_v8, 0  ;;  %v701_v61 = vsub.s32 1, %v696_v60  ;;  %v697_v63 = vsub.s32 0, %v696_v60 }
   0x6   :  { %v442_v48 = vsel %vm94_vm1, %v2004_v12, 0  ;;  %v1863_v55 = vld [vmem:[%s2402_s1 + $0x38] sm:$0xff]   ;;  %v1864_v57 = vld [vmem:[%s2402_s1 + $0x40] sm:$0xff]   ;;  %vm709_vm5 = vcmask 588800   ;;  %s1896_s30 = smov 118   ;;  %vm840_vm6 = vcmask 130048  }
   0x7   :  { %152 = vrot.lane.b32.xlu1 %v1674_v5, %s1889_s24  ;;  %v1865_v58 = vld [vmem:[%s2403_s7] sm:$0xff]   ;;  %vm962_vm7 = vcmask 72704   ;;  %vm1155_vm8 = vcmask 1039360   ;;  %vm1221_vm9 = vcmask 973824   ;;  %vm1287_vm10 = vcmask 965632   ;;  %1646 = vst [vmem:[%s2412_s11 + $0xc] sm:$0xff] %v1887_v2 }
   0x8   :  { %83 = vrot.lane.b32.xlu0 %v1975_v6, %s1888_s23  ;;  %v39_v62 = vld [vmem:[%s2404_s10] sm:$0x3]  ;;  %vm1353_vm11 = vcmask 957440   ;;  %1645 = vst [vmem:[%s2412_s11 + $0x8] sm:$0xf] %v1887_v2  ;;  %vm1660_vm12 = vcmask 588804  }
   0x9   :  { %v2106_v0 = vrot.slane %v39_v62, %v701_v61  ;;  %1647 = vst [vmem:[%s2412_s11 + $0x14] sm:$0xf] %v1887_v2  ;;  %vm1661_vm13 = vmor %vm1660_vm12, %vm94_vm1 }
   0xb   :  { %156 = vrot.lane.b32.xlu1 %v1982_v7, %s1889_s24 }
   0xc   :  { %154 = vrot.lane.b32.xlu0 %v1986_v8, %s1889_s24 }
   0xf   :  { %223 = vrot.lane.b32.xlu1 %v1986_v8, %s1888_s23 }
  0x10   :  { %221 = vrot.lane.b32.xlu0 %v1674_v5, %s1888_s23 }
  0x13   :  { %299 = vrot.lane.b32.xlu1 %v1693_v10, %s1890_s29 }
  0x14   :  { %225 = vrot.lane.b32.xlu0 %v1982_v7, %s1888_s23 }
  0x17   :  { %303 = vrot.lane.b32.xlu1 %v1853_v11, %s1890_s29 }
  0x18   :  { %301 = vrot.lane.b32.xlu0 %v2004_v12, %s1890_s29 }
  0x1b   :  { %504 = vrot.lane.b32.xlu1 %v1986_v8, %s1890_s29 }
  0x1c   :  { %502 = vrot.lane.b32.xlu0 %v1674_v5, %s1890_s29 }
  0x20   :  { %506 = vrot.lane.b32.xlu0 %v1982_v7, %s1890_s29 }
  0x75   :  { %v86_v13 = vpop.permute.xlu1 %85 }
  0x76   :  { %v82_v14 = vpop.permute.xlu0 %81 }
  0x79   :  { %v153_v15 = vpop.permute.xlu1 %152 }
  0x7a   :  { %v84_v16 = vpop.permute.xlu0 %83 }
  0x7b   :  { %v89_v17 = vsel %vm87_vm0, %v84_v16, %v86_v13  ;;  %v88_v18 = vsel %vm87_vm0, %v82_v14, %v84_v16 }
  0x7c   :  { %1683 = vmatprep.subr.msk.bf16.mxu0 %vm94_vm1, %v89_v17  ;;  %v96_v19 = vsel %vm94_vm1, %v88_v18, 0 }
  0x7d   :  { %102 = vmatpush1.bf16.msra.mxu0 %v96_v19  ;;  %v157_v21 = vpop.permute.xlu1 %156 }
  0x7e   :  { %v155_v22 = vpop.permute.xlu0 %154 }
  0x7f   :  { %v159_v23 = vsel %vm158_vm2, %v153_v15, %v155_v22  ;;  %v160_v24 = vsel %vm158_vm2, %v155_v22, %v157_v21 }
  0x80   :  { %v165_v25 = vsel %vm94_vm1, %v159_v23, 0  ;;  %1684 = vmatmul.mubr.msk.bf16.vlgmr.msra.gmra.mrb[0].mxu0 %vm90_vm3, %v1854_v20  ;;  %1686 = vmatprep.subr.msk.bf16.mxu0 %vm94_vm1, %v160_v24 }
  0x81   :  { %171 = vmatpush1.bf16.msra.mxu0 %v165_v25  ;;  %v224_v26 = vpop.permute.xlu1 %223  ;;  %202 = vmatprep.mubr.bf16.mxu0 %v1887_v2 }
  0x82   :  { %v222_v27 = vpop.permute.xlu0 %221 }
  0x83   :  { %v227_v30 = vsel %vm87_vm0, %v222_v27, %v224_v26  ;;  %v757_v27 = vld [vmem:[%s2405_s2 + $0x8] sm:$0xff] }
  0x84   :  { %v233_v34 = vsel %vm94_vm1, %v227_v30, 0  ;;  %v1891_v30 = vmov 0.0  }
  0x85   :  { %v300_v28 = vpop.permute.xlu1 %299  ;;  %798 = vst [vmem:[#allocation2 + $0x10] sm:$0xff] %v1891_v30  ;;  %802 = vst [vmem:[#allocation2 + $0x30] sm:$0xff] %v1891_v30 }
  0x86   :  { %v226_v29 = vpop.permute.xlu0 %225 }
  0x87   :  { %v228_v31 = vsel %vm87_vm0, %v224_v26, %v226_v29  ;;  %v756_v29 = vld [vmem:[%s2405_s2] sm:$0xff]  ;;  %s1893_s2 = smov 9  }
  0x88   :  { %1691 = vmatprep.subr.msk.bf16.mxu0 %vm94_vm1, %v228_v31  ;;  %v773_v31 = vld [vmem:[%s2406_s3 + $0x8] sm:$0xff] }
  0x89   :  { %v304_v33 = vpop.permute.xlu1 %303 }
  0x8a   :  { %v302_v35 = vpop.permute.xlu0 %301 }
  0x8b   :  { %v307_v36 = vsel %vm305_vm4, %v302_v35, %v304_v33  ;;  %v306_v37 = vsel %vm305_vm4, %v300_v28, %v302_v35  ;;  %v772_v28 = vld [vmem:[%s2406_s3] sm:$0xff]  ;;  %s1894_s3 = smov 127  }
  0x8c   :  { %1687 = vmatmul.mubr.msk.bf16.vlgmr.msra.gmra.mrb[0].mxu0 %vm90_vm3, %v1855_v32  ;;  %v312_v39 = vsel %vm94_vm1, %v306_v37, 0  ;;  %v1892_v32 = vmov 0.0|0.0  }
  0x8d   :  { %239 = vmatpush1.bf16.msra.mxu0 %v233_v34  ;;  %270 = vmatprep.mubr.bf16.mxu0 %v1887_v2  ;;  %v505_v47 = vpop.permute.xlu1 %504 }
  0x8e   :  { %1699 = vmatprep.subr.msk.bf16.mxu0 %vm94_vm1, %v307_v36  ;;  %v503_v44 = vpop.permute.xlu0 %502 }
  0x8f   :  { %v508_v50 = vsel %vm305_vm4, %v503_v44, %v505_v47 }
  0x90   :  { %v514_v52 = vsel %vm94_vm1, %v508_v50, 0 }
  0x92   :  { %v507_v46 = vpop.permute.xlu0 %506 }
  0x93   :  { %v509_v49 = vsel %vm305_vm4, %v505_v47, %v507_v46 }
  0x98   :  { %1692 = vmatmul.mubr.msk.bf16.vlgmr.msra.gmra.mrb[0].mxu0 %vm90_vm3, %v1856_v38 }
  0x99   :  { %318 = vmatpush1.bf16.msra.mxu0 %v312_v39  ;;  %349 = vmatprep.mubr.bf16.mxu0 %v1887_v2 }
  0x9a   :  { %1706 = vmatprep.subr.msk.bf16.mxu0 %vm94_vm1, %v1858_v40 }
  0xa4   :  { %1700 = vmatmul.mubr.msk.bf16.vlgmr.msra.gmra.mrb[0].mxu0 %vm90_vm3, %v1857_v42 }
  0xa5   :  { %384 = vmatpush1.bf16.msra.mxu0 %v378_v43  ;;  %415 = vmatprep.mubr.bf16.mxu0 %v1887_v2 }
  0xa6   :  { %1711 = vmatprep.subr.msk.bf16.mxu0 %vm94_vm1, %v1853_v11 }
  0xb0   :  { %1707 = vmatmul.mubr.msk.bf16.vlgmr.msra.gmra.mrb[0].mxu0 %vm90_vm3, %v1860_v45 }
  0xb1   :  { %448 = vmatpush1.bf16.msra.mxu0 %v442_v48  ;;  %479 = vmatprep.mubr.bf16.mxu0 %v1887_v2 }
  0xb2   :  { %1716 = vmatprep.subr.msk.bf16.mxu0 %vm94_vm1, %v509_v49 }
  0xbc   :  { %1712 = vmatmul.mubr.msk.bf16.vlgmr.msra.gmra.mrb[0].mxu0 %vm90_vm3, %v1861_v51 }
  0xbd   :  { %520 = vmatpush1.bf16.msra.mxu0 %v514_v52  ;;  %551 = vmatprep.mubr.bf16.mxu0 %v1887_v2 }
  0xbe   :  { %1721 = vmatprep.subr.msk.bf16.mxu0 %vm94_vm1, %v1964_v1  ;;  %v2108_v1 = vrot.slane %v39_v62, %v697_v63 }
  0xc8   :  { %1717 = vmatmul.mubr.msk.bf16.vlgmr.msra.gmra.mrb[0].mxu0 %vm90_vm3, %v1862_v53 }
  0xc9   :  { %584 = vmatpush1.bf16.msra.mxu0 %v578_v54  ;;  %615 = vmatprep.mubr.bf16.mxu0 %v1887_v2 }
  0xca   :  { %1726 = vmatprep.subr.msk.bf16.mxu0 %vm94_vm1, %v1982_v7 }
  0xd4   :  { %1722 = vmatmul.mubr.msk.bf16.vlgmr.msra.gmra.mrb[0].mxu0 %vm90_vm3, %v1863_v55 }
  0xd5   :  { %648 = vmatpush1.bf16.msra.mxu0 %v642_v56  ;;  %679 = vmatprep.mubr.bf16.mxu0 %v1887_v2 }
  0xd6   :  { %1763 = vmatprep.subr.msk.bf16.mxu0 %vm94_vm1, %v1858_v40 }
  0xe0   :  { %1727 = vmatmul.mubr.msk.bf16.vlgmr.msra.gmra.mrb[0].mxu0 %vm90_vm3, %v1864_v57 }
  0xe1   :  { %1504 = vmatpush1.bf16.msra.mxu0 %v378_v43  ;;  %1535 = vmatprep.mubr.bf16.mxu0 %v1887_v2 }
  0xe8   :  { %1764 = vmatmul.mubr.msk.bf16.vlgmr.msra.gmra.mrb[4].mxu0 %vm90_vm3, %v1865_v58 }
 0x1b3   :  { %v2110_v3 = vpop.f32.mrb[0].mxu0 }
 0x1b4   :  { %v718_v4 = vmul.f32 %v2110_v3, %v2110_v3  ;;  %v2114_v5 = vpop.f32.mrb[1].mxu0  ;;  %v705_v11 = vmul.f32 %v2108_v1, %v2110_v3 }
 0x1b5   :  { %v706_v6 = vmul.f32 %v2106_v0, %v2114_v5  ;;  %v719_v7 = vmul.f32 %v2114_v5, %v2114_v5  ;;  %v2120_v8 = vpop.f32.mrb[2].mxu0 }
 0x1b6   :  { %v720_v9 = vmul.f32 %v2120_v8, %v2120_v8  ;;  %v2124_v10 = vpop.f32.mrb[3].mxu0  ;;  %v707_v17 = vmul.f32 %v2108_v1, %v2120_v8  ;;  %v722_v18 = vmul.f32 %v718_v4, %v2108_v1 }
 0x1b7   :  { %v708_v12 = vmul.f32 %v2106_v0, %v2124_v10  ;;  %v721_v13 = vmul.f32 %v2124_v10, %v2124_v10  ;;  %v710_v14 = vsel %vm709_vm5, %v706_v6, 0.0  ;;  %v723_v15 = vmul.f32 %v719_v7, %v2106_v0 }
 0x1b8   :  { %v711_v16 = vadd.f32 %v710_v14, %v705_v11  ;;  %v724_v24 = vmul.f32 %v720_v9, %v2108_v1 }
 0x1b9   :  { %v714_v19 = vsel %vm709_vm5, %v708_v12, 0.0  ;;  %v726_v20 = vsel %vm709_vm5, %v723_v15, 0.0  ;;  %v725_v21 = vmul.f32 %v721_v13, %v2106_v0 }
 0x1ba   :  { %712 = vadd.xlane.f32.xlu1 %v711_v16  ;;  %v715_v22 = vadd.f32 %v714_v19, %v707_v17  ;;  %v727_v23 = vadd.f32 %v726_v20, %v722_v18 }
 0x1bb   :  { %v730_v25 = vsel %vm709_vm5, %v725_v21, 0.0  ;;  %v2156_v42 = vpop.f32.mrb[4].mxu0 }
 0x1bc   :  { %716 = vadd.xlane.f32.xlu0 %v715_v22  ;;  %v731_v26 = vadd.f32 %v730_v25, %v724_v24  ;;  %v2158_v43 = vpop.f32.mrb[5].mxu0  ;;  %v1546_v44 = vmul.f32 %v2156_v42, %v2108_v1  ;;  %v1558_v47 = vmul.f32 %v2156_v42, %v2156_v42 }
 0x1bd   :  { %v1547_v45 = vmul.f32 %v2158_v43, %v2106_v0  ;;  %v1559_v46 = vmul.f32 %v2158_v43, %v2158_v43  ;;  %v2178_v63 = vpop.f32.mrb[6].mxu0 }
 0x1be   :  { %v1562_v54 = vmul.f32 %v1558_v47, %v2108_v1  ;;  %v2180_v6 = vpop.f32.mrb[7].mxu0  ;;  %v1560_v18 = vmul.f32 %v2178_v63, %v2178_v63 }
 0x1bf   :  { %v1550_v48 = vsel %vm709_vm5, %v1547_v45, 0.0  ;;  %v1563_v51 = vmul.f32 %v1559_v46, %v2106_v0  ;;  %v1549_v9 = vmul.f32 %v2180_v6, %v2106_v0  ;;  %v1561_v17 = vmul.f32 %v2180_v6, %v2180_v6 }
 0x1c0   :  { %728 = vadd.xlane.f32.xlu0 %v727_v23  ;;  %v2169_v49 = vadd.f32 %v1550_v48, %v1546_v44  ;;  %v1564_v20 = vmul.f32 %v1560_v18, %v2108_v1 }
 0x1c1   :  { %v1566_v57 = vsel %vm709_vm5, %v1563_v51, 0.0  ;;  %v1554_v13 = vsel %vm709_vm5, %v1549_v9, 0.0  ;;  %v1565_v19 = vmul.f32 %v1561_v17, %v2106_v0  ;;  %v1474_v51 = vld [vmem:[%s2410_s6 + $0x8] sm:$0xff]  ;;  %v1868_v17 = vld [vmem:[%s2407_s4 + $0x10] sm:$0xff]  }
 0x1c2   :  { %v2176_v60 = vadd.f32 %v1566_v57, %v1562_v54 }
 0x1c3   :  { %v1570_v21 = vsel %vm709_vm5, %v1565_v19, 0.0 }
 0x1c4   :  { %v1571_v22 = vadd.f32 %v1570_v21, %v1564_v20  ;;  %v1869_v20 = vld [vmem:[%s2407_s4 + $0x18] sm:$0xff]  }
 0x1cb   :  { %765 = vperm.xlu1 %1844, %v757_v27  }
 0x1cf   :  { %776 = vperm.xlu1 %1844, %v772_v28  }
 0x1d6   :  { %760 = vperm.xlu0 %1843, %v756_v29  }
 0x1da   :  { %892 = vrot.lane.b32.xlu0 %v1892_v32, %s1889_s24 }
 0x1f3   :  { %732 = vadd.xlane.f32.xlu1 %v731_v26 }
 0x204   :  { %781 = vperm.xlu1 %1844, %v773_v31  }
 0x247   :  { %v713_v33 = vpop.xlane.xlu1 %712 }
 0x248   :  { %v734_v35 = vmul.f32 0.0078125, %v713_v33 }
 0x249   :  { %v717_v34 = vpop.xlane.xlu0 %716 }
 0x24a   :  { %v738_v37 = vmul.f32 %v734_v35, %v734_v35  ;;  %v744_v52 = vsub.f32 %v2110_v3, %v734_v35  ;;  %v745_v53 = vsub.f32 %v2114_v5, %v734_v35  ;;  %v1548_v3 = vmul.f32 %v2178_v63, %v2108_v1 }
 0x24b   :  { %v766_v50 = vpop.permute.xlu1 %765  ;;  %v735_v23 = vmul.f32 0.0078125, %v717_v34 }
 0x24c   :  { %v2187_v14 = vadd.f32 %v1554_v13, %v1548_v3 }
 0x24d   :  { %v729_v36 = vpop.xlane.xlu0 %728  ;;  %v739_v26 = vmul.f32 %v735_v23, %v735_v23  ;;  %v746_v30 = vsub.f32 %v2120_v8, %v735_v23  ;;  %v747_v31 = vsub.f32 %v2124_v10, %v735_v23 }
 0x24e   :  { %v736_v38 = vmul.f32 0.0078125, %v729_v36 }
 0x24f   :  { %v777_v4 = vpop.permute.xlu1 %776 }
 0x250   :  { %v740_v39 = vsub.f32 %v736_v38, %v738_v37 }
 0x252   :  { %v742_v40 = vmax.f32 %v740_v39, 0.0 }
 0x254   :  { %v748_v41 = vadd.f32 1e-05, %v742_v40 }
 0x255   :  { %v761_v56 = vpop.permute.xlu0 %760 }
 0x256   :  { %1875 = vrsqrt.f32 %v748_v41 }
 0x260   :  { %v1876_v55 = vpop.eup %1875 }
 0x261   :  { %v752_v58 = vmul.f32 %v1876_v55, %v744_v52  ;;  %v753_v59 = vmul.f32 %v1876_v55, %v745_v53  ;;  %v1596_v52 = vld [vmem:[%s2409_s8] sm:$0xff] }
 0x262   :  { %v1473_v53 = vld [vmem:[%s2410_s6] sm:$0xff] }
 0x263   :  { %v768_v61 = vmul.f32 %v761_v56, %v752_v58  ;;  %v769_v62 = vmul.f32 %v761_v56, %v753_v59  ;;  %v1866_v59 = vld [vmem:[%s2407_s4 + $0x8] sm:$0xff]  }
 0x265   :  { %v784_v5 = vadd.f32 %v777_v4, %v768_v61  ;;  %v785_v7 = vadd.f32 %v777_v4, %v769_v62  ;;  %v893_v61 = vpop.permute.xlu0 %892 }
 0x267   :  { %v788_v11 = vmax.f32 %v784_v5, 0.0  ;;  %v789_v12 = vmax.f32 %v785_v7, 0.0 }
 0x269   :  { %v792_v15 = vmul.f32 %v788_v11, %v2108_v1  ;;  %v793_v16 = vmul.f32 %v789_v12, %v2106_v0  ;;  %v1867_v11 = vld [vmem:[%s2407_s4] sm:$0xff]  }
 0x26b   :  { %805 = vst.msk [vmem:[#allocation2 + $0x10] sm:$0xff] %vm709_vm5, %v793_v16 }
 0x272   :  { %v810_v8 = vld [vmem:[#allocation2 + $0x10] sm:$0xff] }
 0x280   :  { %v733_v24 = vpop.xlane.xlu1 %732 }
 0x281   :  { %v737_v25 = vmul.f32 0.0078125, %v733_v24 }
 0x283   :  { %v741_v27 = vsub.f32 %v737_v25, %v739_v26  ;;  %v1871_v26 = vld [vmem:[%s2407_s4 + $0x28] sm:$0xff]  }
 0x284   :  { %v782_v39 = vpop.permute.xlu1 %781 }
 0x285   :  { %v743_v28 = vmax.f32 %v741_v27, 0.0 }
 0x287   :  { %v749_v29 = vadd.f32 1e-05, %v743_v28 }
 0x289   :  { %1877 = vrsqrt.f32 %v749_v29 }
 0x293   :  { %v1878_v33 = vpop.eup %1877 }
 0x294   :  { %v754_v35 = vmul.f32 %v1878_v33, %v746_v30  ;;  %v755_v36 = vmul.f32 %v1878_v33, %v747_v31  ;;  %v1872_v30 = vld [vmem:[%s2407_s4 + $0x30] sm:$0xff]  }
 0x296   :  { %v770_v37 = vmul.f32 %v766_v50, %v754_v35  ;;  %v771_v38 = vmul.f32 %v766_v50, %v755_v36  ;;  %v1597_v50 = vld [vmem:[%s2409_s8 + $0x8] sm:$0xff]  ;;  %v1873_v36 = vld [vmem:[%s2407_s4 + $0x38] sm:$0xff]  }
 0x298   :  { %v786_v40 = vadd.f32 %v782_v39, %v770_v37  ;;  %v787_v41 = vadd.f32 %v782_v39, %v771_v38  ;;  %v1874_v39 = vld [vmem:[%s2407_s4 + $0x40] sm:$0xff]  }
 0x29a   :  { %v790_v34 = vmax.f32 %v786_v40, 0.0  ;;  %v791_v44 = vmax.f32 %v787_v41, 0.0 }
 0x29c   :  { %v794_v45 = vmul.f32 %v790_v34, %v2108_v1  ;;  %v795_v46 = vmul.f32 %v791_v44, %v2106_v0 }
 0x29e   :  { %807 = vst.msk [vmem:[#allocation2 + $0x30] sm:$0xff] %vm709_vm5, %v795_v46  ;;  %v2204_v47 = vpack.c.bf16 %v794_v45, %v792_v15 }
 0x2a0   :  { %832 = vrot.lane.b32.xlu1 %v2204_v47, %s1888_s23 }
 0x2a5   :  { %v813_v10 = vld [vmem:[#allocation2 + $0x30] sm:$0xff] }
 0x2a6   :  { %v2208_v48 = vpack.c.bf16 %v813_v10, %v810_v8 }
 0x2a8   :  { %960 = vrot.lane.b32.xlu0 %v2208_v48, %s1893_s2  ;;  %834 = vrot.lane.b32.xlu1 %v2208_v48, %s1888_s23 }
 0x2ac   :  { %1027 = vrot.lane.b32.xlu0 %v2204_v47, %s1890_s29  ;;  %830 = vrot.lane.b32.xlu1 %v1892_v32, %s1888_s23  ;;  %s1897_s23 = smov 117  }
 0x2b0   :  { %1025 = vrot.lane.b32.xlu0 %v1892_v32, %s1890_s29  ;;  %894 = vrot.lane.b32.xlu1 %v2204_v47, %s1889_s24 }
 0x2b4   :  { %1153 = vrot.lane.b32.xlu0 %v2208_v48, %s1894_s3  ;;  %896 = vrot.lane.b32.xlu1 %v2208_v48, %s1889_s24 }
 0x2b8   :  { %1219 = vrot.lane.b32.xlu0 %v2208_v48, %s1895_s0  ;;  %958 = vrot.lane.b32.xlu1 %v2204_v47, %s1893_s2 }
 0x2bc   :  { %1285 = vrot.lane.b32.xlu0 %v2208_v48, %s1896_s30  ;;  %956 = vrot.lane.b32.xlu1 %v1892_v32, %s1893_s2  ;;  %v1457_v32 = vld [vmem:[%s2408_s5] sm:$0xff] }
 0x2c0   :  { %1351 = vrot.lane.b32.xlu0 %v2208_v48, %s1897_s23  ;;  %1029 = vrot.lane.b32.xlu1 %v2208_v48, %s1890_s29 }
 0x2c4   :  { %1151 = vrot.lane.b32.xlu1 %v2204_v47, %s1894_s3 }
 0x2c8   :  { %1217 = vrot.lane.b32.xlu1 %v2204_v47, %s1895_s0 }
 0x2cc   :  { %1283 = vrot.lane.b32.xlu1 %v2204_v47, %s1896_s30 }
 0x2d0   :  { %1349 = vrot.lane.b32.xlu1 %v2204_v47, %s1897_s23 }
 0x2df   :  { %1552 = vadd.xlane.f32.xlu0 %v2169_v49  ;;  %v1458_v49 = vld [vmem:[%s2408_s5 + $0x8] sm:$0xff] }
 0x2e3   :  { %1568 = vadd.xlane.f32.xlu0 %v2176_v60 }
 0x2f4   :  { %1556 = vadd.xlane.f32.xlu1 %v2187_v14 }
 0x2f8   :  { %1572 = vadd.xlane.f32.xlu1 %v1571_v22  ;;  %v1870_v22 = vld [vmem:[%s2407_s4 + $0x20] sm:$0xff]  }
 0x2f9   :  { %1461 = vperm.xlu0 %1843, %v1457_v32  }
 0x2fd   :  { %1605 = vperm.xlu0 %1843, %v1597_v50  }
 0x301   :  { %1482 = vperm.xlu0 %1843, %v1474_v51  }
 0x309   :  { %1466 = vperm.xlu1 %1844, %v1458_v49  }
 0x30d   :  { %1600 = vperm.xlu1 %1844, %v1596_v52  }
 0x311   :  { %1477 = vperm.xlu1 %1844, %v1473_v53  }
 0x312   :  { %v833_v54 = vpop.permute.xlu1 %832 }
 0x31a   :  { %v835_v55 = vpop.permute.xlu1 %834  ;;  %v961_v5 = vpop.permute.xlu0 %960 }
 0x31b   :  { %v837_v56 = vsel %vm87_vm0, %v833_v54, %v835_v55 }
 0x31c   :  { %844 = vmatprep.subr.bf16.mxu1 %v837_v56 }
 0x31e   :  { %v831_v57 = vpop.permute.xlu1 %830  ;;  %v1028_v14 = vpop.permute.xlu0 %1027 }
 0x31f   :  { %v836_v58 = vsel %vm87_vm0, %v831_v57, %v833_v54 }
 0x320   :  { %845 = vmatpush1.bf16.msra.mxu1 %v836_v58 }
 0x322   :  { %v895_v60 = vpop.permute.xlu1 %894  ;;  %v1026_v18 = vpop.permute.xlu0 %1025 }
 0x323   :  { %1731 = vmatmul.mubr.msk.bf16.vlgmr.msra.gmra.mrb[0].mxu1 %vm840_vm6, %v1866_v59  ;;  %v898_v3 = vsel %vm158_vm2, %v893_v61, %v895_v60  ;;  %v1031_v19 = vsel %vm305_vm4, %v1026_v18, %v1028_v14 }
 0x324   :  { %937 = vmatprep.mubr.bf16.mxu1 %v1887_v2 }
 0x326   :  { %v897_v62 = vpop.permute.xlu1 %896  ;;  %v1154_v21 = vpop.permute.xlu0 %1153 }
 0x327   :  { %v899_v4 = vsel %vm158_vm2, %v895_v60, %v897_v62  ;;  %v1612_v62 = vld [vmem:[%s2411_s9] sm:$0xff] }
 0x328   :  { %905 = vmatprep.subr.bf16.mxu1 %v899_v4  ;;  %v1613_v4 = vld [vmem:[%s2411_s9 + $0x8] sm:$0xff] }
 0x329   :  { %906 = vmatpush1.bf16.msra.mxu1 %v898_v3 }
 0x32a   :  { %v959_v7 = vpop.permute.xlu1 %958  ;;  %v1220_v25 = vpop.permute.xlu0 %1219 }
 0x32b   :  { %v964_v9 = vsel %vm962_vm7, %v959_v7, %v961_v5 }
 0x32c   :  { %970 = vmatprep.subr.bf16.mxu1 %v964_v9 }
 0x32e   :  { %v957_v12 = vpop.permute.xlu1 %956  ;;  %v1286_v29 = vpop.permute.xlu0 %1285 }
 0x32f   :  { %v963_v13 = vsel %vm962_vm7, %v957_v12, %v959_v7  ;;  %1733 = vmatmul.mubr.msk.bf16.vlgmr.msra.gmra.mrb[0].mxu1 %vm840_vm6, %v1867_v11 }
 0x330   :  { %971 = vmatpush1.bf16.msra.mxu1 %v963_v13  ;;  %1002 = vmatprep.mubr.bf16.mxu1 %v1887_v2 }
 0x332   :  { %v1030_v15 = vpop.permute.xlu1 %1029  ;;  %v1352_v35 = vpop.permute.xlu0 %1351 }
 0x333   :  { %v1032_v16 = vsel %vm305_vm4, %v1028_v14, %v1030_v15 }
 0x334   :  { %1038 = vmatprep.subr.bf16.mxu1 %v1032_v16 }
 0x336   :  { %v1152_v23 = vpop.permute.xlu1 %1151 }
 0x337   :  { %v1156_v24 = vsel %vm1155_vm8, %v1152_v23, %v1154_v21 }
 0x33a   :  { %v1218_v27 = vpop.permute.xlu1 %1217 }
 0x33b   :  { %1737 = vmatmul.mubr.msk.bf16.vlgmr.msra.gmra.mrb[0].mxu1 %vm840_vm6, %v1868_v17  ;;  %v1222_v28 = vsel %vm1221_vm9, %v1218_v27, %v1220_v25 }
 0x33c   :  { %1039 = vmatpush1.bf16.msra.mxu1 %v1031_v19  ;;  %1070 = vmatprep.mubr.bf16.mxu1 %v1887_v2 }
 0x33d   :  { %1096 = vmatprep.subr.bf16.mxu1 %v2208_v48 }
 0x33e   :  { %v1284_v31 = vpop.permute.xlu1 %1283 }
 0x33f   :  { %v1288_v33 = vsel %vm1287_vm10, %v1284_v31, %v1286_v29 }
 0x342   :  { %v1350_v37 = vpop.permute.xlu1 %1349 }
 0x343   :  { %v1354_v38 = vsel %vm1353_vm11, %v1350_v37, %v1352_v35 }
 0x347   :  { %1741 = vmatmul.mubr.msk.bf16.vlgmr.msra.gmra.mrb[0].mxu1 %vm840_vm6, %v1869_v20 }
 0x348   :  { %1097 = vmatpush1.bf16.msra.mxu1 %v2204_v47  ;;  %1128 = vmatprep.mubr.bf16.mxu1 %v1887_v2 }
 0x349   :  { %1162 = vmatprep.subr.bf16.mxu1 %v1154_v21 }
 0x353   :  { %1745 = vmatmul.mubr.msk.bf16.vlgmr.msra.gmra.mrb[0].mxu1 %vm840_vm6, %v1870_v22 }
 0x354   :  { %1163 = vmatpush1.bf16.msra.mxu1 %v1156_v24  ;;  %1194 = vmatprep.mubr.bf16.mxu1 %v1887_v2 }
 0x355   :  { %1228 = vmatprep.subr.bf16.mxu1 %v1220_v25 }
 0x35f   :  { %1749 = vmatmul.mubr.msk.bf16.vlgmr.msra.gmra.mrb[0].mxu1 %vm840_vm6, %v1871_v26 }
 0x360   :  { %1229 = vmatpush1.bf16.msra.mxu1 %v1222_v28  ;;  %1260 = vmatprep.mubr.bf16.mxu1 %v1887_v2 }
 0x361   :  { %1294 = vmatprep.subr.bf16.mxu1 %v1286_v29 }
 0x36b   :  { %1753 = vmatmul.mubr.msk.bf16.vlgmr.msra.gmra.mrb[0].mxu1 %vm840_vm6, %v1872_v30 }
 0x36c   :  { %1295 = vmatpush1.bf16.msra.mxu1 %v1288_v33  ;;  %1326 = vmatprep.mubr.bf16.mxu1 %v1887_v2  ;;  %v1553_v5 = vpop.xlane.xlu0 %1552 }
 0x36d   :  { %1360 = vmatprep.subr.bf16.mxu1 %v1352_v35  ;;  %v1574_v14 = vmul.f32 0.0078125, %v1553_v5 }
 0x36f   :  { %v1578_v18 = vmul.f32 %v1574_v14, %v1574_v14 }
 0x370   :  { %v1569_v9 = vpop.xlane.xlu0 %1568 }
 0x371   :  { %v1576_v19 = vmul.f32 0.0078125, %v1569_v9 }
 0x373   :  { %v1580_v22 = vsub.f32 %v1576_v19, %v1578_v18 }
 0x375   :  { %v1582_v25 = vmax.f32 %v1580_v22, 0.0 }
 0x377   :  { %1757 = vmatmul.mubr.msk.bf16.vlgmr.msra.gmra.mrb[0].mxu1 %vm840_vm6, %v1873_v36  ;;  %v1588_v31 = vadd.f32 1e-05, %v1582_v25 }
 0x378   :  { %1361 = vmatpush1.bf16.msra.mxu1 %v1354_v38  ;;  %1392 = vmatprep.mubr.bf16.mxu1 %v1887_v2  ;;  %v2364_v12 = vpop.permute.xlu0 %1461 }
 0x37c   :  { %v1606_v20 = vpop.permute.xlu0 %1605 }
 0x380   :  { %v1483_v2 = vpop.permute.xlu0 %1482 }
 0x381   :  { %v1557_v3 = vpop.xlane.xlu1 %1556 }
 0x382   :  { %v1575_v13 = vmul.f32 0.0078125, %v1557_v3 }
 0x383   :  { %1761 = vmatmul.mubr.msk.bf16.vlgmr.msra.gmra.mrb[0].mxu1 %vm840_vm6, %v1874_v39 }
 0x384   :  { %v1579_v15 = vmul.f32 %v1575_v13, %v1575_v13 }
 0x385   :  { %v1573_v7 = vpop.xlane.xlu1 %1572 }
 0x386   :  { %v1577_v16 = vmul.f32 0.0078125, %v1573_v7 }
 0x388   :  { %v1581_v21 = vsub.f32 %v1577_v16, %v1579_v15 }
 0x389   :  { %v2362_v11 = vpop.permute.xlu1 %1466 }
 0x38a   :  { %v1583_v24 = vmax.f32 %v1581_v21, 0.0 }
 0x38c   :  { %v1589_v27 = vadd.f32 1e-05, %v1583_v24 }
 0x38d   :  { %v1601_v17 = vpop.permute.xlu1 %1600 }
 0x38e   :  { %1879 = vrsqrt.f32 %v1589_v27 }
 0x38f   :  { %1881 = vrsqrt.f32 %v1588_v31 }
 0x391   :  { %v2366_v23 = vpop.permute.xlu1 %1477 }
 0x456   :  { %v2308_v40 = vpop.f32.mrb[0].mxu1 }
 0x457   :  { %v1419_v41 = vmul.f32 %v2308_v40, %v2308_v40  ;;  %v2312_v34 = vpop.f32.mrb[1].mxu1  ;;  %v1407_v10 = vmul.f32 %v2308_v40, %v2108_v1 }
 0x458   :  { %v1408_v44 = vmul.f32 %v2312_v34, %v2106_v0  ;;  %v1420_v45 = vmul.f32 %v2312_v34, %v2312_v34  ;;  %v2318_v46 = vpop.f32.mrb[2].mxu1 }
 0x459   :  { %v1421_v47 = vmul.f32 %v2318_v46, %v2318_v46  ;;  %v2322_v8 = vpop.f32.mrb[3].mxu1  ;;  %v1409_v52 = vmul.f32 %v2318_v46, %v2108_v1  ;;  %v1423_v53 = vmul.f32 %v1419_v41, %v2108_v1 }
 0x45a   :  { %v1410_v48 = vmul.f32 %v2322_v8, %v2106_v0  ;;  %v1422_v32 = vmul.f32 %v2322_v8, %v2322_v8  ;;  %v1411_v50 = vsel %vm709_vm5, %v1408_v44, 0.0  ;;  %v1424_v51 = vmul.f32 %v1420_v45, %v2106_v0 }
 0x45b   :  { %v1412_v49 = vadd.f32 %v1411_v50, %v1407_v10  ;;  %v1425_v58 = vmul.f32 %v1421_v47, %v2108_v1  ;;  %v1587_v50 = vsub.f32 %v2180_v6, %v1575_v13 }
 0x45c   :  { %v1426_v54 = vmul.f32 %v1422_v32, %v2106_v0  ;;  %v1415_v55 = vsel %vm709_vm5, %v1410_v48, 0.0  ;;  %v1427_v56 = vsel %vm709_vm5, %v1424_v51, 0.0  ;;  %v1586_v32 = vsub.f32 %v2178_v63, %v1575_v13  ;;  %v1880_v51 = vpop.eup %1879 }
 0x45d   :  { %1413 = vadd.xlane.f32.xlu1 %v1412_v49  ;;  %v1416_v57 = vadd.f32 %v1415_v55, %v1409_v52  ;;  %v1428_v59 = vadd.f32 %v1427_v56, %v1423_v53  ;;  %v1584_v49 = vsub.f32 %v2156_v42, %v1574_v14  ;;  %v1585_v52 = vsub.f32 %v2158_v43, %v1574_v14  ;;  %v1882_v53 = vpop.eup %1881 }
 0x45e   :  { %v1431_v60 = vsel %vm709_vm5, %v1426_v54, 0.0  ;;  %v1594_v54 = vmul.f32 %v1880_v51, %v1586_v32  ;;  %v1595_v55 = vmul.f32 %v1880_v51, %v1587_v50 }
 0x45f   :  { %1417 = vadd.xlane.f32.xlu0 %v1416_v57  ;;  %v1432_v61 = vadd.f32 %v1431_v60, %v1425_v58  ;;  %v1592_v56 = vmul.f32 %v1882_v53, %v1584_v49  ;;  %v1593_v57 = vmul.f32 %v1882_v53, %v1585_v52 }
 0x460   :  { %v1610_v63 = vmul.f32 %v1606_v20, %v1594_v54 }
 0x461   :  { %1433 = vadd.xlane.f32.xlu1 %v1432_v61  ;;  %v1608_v7 = vmul.f32 %v1601_v17, %v1592_v56  ;;  %v1609_v9 = vmul.f32 %v1601_v17, %v1593_v57 }
 0x463   :  { %1429 = vadd.xlane.f32.xlu0 %v1428_v59 }
 0x472   :  { %1616 = vperm.xlu1 %1844, %v1612_v62   ;;  %v1611_v62 = vmul.f32 %v1606_v20, %v1595_v55 }
 0x479   :  { %1621 = vperm.xlu0 %1843, %v1613_v4  }
 0x4ea   :  { %v1414_v26 = vpop.xlane.xlu1 %1413 }
 0x4eb   :  { %v1435_v29 = vmul.f32 0.0078125, %v1414_v26 }
 0x4ec   :  { %v1418_v28 = vpop.xlane.xlu0 %1417 }
 0x4ed   :  { %v1436_v30 = vmul.f32 0.0078125, %v1418_v28  ;;  %v1439_v39 = vmul.f32 %v1435_v29, %v1435_v29  ;;  %v1445_v6 = vsub.f32 %v2308_v40, %v1435_v29  ;;  %v1446_v4 = vsub.f32 %v2312_v34, %v1435_v29 }
 0x4ee   :  { %v1434_v33 = vpop.xlane.xlu1 %1433 }
 0x4ef   :  { %v1438_v35 = vmul.f32 0.0078125, %v1434_v33  ;;  %v1440_v36 = vmul.f32 %v1436_v30, %v1436_v30  ;;  %v1447_v58 = vsub.f32 %v2318_v46, %v1436_v30  ;;  %v1448_v59 = vsub.f32 %v2322_v8, %v1436_v30 }
 0x4f0   :  { %v1430_v37 = vpop.xlane.xlu0 %1429 }
 0x4f1   :  { %v1442_v38 = vsub.f32 %v1438_v35, %v1440_v36  ;;  %v1437_v41 = vmul.f32 0.0078125, %v1430_v37 }
 0x4f2   :  { %v1617_v42 = vpop.permute.xlu1 %1616 }
 0x4f3   :  { %v1444_v44 = vmax.f32 %v1442_v38, 0.0  ;;  %v1441_v45 = vsub.f32 %v1437_v41, %v1439_v39  ;;  %v1624_v18 = vadd.f32 %v1617_v42, %v1608_v7  ;;  %v1625_v19 = vadd.f32 %v1617_v42, %v1609_v9 }
 0x4f5   :  { %v1450_v47 = vadd.f32 1e-05, %v1444_v44  ;;  %v1443_v10 = vmax.f32 %v1441_v45, 0.0  ;;  %v1628_v27 = vmul.f32 %v1624_v18, %v2108_v1  ;;  %v1629_v28 = vmul.f32 %v1625_v19, %v2106_v0 }
 0x4f7   :  { %1883 = vrsqrt.f32 %v1450_v47  ;;  %v1449_v48 = vadd.f32 1e-05, %v1443_v10 }
 0x4f8   :  { %v1622_v60 = vpop.permute.xlu0 %1621 }
 0x4f9   :  { %1885 = vrsqrt.f32 %v1449_v48  ;;  %v1626_v13 = vadd.f32 %v1622_v60, %v1610_v63  ;;  %v1627_v14 = vadd.f32 %v1622_v60, %v1611_v62 }
 0x4fb   :  { %v1630_v22 = vmul.f32 %v1626_v13, %v2108_v1  ;;  %v1631_v17 = vmul.f32 %v1627_v14, %v2106_v0 }
 0x501   :  { %v1884_v61 = vpop.eup %1883 }
 0x502   :  { %v1455_v3 = vmul.f32 %v1884_v61, %v1447_v58  ;;  %v1456_v43 = vmul.f32 %v1884_v61, %v1448_v59 }
 0x503   :  { %v1886_v5 = vpop.eup %1885 }
 0x504   :  { %v1453_v15 = vmul.f32 %v1886_v5, %v1445_v6  ;;  %v1454_v46 = vmul.f32 %v1886_v5, %v1446_v4  ;;  %v1471_v8 = vmul.f32 %v2362_v11, %v1455_v3  ;;  %v1472_v16 = vmul.f32 %v2362_v11, %v1456_v43 }
 0x506   :  { %v1469_v40 = vmul.f32 %v2364_v12, %v1453_v15  ;;  %v1470_v34 = vmul.f32 %v2364_v12, %v1454_v46  ;;  %v1487_v20 = vadd.f32 %v1483_v2, %v1471_v8  ;;  %v1488_v21 = vadd.f32 %v1483_v2, %v1472_v16 }
 0x508   :  { %v1485_v24 = vadd.f32 %v2366_v23, %v1469_v40  ;;  %v1486_v25 = vadd.f32 %v2366_v23, %v1470_v34  ;;  %v1491_v26 = vmul.f32 %v1487_v20, %v2108_v1  ;;  %v1492_v11 = vmul.f32 %v1488_v21, %v2106_v0 }
 0x50a   :  { %v1489_v12 = vmul.f32 %v1485_v24, %v2108_v1  ;;  %v1490_v2 = vmul.f32 %v1486_v25, %v2106_v0  ;;  %v1634_v29 = vadd.f32 %v1630_v22, %v1491_v26  ;;  %v1635_v30 = vadd.f32 %v1631_v17, %v1492_v11 }
 0x50c   :  { %v1632_v31 = vadd.f32 %v1628_v27, %v1489_v12  ;;  %v1633_v33 = vadd.f32 %v1629_v28, %v1490_v2  ;;  %v1638_v35 = vmax.f32 %v1634_v29, 0.0  ;;  %v1639_v36 = vmax.f32 %v1635_v30, 0.0 }
 0x50e   :  { %v1636_v23 = vmax.f32 %v1632_v31, 0.0  ;;  %v1637_v37 = vmax.f32 %v1633_v33, 0.0  ;;  %v1642_v38 = vmul.f32 %v1638_v35, %v2108_v1  ;;  %v1643_v39 = vmul.f32 %v1639_v36, %v2106_v0 }
 0x510   :  { %v1640_v41 = vmul.f32 %v1636_v23, %v2108_v1  ;;  %v1641_v44 = vmul.f32 %v1637_v37, %v2106_v0  ;;  %v1768_v45 = vpack.c.bf16 %v1643_v39, %v1642_v38 }
 0x512   :  { %v1767_v47 = vpack.c.bf16 %v1641_v44, %v1640_v41  ;;  %1663 = vst.msk [vmem:[%s2412_s11 + $0x10] sm:$0xff] %vm1661_vm13, %v1768_v45 }
 0x514   :  { %1662 = vst.msk [vmem:[%s2412_s11 + $0x4] sm:$0xff] %vm1661_vm13, %v1767_v47 }

// kernel: _lambda_.7
= control target key start
LH: loop header
LB: loop body
LE: loop exit
PB: predicated region body
PF: predicated region fallthrough
CT: control target
= control target key end

     0   :  { %s2823_s17 = smov 6   ;;  %s2824_s18 = smov 7   ;;  %vm106_vm0 = vcmask 130048   ;;  %v2826_v8 = vmov 0   ;;  %vm178_vm1 = vcmask 56320   ;;  %vm103_vm2 = vcmask 48128   ;;  %s3486_s0 = inlined_call_operand.vmem [shape: bf16[4,16,256], index: 0, kind: input, shape index: {}]   ;;  %s3487_s1 = inlined_call_operand.vmem [shape: bf16[9,32,16], index: 1, kind: input, shape index: {}]   ;;  %s3488_s2 = inlined_call_operand.vmem [shape: f32[32,1], index: 2, kind: input, shape index: {}]   ;;  %s3489_s10 = inlined_call_operand.vmem [shape: f32[1,72], index: 10, kind: input, shape index: {}]   ;;  %s3490_s3 = inlined_call_operand.vmem [shape: f32[32,1], index: 3, kind: input, shape index: {}]   ;;  %s3491_s4 = inlined_call_operand.vmem [shape: bf16[9,32,32], index: 4, kind: input, shape index: {}]   ;;  %s3492_s8 = inlined_call_operand.vmem [shape: f32[32,1], index: 8, kind: input, shape index: {}]   ;;  %s3493_s6 = inlined_call_operand.vmem [shape: f32[32,1], index: 6, kind: input, shape index: {}]   ;;  %s3494_s5 = inlined_call_operand.vmem [shape: f32[32,1], index: 5, kind: input, shape index: {}]   ;;  %s3495_s7 = inlined_call_operand.vmem [shape: bf16[1,32,16], index: 7, kind: input, shape index: {}]   ;;  %s3496_s9 = inlined_call_operand.vmem [shape: f32[32,1], index: 9, kind: input, shape index: {}]   ;;  %s3497_s13 = inlined_call_operand.vmem [shape: f32[10,1], index: 13, kind: input, shape index: {}]   ;;  %s3498_s11 = inlined_call_operand.vmem [shape: f32[72,2], index: 11, kind: input, shape index: {}]   ;;  %s3499_s12 = inlined_call_operand.vmem [shape: f32[10,32], index: 12, kind: input, shape index: {}]   ;;  %s3500_s14 = inlined_call_operand.vmem [shape: f32[10,2], index: 14, kind: output, shape index: {}]  }
   0x1   :  { %v2750_v0 = vld [vmem:[%s3486_s0 + $0x30] ss:$8 sps:$4 sm:$0xff]   ;;  %v2915_v1 = vld [vmem:[%s3486_s0 + $0x34] ss:$8 sps:$4 sm:$0xff]   ;;  %v2759_v3 = vld [vmem:[%s3487_s1] sm:$0xff]   ;;  %s2825_s25 = smov 1   ;;  %2748 = vset.pattern.permute.xlu1 %v2826_v8  ;;  %2749 = vset.pattern.permute.xlu0 %v2826_v8 }
   0x2   :  { %251 = vrot.lane.b32.xlu1 %v2750_v0, %s2823_s17  ;;  %174 = vrot.lane.b32.xlu0 %v2750_v0, %s2824_s18  ;;  %v2922_v2 = vld [vmem:[%s3486_s0 + $0x14] ss:$8 sps:$4 sm:$0xff]   ;;  %v2755_v4 = vld [vmem:[%s3486_s0 + $0x10] ss:$8 sps:$4 sm:$0xff]   ;;  %vm339_vm3 = vcmask 7168   ;;  %vm788_vm4 = vcmask 588800  }
   0x3   :  { %2491 = vmatprep.mubr.msk.bf16.mxu0 %vm106_vm0, %v2759_v3  ;;  %v2941_v5 = vld [vmem:[%s3486_s0 + $0x24] ss:$8 sps:$4 sm:$0xff]   ;;  %v2758_v6 = vld [vmem:[%s3486_s0 + $0x20] ss:$8 sps:$4 sm:$0xff]   ;;  %v2774_v7 = vld [vmem:[%s3487_s1 + $0x10] sm:$0xff]   ;;  %vm984_vm5 = vcmask 261120  }
   0x4   :  { %2485 = vmatprep.mubr.msk.bf16.mxu1 %vm106_vm0, %v2774_v7  ;;  %v857_v9 = vld [vmem:[%s3488_s2] sm:$0xff]  ;;  %v2760_v16 = vld [vmem:[%s3487_s1 + $0x8] sm:$0xff]   ;;  %v2775_v27 = vld [vmem:[%s3487_s1 + $0x18] sm:$0xff]   ;;  %s2831_s29 = smov 123   ;;  %s2832_s30 = smov 122   ;;  %vm1140_vm6 = vcmask 39936  }
   0x5   :  { %v2761_v17 = vld [vmem:[%s3487_s1 + $0x20] sm:$0xff]   ;;  %v2762_v26 = vld [vmem:[%s3487_s1 + $0x28] sm:$0xff]   ;;  %v2763_v28 = vld [vmem:[%s3487_s1 + $0x30] sm:$0xff]   ;;  %s2833_s15 = smov 121   ;;  %vm2232_vm7 = vcmask 9216   ;;  %vm2230_vm8 = vcmask 15360  }
   0x6   :  { %253 = vrot.lane.b32.xlu1 %v2915_v1, %s2823_s17  ;;  %176 = vrot.lane.b32.xlu0 %v2915_v1, %s2824_s18  ;;  %v2983_v29 = vld [vmem:[%s3486_s0 + $0x4] ss:$8 sps:$4 sm:$0xff]   ;;  %v2764_v30 = vld [vmem:[%s3487_s1 + $0x38] sm:$0xff]  }
   0x7   :  { %v2766_v31 = vld [vmem:[%s3487_s1 + $0x40] sm:$0xff]   ;;  %v2767_v32 = vld [vmem:[%s3487_s1 + $0x48] sm:$0xff]   ;;  %v2768_v33 = vld [vmem:[%s3487_s1 + $0x50] sm:$0xff]  }
   0x8   :  { %v2769_v35 = vld [vmem:[%s3487_s1 + $0x58] sm:$0xff]   ;;  %v2770_v36 = vld [vmem:[%s3487_s1 + $0x60] sm:$0xff]   ;;  %v2771_v37 = vld [vmem:[%s3487_s1 + $0x68] sm:$0xff]  }
   0x9   :  { %v2772_v38 = vld [vmem:[%s3487_s1 + $0x70] sm:$0xff]   ;;  %v2773_v39 = vld [vmem:[%s3487_s1 + $0x78] sm:$0xff]   ;;  %v2776_v40 = vld [vmem:[%s3487_s1 + $0x80] sm:$0xff]  }
   0xa   :  { %337 = vrot.lane.b32.xlu1 %v2922_v2, %s2825_s25  ;;  %335 = vrot.lane.b32.xlu0 %v2755_v4, %s2825_s25  ;;  %v2777_v41 = vld [vmem:[%s3487_s1 + $0x88] sm:$0xff]   ;;  %v3044_v47 = vld [vmem:[%s3489_s10] ss:$0 sm:$0xff]  ;;  %s2830_s1 = smov 127  }
   0xe   :  { %567 = vrot.lane.b32.xlu1 %v2915_v1, %s2825_s25  ;;  %565 = vrot.lane.b32.xlu0 %v2750_v0, %s2825_s25 }
  0x12   :  { %101 = vrot.lane.b32.xlu1 %v2941_v5, %s2823_s17  ;;  %99 = vrot.lane.b32.xlu0 %v2758_v6, %s2823_s17 }
  0x16   :  { %863 = vperm.xlu1 %2748, %v857_v9  }
  0x74   :  { %v252_v10 = vpop.permute.xlu1 %251  ;;  %v175_v11 = vpop.permute.xlu0 %174 }
  0x78   :  { %v254_v12 = vpop.permute.xlu1 %253  ;;  %v177_v13 = vpop.permute.xlu0 %176 }
  0x79   :  { %v179_v14 = vsel %vm178_vm1, %v175_v11, %v177_v13  ;;  %v255_v15 = vsel %vm103_vm2, %v252_v10, %v254_v12  ;;  %v885_v11 = vld [vmem:[%s3490_s3] sm:$0xff]  ;;  %v886_v12 = vld [vmem:[%s3490_s3 + $0x8] sm:$0xff]  ;;  %v859_v13 = vld [vmem:[%s3488_s2 + $0x10] sm:$0xff] }
  0x7a   :  { %2489 = vmatprep.subr.bf16.mxu0 %v179_v14 }
  0x7b   :  { %2490 = vmatpush3.bf16.msra.mxu0 %v179_v14  ;;  %v860_v14 = vld [vmem:[%s3488_s2 + $0x18] sm:$0xff] }
  0x7c   :  { %2495 = vmatprep.subr.bf16.mxu0 %v255_v15  ;;  %v338_v18 = vpop.permute.xlu1 %337  ;;  %v336_v19 = vpop.permute.xlu0 %335 }
  0x7d   :  { %v340_v20 = vsel %vm339_vm3, %v336_v19, %v338_v18  ;;  %v2827_v18 = vmov 0.0   ;;  %v2828_v19 = vmov 0.0|0.0  }
  0x7e   :  { %2492 = vmatmul.mubr.msk.bf16.vlgmr.msra.gmra.mrb[0].mxu0 %vm106_vm0, %v2760_v16  ;;  %v887_v16 = vld [vmem:[%s3490_s3 + $0x10] sm:$0xff]  ;;  %922 = vst [vmem:[#allocation2 + $0x8] sm:$0xff] %v2827_v18  ;;  %925 = vst [vmem:[#allocation2 + $0x20] sm:$0xff] %v2827_v18 }
  0x7f   :  { %2496 = vmatpush3.bf16.msra.mxu0 %v255_v15  ;;  %2497 = vmatprep.mubr.msk.bf16.mxu0 %vm106_vm0, %v2761_v17  ;;  %v858_v15 = vld [vmem:[%s3488_s2 + $0x8] sm:$0xff]  ;;  %v888_v17 = vld [vmem:[%s3490_s3 + $0x18] sm:$0xff]  ;;  %928 = vst [vmem:[#allocation2 + $0x38] sm:$0xff] %v2827_v18  ;;  %931 = vst [vmem:[#allocation2 + $0x50] sm:$0xff] %v2827_v18  ;;  %s2829_s2 = smov 5  }
  0x80   :  { %2501 = vmatprep.subr.bf16.mxu0 %v340_v20  ;;  %v568_v21 = vpop.permute.xlu1 %567  ;;  %v566_v22 = vpop.permute.xlu0 %565 }
  0x81   :  { %v569_v34 = vsel %vm339_vm3, %v566_v22, %v568_v21 }
  0x84   :  { %v102_v23 = vpop.permute.xlu1 %101  ;;  %v100_v24 = vpop.permute.xlu0 %99 }
  0x85   :  { %v104_v25 = vsel %vm103_vm2, %v100_v24, %v102_v23 }
  0x86   :  { %2483 = vmatprep.subr.bf16.mxu1 %v104_v25 }
  0x87   :  { %2484 = vmatpush3.bf16.msra.mxu1 %v104_v25 }
  0x8a   :  { %2498 = vmatmul.mubr.msk.bf16.vlgmr.msra.gmra.mrb[0].mxu0 %vm106_vm0, %v2762_v26  ;;  %2486 = vmatmul.mubr.msk.bf16.vlgmr.msra.gmra.mrb[0].mxu1 %vm106_vm0, %v2775_v27 }
  0x8b   :  { %2502 = vmatpush3.bf16.msra.mxu0 %v340_v20  ;;  %2503 = vmatprep.mubr.msk.bf16.mxu0 %vm106_vm0, %v2763_v28 }
  0x8c   :  { %2507 = vmatprep.subr.bf16.mxu0 %v2983_v29 }
  0x95   :  { %v864_v20 = vpop.permute.xlu1 %863 }
  0x96   :  { %2504 = vmatmul.mubr.msk.bf16.vlgmr.msra.gmra.mrb[0].mxu0 %vm106_vm0, %v2764_v30 }
  0x97   :  { %2508 = vmatpush3.bf16.msra.mxu0 %v2983_v29  ;;  %2509 = vmatprep.mubr.msk.bf16.mxu0 %vm106_vm0, %v2766_v31 }
  0x98   :  { %2513 = vmatprep.subr.bf16.mxu0 %v2922_v2 }
  0xa2   :  { %2510 = vmatmul.mubr.msk.bf16.vlgmr.msra.gmra.mrb[0].mxu0 %vm106_vm0, %v2767_v32 }
  0xa3   :  { %2514 = vmatpush3.bf16.msra.mxu0 %v2922_v2  ;;  %2515 = vmatprep.mubr.msk.bf16.mxu0 %vm106_vm0, %v2768_v33 }
  0xa4   :  { %2519 = vmatprep.subr.bf16.mxu0 %v569_v34 }
  0xae   :  { %2516 = vmatmul.mubr.msk.bf16.vlgmr.msra.gmra.mrb[0].mxu0 %vm106_vm0, %v2769_v35 }
  0xaf   :  { %2520 = vmatpush3.bf16.msra.mxu0 %v569_v34  ;;  %2521 = vmatprep.mubr.msk.bf16.mxu0 %vm106_vm0, %v2770_v36 }
  0xb0   :  { %2525 = vmatprep.subr.bf16.mxu0 %v2941_v5 }
  0xba   :  { %2522 = vmatmul.mubr.msk.bf16.vlgmr.msra.gmra.mrb[0].mxu0 %vm106_vm0, %v2771_v37 }
  0xbb   :  { %2526 = vmatpush3.bf16.msra.mxu0 %v2941_v5  ;;  %2527 = vmatprep.mubr.msk.bf16.mxu0 %vm106_vm0, %v2772_v38 }
  0xbc   :  { %2531 = vmatprep.subr.bf16.mxu0 %v2915_v1 }
  0xc6   :  { %2528 = vmatmul.mubr.msk.bf16.vlgmr.msra.gmra.mrb[0].mxu0 %vm106_vm0, %v2773_v39 }
  0xc7   :  { %2532 = vmatpush3.bf16.msra.mxu0 %v2915_v1  ;;  %2533 = vmatprep.mubr.msk.bf16.mxu0 %vm106_vm0, %v2776_v40 }
  0xd2   :  { %2534 = vmatmul.mubr.msk.bf16.vlgmr.msra.gmra.mrb[0].mxu0 %vm106_vm0, %v2777_v41 }
 0x15d   :  { %v2487_v42 = vpop.f32.mrb[0].mxu1 }
 0x15e   :  { %v147_v43 = vpop.f32.mrb[1].mxu1 }
 0x15f   :  { %v2488_v44 = vpop.f32.mrb[2].mxu1 }
 0x160   :  { %v150_v45 = vpop.f32.mrb[3].mxu1 }
 0x1a5   :  { %v2535_v46 = vpop.f32.mrb[0].mxu0 }
 0x1a6   :  { %v3046_v48 = vadd.f32 %v2535_v46, %v2487_v42  ;;  %v759_v49 = vpop.f32.mrb[1].mxu0 }
 0x1a7   :  { %v3048_v50 = vadd.f32 %v759_v49, %v147_v43  ;;  %v2536_v51 = vpop.f32.mrb[2].mxu0 }
 0x1a8   :  { %v3050_v52 = vadd.f32 %v2536_v51, %v2488_v44  ;;  %v762_v53 = vpop.f32.mrb[3].mxu0  ;;  %v786_v54 = vmul.f32 %v3046_v48, %v3044_v47  ;;  %v803_v55 = vmul.f32 %v3046_v48, %v3046_v48 }
 0x1a9   :  { %v3056_v56 = vadd.f32 %v762_v53, %v150_v45  ;;  %v784_v57 = vmul.f32 %v3048_v50, %v3044_v47  ;;  %v801_v62 = vmul.f32 %v3048_v50, %v3048_v50 }
 0x1aa   :  { %v795_v58 = vsel %vm788_vm4, %v786_v54, 0.0  ;;  %v807_v59 = vmul.f32 %v3044_v47, %v803_v55  ;;  %v787_v61 = vmul.f32 %v3050_v52, %v3044_v47  ;;  %v804_v3 = vmul.f32 %v3050_v52, %v3050_v52 }
 0x1ab   :  { %796 = vadd.xlane.f32.xlu1 %v795_v58  ;;  %v789_v60 = vsel %vm788_vm4, %v784_v57, 0.0  ;;  %v785_v0 = vmul.f32 %v3056_v56, %v3044_v47  ;;  %v805_v2 = vmul.f32 %v3044_v47, %v801_v62  ;;  %v802_v7 = vmul.f32 %v3056_v56, %v3056_v56 }
 0x1ac   :  { %790 = vadd.xlane.f32.xlu0 %v789_v60  ;;  %v815_v63 = vsel %vm788_vm4, %v807_v59, 0.0  ;;  %v798_v1 = vsel %vm788_vm4, %v787_v61, 0.0  ;;  %v808_v6 = vmul.f32 %v3044_v47, %v804_v3 }
 0x1ad   :  { %v792_v4 = vsel %vm788_vm4, %v785_v0, 0.0  ;;  %v809_v5 = vsel %vm788_vm4, %v805_v2, 0.0  ;;  %v806_v9 = vmul.f32 %v3044_v47, %v802_v7 }
 0x1ae   :  { %v818_v8 = vsel %vm788_vm4, %v808_v6, 0.0 }
 0x1af   :  { %816 = vadd.xlane.f32.xlu1 %v815_v63  ;;  %v812_v10 = vsel %vm788_vm4, %v806_v9, 0.0 }
 0x1b0   :  { %799 = vadd.xlane.f32.xlu0 %v798_v1 }
 0x1b3   :  { %793 = vadd.xlane.f32.xlu1 %v792_v4 }
 0x1b4   :  { %810 = vadd.xlane.f32.xlu0 %v809_v5 }
 0x1b8   :  { %819 = vadd.xlane.f32.xlu0 %v818_v8 }
 0x1bc   :  { %813 = vadd.xlane.f32.xlu0 %v812_v10 }
 0x1c4   :  { %891 = vperm.xlu1 %2748, %v885_v11  }
 0x1c8   :  { %896 = vperm.xlu1 %2748, %v886_v12  }
 0x1cc   :  { %873 = vperm.xlu1 %2748, %v859_v13  }
 0x1d0   :  { %878 = vperm.xlu1 %2748, %v860_v14  }
 0x1d2   :  { %868 = vperm.xlu0 %2749, %v858_v15  }
 0x1d4   :  { %901 = vperm.xlu1 %2748, %v887_v16  }
 0x1d6   :  { %1054 = vrot.lane.b32.xlu0 %v2828_v19, %s2824_s18 }
 0x1d8   :  { %906 = vperm.xlu1 %2748, %v888_v17  }
 0x1da   :  { %1132 = vrot.lane.b32.xlu0 %v2828_v19, %s2829_s2 }
 0x1dc   :  { %1050 = vrot.lane.b32.xlu1 %v2828_v19, %s2824_s18 }
 0x1de   :  { %1136 = vrot.lane.b32.xlu0 %v2828_v19, %s2829_s2 }
 0x1e2   :  { %1219 = vrot.lane.b32.xlu0 %v2828_v19, %s2825_s25 }
 0x1e6   :  { %1223 = vrot.lane.b32.xlu0 %v2828_v19, %s2825_s25 }
 0x238   :  { %v797_v21 = vpop.xlane.xlu1 %796 }
 0x239   :  { %v823_v22 = vmul.f32 0.03125, %v797_v21  ;;  %v791_v23 = vpop.xlane.xlu0 %790 }
 0x23a   :  { %v821_v28 = vmul.f32 0.03125, %v791_v23 }
 0x23b   :  { %v831_v25 = vmul.f32 %v823_v22, %v823_v22  ;;  %v843_v60 = vsub.f32 %v3046_v48, %v823_v22 }
 0x23c   :  { %v817_v24 = vpop.xlane.xlu1 %816  ;;  %v829_v34 = vmul.f32 %v821_v28, %v821_v28  ;;  %v841_v3 = vsub.f32 %v3048_v50, %v821_v28 }
 0x23d   :  { %v827_v26 = vmul.f32 0.03125, %v817_v24  ;;  %v800_v27 = vpop.xlane.xlu0 %799 }
 0x23e   :  { %v824_v35 = vmul.f32 0.03125, %v800_v27  ;;  %v2778_v27 = vld [vmem:[%s3491_s4] sm:$0xff]  }
 0x23f   :  { %v835_v30 = vsub.f32 %v827_v26, %v831_v25  ;;  %2549 = vmatprep.mubr.msk.bf16.mxu1 %vm984_vm5, %v2778_v27 }
 0x240   :  { %v794_v31 = vpop.xlane.xlu1 %793  ;;  %v832_v41 = vmul.f32 %v824_v35, %v824_v35  ;;  %v844_v8 = vsub.f32 %v3050_v52, %v824_v35  ;;  %v1957_v35 = vld [vmem:[%s3492_s8] sm:$0xff] }
 0x241   :  { %v839_v32 = vmax.f32 %v835_v30, 0.0  ;;  %v811_v33 = vpop.xlane.xlu0 %810  ;;  %v822_v42 = vmul.f32 0.03125, %v794_v31 }
 0x242   :  { %v825_v36 = vmul.f32 0.03125, %v811_v33 }
 0x243   :  { %v847_v37 = vadd.f32 1e-05, %v839_v32  ;;  %v830_v53 = vmul.f32 %v822_v42, %v822_v42  ;;  %v842_v14 = vsub.f32 %v3056_v56, %v822_v42  ;;  %v1985_v42 = vld [vmem:[%s3496_s9] sm:$0xff] }
 0x244   :  { %v833_v38 = vsub.f32 %v825_v36, %v829_v34  ;;  %v892_v39 = vpop.permute.xlu1 %891  ;;  %v1785_v36 = vld [vmem:[%s3493_s6 + $0x8] sm:$0xff] }
 0x245   :  { %2798 = vrsqrt.f32 %v847_v37  ;;  %v820_v40 = vpop.xlane.xlu0 %819  ;;  %v2784_v37 = vld [vmem:[%s3491_s4 + $0x10] sm:$0xff]  }
 0x246   :  { %v837_v43 = vmax.f32 %v833_v38, 0.0  ;;  %v828_v44 = vmul.f32 0.03125, %v820_v40  ;;  %v1758_v38 = vld [vmem:[%s3494_s5 + $0x10] sm:$0xff]  ;;  %2541 = vmatprep.mubr.msk.bf16.mxu0 %vm984_vm5, %v2784_v37  ;;  %v1757_v40 = vld [vmem:[%s3494_s5 + $0x8] sm:$0xff] }
 0x248   :  { %v845_v45 = vadd.f32 1e-05, %v837_v43  ;;  %v836_v46 = vsub.f32 %v828_v44, %v832_v41  ;;  %v897_v49 = vpop.permute.xlu1 %896  ;;  %v1958_v41 = vld [vmem:[%s3492_s8 + $0x8] sm:$0xff]  ;;  %v1959_v44 = vld [vmem:[%s3492_s8 + $0x10] sm:$0xff] }
 0x249   :  { %v814_v51 = vpop.xlane.xlu0 %813  ;;  %v1986_v43 = vld [vmem:[%s3496_s9 + $0x8] sm:$0xff] }
 0x24a   :  { %2800 = vrsqrt.f32 %v845_v45  ;;  %v840_v54 = vmax.f32 %v836_v46, 0.0  ;;  %v826_v55 = vmul.f32 0.03125, %v814_v51 }
 0x24c   :  { %v848_v57 = vadd.f32 1e-05, %v840_v54  ;;  %v834_v58 = vsub.f32 %v826_v55, %v830_v53  ;;  %v874_v59 = vpop.permute.xlu1 %873 }
 0x24e   :  { %2802 = vrsqrt.f32 %v848_v57  ;;  %v838_v61 = vmax.f32 %v834_v58, 0.0 }
 0x24f   :  { %v2799_v62 = vpop.eup %2798 }
 0x250   :  { %v846_v63 = vadd.f32 1e-05, %v838_v61  ;;  %v855_v0 = vmul.f32 %v2799_v62, %v843_v60  ;;  %v879_v1 = vpop.permute.xlu1 %878  ;;  %v2780_v60 = vld [vmem:[%s3491_s4 + $0x20] sm:$0xff]  }
 0x251   :  { %v869_v18 = vpop.permute.xlu0 %868 }
 0x252   :  { %2804 = vrsqrt.f32 %v846_v63  ;;  %v883_v2 = vmul.f32 %v874_v59, %v855_v0  ;;  %v2779_v59 = vld [vmem:[%s3491_s4 + $0x8] sm:$0xff]  }
 0x254   :  { %v2801_v4 = vpop.eup %2800  ;;  %v902_v5 = vpop.permute.xlu1 %901 }
 0x255   :  { %v853_v6 = vmul.f32 %v2801_v4, %v841_v3  ;;  %v911_v7 = vadd.f32 %v902_v5, %v883_v2  ;;  %v1055_v45 = vpop.permute.xlu0 %1054  ;;  %v2781_v5 = vld [vmem:[%s3491_s4 + $0x28] sm:$0xff]  }
 0x257   :  { %v881_v9 = vmul.f32 %v864_v20, %v853_v6  ;;  %v915_v10 = vmax.f32 %v911_v7, 0.0  ;;  %v2782_v6 = vld [vmem:[%s3491_s4 + $0x30] sm:$0xff]  }
 0x258   :  { %v2803_v11 = vpop.eup %2802  ;;  %v907_v17 = vpop.permute.xlu1 %906 }
 0x259   :  { %v909_v48 = vadd.f32 %v892_v39, %v881_v9  ;;  %v856_v12 = vmul.f32 %v2803_v11, %v844_v8  ;;  %v919_v13 = vmul.f32 %v3044_v47, %v915_v10  ;;  %v1756_v39 = vld [vmem:[%s3494_s5] sm:$0xff]  ;;  %v1133_v46 = vpop.permute.xlu0 %1132 }
 0x25b   :  { %v913_v15 = vmax.f32 %v909_v48, 0.0  ;;  %v884_v16 = vmul.f32 %v879_v1, %v856_v12  ;;  %935 = vst.msk [vmem:[#allocation2 + $0x38] sm:$0xff] %vm788_vm4, %v919_v13  ;;  %v2783_v12 = vld [vmem:[%s3491_s4 + $0x38] sm:$0xff]   ;;  %v2785_v13 = vld [vmem:[%s3491_s4 + $0x40] sm:$0xff]  }
 0x25c   :  { %v2805_v50 = vpop.eup %2804 }
 0x25d   :  { %v917_v21 = vmul.f32 %v3044_v47, %v913_v15  ;;  %v912_v22 = vadd.f32 %v907_v17, %v884_v16  ;;  %v854_v52 = vmul.f32 %v2805_v50, %v842_v14  ;;  %v1137_v51 = vpop.permute.xlu0 %1136 }
 0x25f   :  { %933 = vst.msk [vmem:[#allocation2 + $0x8] sm:$0xff] %vm788_vm4, %v917_v21  ;;  %v916_v20 = vmax.f32 %v912_v22, 0.0  ;;  %v882_v23 = vmul.f32 %v869_v18, %v854_v52  ;;  %v2786_v22 = vld [vmem:[%s3491_s4 + $0x18] sm:$0xff]   ;;  %v2787_v52 = vld [vmem:[%s3491_s4 + $0x48] sm:$0xff]  }
 0x261   :  { %v920_v24 = vmul.f32 %v3044_v47, %v916_v20  ;;  %v910_v25 = vadd.f32 %v897_v49, %v882_v23  ;;  %v1051_v49 = vpop.permute.xlu1 %1050  ;;  %v1220_v55 = vpop.permute.xlu0 %1219  ;;  %v2788_v20 = vld [vmem:[%s3495_s7] sm:$0xff]   ;;  %v2790_v23 = vld [vmem:[%s3491_s4 + $0x50] sm:$0xff]  }
 0x262   :  { %v942_v33 = vld [vmem:[#allocation2 + $0x38] sm:$0xff] }
 0x263   :  { %936 = vst.msk [vmem:[#allocation2 + $0x50] sm:$0xff] %vm788_vm4, %v920_v24  ;;  %v914_v56 = vmax.f32 %v910_v25, 0.0  ;;  %v2789_v24 = vld [vmem:[%s3495_s7 + $0x8] sm:$0xff]   ;;  %v2791_v25 = vld [vmem:[%s3491_s4 + $0x58] sm:$0xff]  }
 0x265   :  { %v918_v26 = vmul.f32 %v3044_v47, %v914_v56  ;;  %v1224_v63 = vpop.permute.xlu0 %1223  ;;  %v2793_v56 = vld [vmem:[%s3491_s4 + $0x68] sm:$0xff]  }
 0x266   :  { %v938_v28 = vld [vmem:[#allocation2 + $0x8] sm:$0xff] }
 0x267   :  { %934 = vst.msk [vmem:[#allocation2 + $0x20] sm:$0xff] %vm788_vm4, %v918_v26  ;;  %v2794_v26 = vld [vmem:[%s3491_s4 + $0x70] sm:$0xff]  }
 0x26a   :  { %v944_v30 = vld [vmem:[#allocation2 + $0x50] sm:$0xff] }
 0x26b   :  { %v3136_v34 = vpack.c.bf16 %v944_v30, %v942_v33  ;;  %v2796_v30 = vld [vmem:[%s3491_s4 + $0x80] sm:$0xff]  }
 0x26e   :  { %v940_v31 = vld [vmem:[#allocation2 + $0x20] sm:$0xff] }
 0x26f   :  { %v3131_v32 = vpack.c.bf16 %v940_v31, %v938_v28  ;;  %v2795_v28 = vld [vmem:[%s3491_s4 + $0x78] sm:$0xff]  }
 0x271   :  { %1379 = vrot.lane.b32.xlu0 %v3131_v32, %s2830_s1  ;;  %1052 = vrot.lane.b32.xlu1 %v3131_v32, %s2824_s18 }
 0x275   :  { %1459 = vrot.lane.b32.xlu0 %v3131_v32, %s2831_s29  ;;  %1056 = vrot.lane.b32.xlu1 %v3136_v34, %s2824_s18 }
 0x279   :  { %1539 = vrot.lane.b32.xlu0 %v3131_v32, %s2832_s30  ;;  %1134 = vrot.lane.b32.xlu1 %v3131_v32, %s2829_s2 }
 0x27d   :  { %972 = vrot.lane.b32.xlu0 %v2828_v19, %s2823_s17  ;;  %1138 = vrot.lane.b32.xlu1 %v3136_v34, %s2829_s2 }
 0x281   :  { %976 = vrot.lane.b32.xlu0 %v2828_v19, %s2823_s17  ;;  %1221 = vrot.lane.b32.xlu1 %v3131_v32, %s2825_s25  ;;  %v1784_v19 = vld [vmem:[%s3493_s6] sm:$0xff] }
 0x285   :  { %1619 = vrot.lane.b32.xlu0 %v3131_v32, %s2833_s15  ;;  %1225 = vrot.lane.b32.xlu1 %v3136_v34, %s2825_s25 }
 0x289   :  { %1963 = vperm.xlu0 %2749, %v1957_v35   ;;  %1381 = vrot.lane.b32.xlu1 %v3136_v34, %s2830_s1 }
 0x28d   :  { %1790 = vperm.xlu0 %2749, %v1784_v19   ;;  %1461 = vrot.lane.b32.xlu1 %v3136_v34, %s2831_s29 }
 0x291   :  { %1795 = vperm.xlu0 %2749, %v1785_v36   ;;  %1541 = vrot.lane.b32.xlu1 %v3136_v34, %s2832_s30 }
 0x295   :  { %1772 = vperm.xlu0 %2749, %v1758_v38   ;;  %974 = vrot.lane.b32.xlu1 %v3131_v32, %s2823_s17 }
 0x299   :  { %978 = vrot.lane.b32.xlu1 %v3136_v34, %s2823_s17 }
 0x29d   :  { %1621 = vrot.lane.b32.xlu1 %v3136_v34, %s2833_s15 }
 0x2a1   :  { %1762 = vperm.xlu1 %2748, %v1756_v39  }
 0x2a5   :  { %1767 = vperm.xlu1 %2748, %v1757_v40  }
 0x2a9   :  { %1968 = vperm.xlu1 %2748, %v1958_v41  }
 0x2ad   :  { %1991 = vperm.xlu1 %2748, %v1985_v42  }
 0x2b1   :  { %1996 = vperm.xlu1 %2748, %v1986_v43  }
 0x2b5   :  { %1973 = vperm.xlu1 %2748, %v1959_v44  }
 0x2e3   :  { %v1053_v53 = vpop.permute.xlu1 %1052  ;;  %v1380_v2 = vpop.permute.xlu0 %1379 }
 0x2e4   :  { %v1058_v54 = vsel %vm178_vm1, %v1051_v49, %v1053_v53 }
 0x2e5   :  { %2545 = vmatprep.subr.bf16.mxu1 %v1058_v54 }
 0x2e6   :  { %2546 = vmatpush3.bf16.msra.mxu1 %v1058_v54 }
 0x2e7   :  { %v1057_v57 = vpop.permute.xlu1 %1056  ;;  %v1460_v9 = vpop.permute.xlu0 %1459 }
 0x2e8   :  { %v1059_v58 = vsel %vm178_vm1, %v1055_v45, %v1057_v57 }
 0x2e9   :  { %2547 = vmatprep.subr.bf16.mxu1 %v1059_v58 }
 0x2ea   :  { %2548 = vmatpush3.bf16.msra.mxu1 %v1059_v58 }
 0x2eb   :  { %v1135_v61 = vpop.permute.xlu1 %1134  ;;  %v1540_v11 = vpop.permute.xlu0 %1539 }
 0x2ec   :  { %v1141_v62 = vsel %vm1140_vm6, %v1133_v46, %v1135_v61 }
 0x2ed   :  { %2550 = vmatmul.mubr.msk.bf16.vlgmr.msra.gmra.mrb[4].mxu1 %vm984_vm5, %v2779_v59  ;;  %2553 = vmatprep.subr.bf16.mxu1 %v1141_v62 }
 0x2ee   :  { %2554 = vmatpush3.bf16.msra.mxu1 %v1141_v62  ;;  %2557 = vmatprep.mubr.msk.bf16.mxu1 %vm984_vm5, %v2780_v60 }
 0x2ef   :  { %v1139_v0 = vpop.permute.xlu1 %1138  ;;  %v973_v15 = vpop.permute.xlu0 %972 }
 0x2f0   :  { %v1142_v1 = vsel %vm1140_vm6, %v1137_v51, %v1139_v0 }
 0x2f1   :  { %2555 = vmatprep.subr.bf16.mxu1 %v1142_v1 }
 0x2f2   :  { %2556 = vmatpush3.bf16.msra.mxu1 %v1142_v1 }
 0x2f3   :  { %v1222_v3 = vpop.permute.xlu1 %1221  ;;  %v977_v17 = vpop.permute.xlu0 %976 }
 0x2f4   :  { %v1227_v4 = vsel %vm339_vm3, %v1220_v55, %v1222_v3 }
 0x2f5   :  { %2561 = vmatprep.subr.bf16.mxu1 %v1227_v4 }
 0x2f7   :  { %v1226_v7 = vpop.permute.xlu1 %1225  ;;  %v1620_v27 = vpop.permute.xlu0 %1619 }
 0x2f8   :  { %v1228_v8 = vsel %vm339_vm3, %v1224_v63, %v1226_v7 }
 0x2f9   :  { %2558 = vmatmul.mubr.msk.bf16.vlgmr.msra.gmra.mrb[4].mxu1 %vm984_vm5, %v2781_v5 }
 0x2fa   :  { %2562 = vmatpush3.bf16.msra.mxu1 %v1227_v4  ;;  %2565 = vmatprep.mubr.msk.bf16.mxu1 %vm984_vm5, %v2782_v6 }
 0x2fb   :  { %2563 = vmatprep.subr.bf16.mxu1 %v1228_v8  ;;  %v1382_v10 = vpop.permute.xlu1 %1381 }
 0x2fe   :  { %2564 = vmatpush3.bf16.msra.mxu1 %v1228_v8 }
 0x2ff   :  { %2569 = vmatprep.subr.bf16.mxu1 %v3131_v32  ;;  %v1462_v48 = vpop.permute.xlu1 %1461 }
 0x303   :  { %v1542_v14 = vpop.permute.xlu1 %1541 }
 0x305   :  { %2566 = vmatmul.mubr.msk.bf16.vlgmr.msra.gmra.mrb[4].mxu1 %vm984_vm5, %v2783_v12 }
 0x306   :  { %2570 = vmatpush3.bf16.msra.mxu1 %v3131_v32  ;;  %2573 = vmatprep.mubr.msk.bf16.mxu1 %vm984_vm5, %v2785_v13  ;;  %v2797_v32 = vld [vmem:[%s3491_s4 + $0x88] sm:$0xff]  }
 0x307   :  { %2571 = vmatprep.subr.bf16.mxu1 %v3136_v34  ;;  %v975_v16 = vpop.permute.xlu1 %974 }
 0x308   :  { %v980_v50 = vsel %vm103_vm2, %v973_v15, %v975_v16 }
 0x309   :  { %2537 = vmatprep.subr.bf16.mxu0 %v980_v50 }
 0x30a   :  { %2572 = vmatpush3.bf16.msra.mxu1 %v3136_v34  ;;  %2538 = vmatpush3.bf16.msra.mxu0 %v980_v50 }
 0x30b   :  { %2577 = vmatprep.subr.bf16.mxu1 %v1380_v2  ;;  %v979_v18 = vpop.permute.xlu1 %978 }
 0x30c   :  { %v981_v21 = vsel %vm103_vm2, %v977_v17, %v979_v18  ;;  %v1960_v18 = vld [vmem:[%s3492_s8 + $0x18] sm:$0xff] }
 0x30d   :  { %2539 = vmatprep.subr.bf16.mxu0 %v981_v21 }
 0x30e   :  { %2540 = vmatpush3.bf16.msra.mxu0 %v981_v21  ;;  %v1759_v21 = vld [vmem:[%s3494_s5 + $0x18] sm:$0xff] }
 0x30f   :  { %2609 = vmatprep.subr.bf16.mxu0 %v2983_v29  ;;  %v1622_v31 = vpop.permute.xlu1 %1621 }
 0x311   :  { %2542 = vmatmul.mubr.msk.bf16.vlgmr.msra.gmra.mrb[4].mxu0 %vm984_vm5, %v2786_v22  ;;  %2574 = vmatmul.mubr.msk.bf16.vlgmr.msra.gmra.mrb[4].mxu1 %vm984_vm5, %v2787_v52  ;;  %v1987_v22 = vld [vmem:[%s3496_s9 + $0x10] sm:$0xff] }
 0x312   :  { %2578 = vmatpush3.bf16.msra.mxu1 %v1380_v2  ;;  %2610 = vmatpush3.bf16.msra.mxu0 %v2983_v29  ;;  %v2792_v29 = vld [vmem:[%s3491_s4 + $0x60] sm:$0xff]   ;;  %v1786_v52 = vld [vmem:[%s3493_s6 + $0x10] sm:$0xff] }
 0x313   :  { %2579 = vmatprep.subr.bf16.mxu1 %v1382_v10  ;;  %2611 = vmatprep.mubr.msk.bf16.mxu0 %vm106_vm0, %v2788_v20  ;;  %v1787_v20 = vld [vmem:[%s3493_s6 + $0x18] sm:$0xff] }
 0x314   :  { %2581 = vmatprep.mubr.msk.bf16.mxu1 %vm984_vm5, %v2790_v23  ;;  %v2137_v23 = vld [vmem:[%s3497_s13] sm:$0xff] }
 0x316   :  { %2580 = vmatpush3.bf16.msra.mxu1 %v1382_v10 }
 0x317   :  { %2585 = vmatprep.subr.bf16.mxu1 %v1460_v9 }
 0x319   :  { %2612 = vmatmul.mubr.msk.bf16.vlgmr.msra.gmra.mrb[8].mxu0 %vm106_vm0, %v2789_v24 }
 0x31d   :  { %2582 = vmatmul.mubr.msk.bf16.vlgmr.msra.gmra.mrb[4].mxu1 %vm984_vm5, %v2791_v25 }
 0x31e   :  { %2586 = vmatpush3.bf16.msra.mxu1 %v1460_v9  ;;  %2589 = vmatprep.mubr.msk.bf16.mxu1 %vm984_vm5, %v2792_v29 }
 0x31f   :  { %2587 = vmatprep.subr.bf16.mxu1 %v1462_v48 }
 0x322   :  { %2588 = vmatpush3.bf16.msra.mxu1 %v1462_v48 }
 0x323   :  { %2593 = vmatprep.subr.bf16.mxu1 %v1540_v11 }
 0x329   :  { %2590 = vmatmul.mubr.msk.bf16.vlgmr.msra.gmra.mrb[4].mxu1 %vm984_vm5, %v2793_v56 }
 0x32a   :  { %2594 = vmatpush3.bf16.msra.mxu1 %v1540_v11  ;;  %2597 = vmatprep.mubr.msk.bf16.mxu1 %vm984_vm5, %v2794_v26 }
 0x32b   :  { %2595 = vmatprep.subr.bf16.mxu1 %v1542_v14 }
 0x32e   :  { %2596 = vmatpush3.bf16.msra.mxu1 %v1542_v14 }
 0x32f   :  { %2601 = vmatprep.subr.bf16.mxu1 %v1620_v27 }
 0x335   :  { %2598 = vmatmul.mubr.msk.bf16.vlgmr.msra.gmra.mrb[4].mxu1 %vm984_vm5, %v2795_v28 }
 0x336   :  { %2602 = vmatpush3.bf16.msra.mxu1 %v1620_v27  ;;  %2605 = vmatprep.mubr.msk.bf16.mxu1 %vm984_vm5, %v2796_v30 }
 0x337   :  { %2603 = vmatprep.subr.bf16.mxu1 %v1622_v31 }
 0x33a   :  { %2604 = vmatpush3.bf16.msra.mxu1 %v1622_v31 }
 0x341   :  { %2606 = vmatmul.mubr.msk.bf16.vlgmr.msra.gmra.mrb[4].mxu1 %vm984_vm5, %v2797_v32  ;;  %v3371_v32 = vpop.permute.xlu1 %1762 }
 0x3e4   :  { %v2543_v33 = vpop.f32.mrb[4].mxu0 }
 0x3e5   :  { %v1025_v34 = vpop.f32.mrb[5].mxu0 }
 0x3e6   :  { %v2544_v35 = vpop.f32.mrb[6].mxu0 }
 0x3e7   :  { %v1028_v19 = vpop.f32.mrb[7].mxu0 }
 0x3ec   :  { %v3281_v36 = vpop.f32.mrb[8].mxu0 }
 0x3ed   :  { %v1903_v37 = vmul.f32 %v3281_v36, %v3281_v36  ;;  %v3285_v38 = vpop.f32.mrb[9].mxu0  ;;  %v1887_v39 = vmul.f32 %v3281_v36, %v3044_v47 }
 0x3ee   :  { %v3289_v40 = vpop.f32.mrb[10].mxu0  ;;  %v1885_v41 = vmul.f32 %v3044_v47, %v3285_v38  ;;  %v1901_v51 = vmul.f32 %v3285_v38, %v3285_v38 }
 0x3ef   :  { %v1895_v42 = vsel %vm788_vm4, %v1887_v39, 0.0  ;;  %v1888_v43 = vmul.f32 %v3289_v40, %v3044_v47  ;;  %v3296_v44 = vpop.f32.mrb[11].mxu0  ;;  %v1907_v49 = vmul.f32 %v3044_v47, %v1903_v37  ;;  %v1904_v55 = vmul.f32 %v3289_v40, %v3289_v40  ;;  %v1988_v37 = vld [vmem:[%s3496_s9 + $0x18] sm:$0xff] }
 0x3f0   :  { %1896 = vadd.xlane.f32.xlu0 %v1895_v42  ;;  %v1889_v45 = vsel %vm788_vm4, %v1885_v41, 0.0  ;;  %v1886_v54 = vmul.f32 %v3044_v47, %v3296_v44  ;;  %v1905_v58 = vmul.f32 %v3044_v47, %v1901_v51  ;;  %v1902_v59 = vmul.f32 %v3296_v44, %v3296_v44 }
 0x3f1   :  { %1890 = vadd.xlane.f32.xlu1 %v1889_v45  ;;  %v1898_v46 = vsel %vm788_vm4, %v1888_v43, 0.0  ;;  %v1915_v53 = vsel %vm788_vm4, %v1907_v49, 0.0  ;;  %v1908_v61 = vmul.f32 %v3044_v47, %v1904_v55  ;;  %v2030_v49 = vld [vmem:[%s3498_s11 + $0x8] sm:$0xff]  ;;  %v2032_v55 = vld [vmem:[%s3498_s11 + $0x18] sm:$0xff] }
 0x3f2   :  { %v1892_v57 = vsel %vm788_vm4, %v1886_v54, 0.0  ;;  %v1909_v60 = vsel %vm788_vm4, %v1905_v58, 0.0  ;;  %v1906_v63 = vmul.f32 %v3044_v47, %v1902_v59  ;;  %v2031_v54 = vld [vmem:[%s3498_s11 + $0x10] sm:$0xff] }
 0x3f3   :  { %v1918_v62 = vsel %vm788_vm4, %v1908_v61, 0.0  ;;  %v2654_v58 = vpack.c.bf16 %v2032_v55, %v2031_v54  ;;  %v2034_v61 = vld [vmem:[%s3498_s11 + $0x28] sm:$0xff] }
 0x3f4   :  { %1899 = vadd.xlane.f32.xlu0 %v1898_v46  ;;  %v1912_v0 = vsel %vm788_vm4, %v1906_v63, 0.0  ;;  %v2029_v46 = vld [vmem:[%s3498_s11] sm:$0xff] }
 0x3f5   :  { %v2650_v51 = vpack.c.bf16 %v2030_v49, %v2029_v46 }
 0x3f7   :  { %2651 = vmatprep.subr.bf16.mxu1 %v2650_v51 }
 0x3f8   :  { %1916 = vadd.xlane.f32.xlu0 %v1915_v53  ;;  %2653 = vmatpush3.bf16.msra.mxu1 %v2650_v51 }
 0x3f9   :  { %2655 = vmatprep.subr.bf16.mxu1 %v2654_v58 }
 0x3fc   :  { %1893 = vadd.xlane.f32.xlu0 %v1892_v57  ;;  %2657 = vmatpush3.bf16.msra.mxu1 %v2654_v58 }
 0x400   :  { %1910 = vadd.xlane.f32.xlu0 %v1909_v60  ;;  %v2033_v60 = vld [vmem:[%s3498_s11 + $0x20] sm:$0xff] }
 0x401   :  { %v2658_v63 = vpack.c.bf16 %v2034_v61, %v2033_v60 }
 0x403   :  { %2659 = vmatprep.subr.bf16.mxu1 %v2658_v63 }
 0x404   :  { %1919 = vadd.xlane.f32.xlu0 %v1918_v62  ;;  %2661 = vmatpush3.bf16.msra.mxu1 %v2658_v63 }
 0x408   :  { %1913 = vadd.xlane.f32.xlu0 %v1912_v0 }
 0x414   :  { %v2607_v1 = vpop.f32.mrb[4].mxu1 }
 0x415   :  { %v3317_v2 = vadd.f32 %v2607_v1, %v2543_v33  ;;  %v1665_v3 = vpop.f32.mrb[5].mxu1  ;;  %v1964_v33 = vpop.permute.xlu0 %1963 }
 0x416   :  { %v3319_v4 = vadd.f32 %v1665_v3, %v1025_v34  ;;  %v2608_v5 = vpop.f32.mrb[6].mxu1  ;;  %v3373_v34 = vpop.permute.xlu1 %1767  ;;  %v2035_v3 = vld [vmem:[%s3498_s11 + $0x30] sm:$0xff] }
 0x417   :  { %v3321_v6 = vadd.f32 %v2608_v5, %v2544_v35  ;;  %v1668_v7 = vpop.f32.mrb[7].mxu1  ;;  %v1686_v8 = vmul.f32 %v3317_v2, %v3044_v47  ;;  %v1702_v12 = vmul.f32 %v3317_v2, %v3317_v2  ;;  %v2036_v5 = vld [vmem:[%s3498_s11 + $0x38] sm:$0xff] }
 0x418   :  { %v3325_v9 = vadd.f32 %v1668_v7, %v1028_v19  ;;  %v1684_v10 = vmul.f32 %v3319_v4, %v3044_v47  ;;  %v1700_v24 = vmul.f32 %v3319_v4, %v3319_v4  ;;  %v2662_v7 = vpack.c.bf16 %v2036_v5, %v2035_v3  ;;  %v3435_v5 = vld [vmem:[%s3489_s10] ss:$0 sm:$0xff] }
 0x419   :  { %v1694_v11 = vsel %vm788_vm4, %v1686_v8, 0.0  ;;  %v1687_v48 = vmul.f32 %v3321_v6, %v3044_v47  ;;  %v1706_v16 = vmul.f32 %v3044_v47, %v1702_v12  ;;  %v1703_v29 = vmul.f32 %v3321_v6, %v3321_v6  ;;  %v3375_v35 = vpop.permute.xlu0 %1790 }
 0x41a   :  { %1695 = vadd.xlane.f32.xlu1 %v1694_v11  ;;  %v1688_v13 = vsel %vm788_vm4, %v1684_v10, 0.0  ;;  %v1685_v14 = vmul.f32 %v3325_v9, %v3044_v47  ;;  %v1704_v25 = vmul.f32 %v3044_v47, %v1700_v24  ;;  %v1701_v27 = vmul.f32 %v3325_v9, %v3325_v9  ;;  %v3377_v19 = vpop.permute.xlu1 %1968  ;;  %v2037_v10 = vld [vmem:[%s3498_s11 + $0x40] sm:$0xff]  ;;  %2663 = vmatprep.subr.bf16.mxu1 %v2662_v7 }
 0x41b   :  { %1689 = vadd.xlane.f32.xlu0 %v1688_v13  ;;  %v1697_v15 = vsel %vm788_vm4, %v1687_v48, 0.0  ;;  %v1714_v17 = vsel %vm788_vm4, %v1706_v16, 0.0  ;;  %v1707_v26 = vmul.f32 %v3044_v47, %v1703_v29  ;;  %2665 = vmatpush3.bf16.msra.mxu1 %v2662_v7 }
 0x41c   :  { %v1691_v50 = vsel %vm788_vm4, %v1685_v14, 0.0  ;;  %v1708_v56 = vsel %vm788_vm4, %v1704_v25, 0.0  ;;  %v1705_v30 = vmul.f32 %v3044_v47, %v1701_v27  ;;  %v2138_v47 = vld [vmem:[%s3497_s13 + $0x8] sm:$0x3]  ;;  %2631 = vmatprep.subr.mxu1 %v2037_v10 }
 0x41d   :  { %v1717_v28 = vsel %vm788_vm4, %v1707_v26, 0.0  ;;  %v3382_v39 = vpop.permute.xlu0 %1795 }
 0x41e   :  { %1698 = vadd.xlane.f32.xlu1 %v1697_v15  ;;  %v1711_v31 = vsel %vm788_vm4, %v1705_v30, 0.0  ;;  %v3387_v41 = vpop.permute.xlu1 %1991 }
 0x41f   :  { %1692 = vadd.xlane.f32.xlu0 %v1691_v50  ;;  %2632 = vmatpush3.msra.mxu1 %v2037_v10 }
 0x421   :  { %v3389_v42 = vpop.permute.xlu0 %1772 }
 0x422   :  { %1715 = vadd.xlane.f32.xlu1 %v1714_v17  ;;  %v3391_v43 = vpop.permute.xlu1 %1996 }
 0x426   :  { %v1974_v57 = vpop.permute.xlu1 %1973 }
 0x433   :  { %1978 = vperm.xlu1 %2748, %v1960_v18  }
 0x435   :  { %1777 = vperm.xlu0 %2749, %v1759_v21  }
 0x437   :  { %2001 = vperm.xlu1 %2748, %v1987_v22  }
 0x439   :  { %1800 = vperm.xlu0 %2749, %v1786_v52  }
 0x43d   :  { %1805 = vperm.xlu0 %2749, %v1787_v20  }
 0x441   :  { %2141 = vperm.xlu0 %2749, %v2137_v23  }
 0x45b   :  { %1709 = vadd.xlane.f32.xlu1 %v1708_v56 }
 0x45f   :  { %1718 = vadd.xlane.f32.xlu1 %v1717_v28 }
 0x463   :  { %1712 = vadd.xlane.f32.xlu1 %v1711_v31 }
 0x474   :  { %2006 = vperm.xlu1 %2748, %v1988_v37  }
 0x478   :  { %2146 = vperm.xlu1 %2748, %v2138_v47  }
 0x47d   :  { %v1897_v45 = vpop.xlane.xlu0 %1896 }
 0x47e   :  { %v1891_v62 = vpop.xlane.xlu1 %1890  ;;  %v1923_v50 = vmul.f32 0.03125, %v1897_v45 }
 0x47f   :  { %v1921_v1 = vmul.f32 0.03125, %v1891_v62 }
 0x480   :  { %v1931_v18 = vmul.f32 %v1923_v50, %v1923_v50  ;;  %v1943_v49 = vsub.f32 %v3281_v36, %v1923_v50 }
 0x481   :  { %v3399_v53 = vpop.xlane.xlu0 %1899  ;;  %v1929_v8 = vmul.f32 %v1921_v1, %v1921_v1  ;;  %v1941_v15 = vsub.f32 %v3285_v38, %v1921_v1 }
 0x485   :  { %v1917_v59 = vpop.xlane.xlu0 %1916 }
 0x486   :  { %v1927_v21 = vmul.f32 0.03125, %v1917_v59 }
 0x488   :  { %v1935_v52 = vsub.f32 %v1927_v21, %v1931_v18 }
 0x489   :  { %v1894_v0 = vpop.xlane.xlu0 %1893 }
 0x48a   :  { %v1939_v23 = vmax.f32 %v1935_v52, 0.0 }
 0x48c   :  { %v1947_v56 = vadd.f32 1e-05, %v1939_v23 }
 0x48d   :  { %v1911_v11 = vpop.xlane.xlu0 %1910 }
 0x48e   :  { %v1925_v48 = vmul.f32 0.03125, %v1911_v11  ;;  %v1924_v11 = vmul.f32 0.03125, %v3399_v53 }
 0x490   :  { %v1933_v12 = vsub.f32 %v1925_v48, %v1929_v8  ;;  %v1932_v48 = vmul.f32 %v1924_v11, %v1924_v11 }
 0x491   :  { %v1920_v25 = vpop.xlane.xlu0 %1919 }
 0x492   :  { %v1937_v13 = vmax.f32 %v1933_v12, 0.0 }
 0x494   :  { %v1945_v14 = vadd.f32 1e-05, %v1937_v13 }
 0x495   :  { %v1914_v30 = vpop.xlane.xlu0 %1913 }
 0x496   :  { %2806 = vrsqrt.f32 %v1945_v14 }
 0x497   :  { %2808 = vrsqrt.f32 %v1947_v56 }
 0x4a0   :  { %v2807_v16 = vpop.eup %2806 }
 0x4a1   :  { %v1953_v17 = vmul.f32 %v2807_v16, %v1941_v15  ;;  %v2809_v45 = vpop.eup %2808 }
 0x4a2   :  { %v1955_v51 = vmul.f32 %v2809_v45, %v1943_v49 }
 0x4a3   :  { %v3423_v22 = vmul.f32 %v1964_v33, %v1953_v17 }
 0x4a4   :  { %v1983_v60 = vmul.f32 %v1974_v57, %v1955_v51  ;;  %v1926_v57 = vmul.f32 0.03125, %v1914_v30 }
 0x4a7   :  { %v1696_v20 = vpop.xlane.xlu1 %1695 }
 0x4a8   :  { %v1722_v29 = vmul.f32 0.03125, %v1696_v20  ;;  %v1690_v37 = vpop.xlane.xlu0 %1689 }
 0x4a9   :  { %v1720_v13 = vmul.f32 0.03125, %v1690_v37 }
 0x4aa   :  { %v1730_v27 = vmul.f32 %v1722_v29, %v1722_v29  ;;  %v1742_v55 = vsub.f32 %v3317_v2, %v1722_v29  ;;  %v1922_v2 = vmul.f32 0.03125, %v1894_v0 }
 0x4ab   :  { %v1699_v24 = vpop.xlane.xlu1 %1698  ;;  %v1728_v50 = vmul.f32 %v1720_v13, %v1720_v13 }
 0x4ac   :  { %v1693_v33 = vpop.xlane.xlu0 %1692  ;;  %v1930_v10 = vmul.f32 %v1922_v2, %v1922_v2  ;;  %v1723_v17 = vmul.f32 0.03125, %v1699_v24 }
 0x4ad   :  { %v1721_v0 = vmul.f32 0.03125, %v1693_v33  ;;  %v1740_v33 = vsub.f32 %v3319_v4, %v1720_v13 }
 0x4ae   :  { %v1934_v12 = vsub.f32 %v1926_v57, %v1930_v10  ;;  %v1731_v29 = vmul.f32 %v1723_v17, %v1723_v17 }
 0x4af   :  { %v1716_v26 = vpop.xlane.xlu1 %1715  ;;  %v1729_v30 = vmul.f32 %v1721_v0, %v1721_v0 }
 0x4b0   :  { %v1726_v28 = vmul.f32 0.03125, %v1716_v26  ;;  %v1938_v15 = vmax.f32 %v1934_v12, 0.0 }
 0x4b2   :  { %v1734_v38 = vsub.f32 %v1726_v28, %v1730_v27  ;;  %v1946_v20 = vadd.f32 1e-05, %v1938_v15 }
 0x4b3   :  { %v3425_v46 = vpop.permute.xlu1 %1978 }
 0x4b4   :  { %v1738_v31 = vmax.f32 %v1734_v38, 0.0  ;;  %v3428_v54 = vpop.permute.xlu0 %1777 }
 0x4b6   :  { %v1746_v47 = vadd.f32 1e-05, %v1738_v31 }
 0x4b7   :  { %v2002_v59 = vpop.permute.xlu1 %2001 }
 0x4b8   :  { %2810 = vrsqrt.f32 %v1746_v47  ;;  %v2011_v62 = vadd.f32 %v2002_v59, %v1983_v60  ;;  %v1801_v1 = vpop.permute.xlu0 %1800  ;;  %v2009_v59 = vadd.f32 %v3387_v41, %v3423_v22 }
 0x4b9   :  { %2812 = vrsqrt.f32 %v1946_v20  ;;  %v2135_v20 = vld [vmem:[%s3499_s12] sm:$0xff] }
 0x4ba   :  { %v2015_v36 = vmul.f32 %v3435_v5, %v2011_v62  ;;  %v1743_v62 = vsub.f32 %v3321_v6, %v1723_v17  ;;  %v2013_v10 = vmul.f32 %v3435_v5, %v2009_v59  ;;  %2647 = vmatprep.mubr.msk.f32.mxu0 %vm984_vm5, %v2135_v20 }
 0x4bc   :  { %v1806_v57 = vpop.permute.xlu0 %1805 }
 0x4c2   :  { %v2811_v58 = vpop.eup %2810 }
 0x4c3   :  { %v1754_v61 = vmul.f32 %v2811_v58, %v1742_v55  ;;  %v2813_v49 = vpop.eup %2812  ;;  %v1942_v55 = vsub.f32 %v3296_v44, %v1922_v2  ;;  %v1741_v2 = vsub.f32 %v3325_v9, %v1721_v0 }
 0x4c5   :  { %v1782_v63 = vmul.f32 %v3389_v42, %v1754_v61  ;;  %v1928_v42 = vmul.f32 0.03125, %v1920_v25  ;;  %v1954_v61 = vmul.f32 %v2813_v49, %v1942_v55 }
 0x4c7   :  { %v1810_v3 = vadd.f32 %v1801_v1, %v1782_v63  ;;  %v1936_v14 = vsub.f32 %v1928_v42, %v1932_v48  ;;  %v1982_v44 = vmul.f32 %v3377_v19, %v1954_v61 }
 0x4c9   :  { %v1814_v7 = vmul.f32 %v3435_v5, %v1810_v3  ;;  %v1940_v52 = vmax.f32 %v1936_v14, 0.0  ;;  %v1944_v3 = vsub.f32 %v3289_v40, %v1924_v11  ;;  %v2010_v19 = vadd.f32 %v3391_v43, %v1982_v44 }
 0x4cb   :  { %v3439_v8 = vadd.f32 %v2015_v36, %v1814_v7  ;;  %v1948_v28 = vadd.f32 1e-05, %v1940_v52 }
 0x4cd   :  { %v2023_v17 = vmax.f32 %v3439_v8, 0.0 }
 0x4cf   :  { %v2027_v52 = vmul.f32 %v3435_v5, %v2023_v17 }
 0x4e8   :  { %v1710_v16 = vpop.xlane.xlu1 %1709 }
 0x4e9   :  { %v1724_v18 = vmul.f32 0.03125, %v1710_v16  ;;  %v2014_v16 = vmul.f32 %v3435_v5, %v2010_v19 }
 0x4eb   :  { %v1732_v21 = vsub.f32 %v1724_v18, %v1728_v50 }
 0x4ec   :  { %v1719_v23 = vpop.xlane.xlu1 %1718 }
 0x4ed   :  { %v1736_v56 = vmax.f32 %v1732_v21, 0.0  ;;  %v1727_v26 = vmul.f32 0.03125, %v1719_v23 }
 0x4ef   :  { %v1744_v27 = vadd.f32 1e-05, %v1736_v56  ;;  %v1735_v53 = vsub.f32 %v1727_v26, %v1731_v29 }
 0x4f0   :  { %v1713_v25 = vpop.xlane.xlu1 %1712 }
 0x4f1   :  { %2814 = vrsqrt.f32 %v1744_v27  ;;  %v1739_v38 = vmax.f32 %v1735_v53, 0.0  ;;  %v1725_v31 = vmul.f32 0.03125, %v1713_v25 }
 0x4f2   :  { %2816 = vrsqrt.f32 %v1948_v28  ;;  %v2142_v28 = vpop.permute.xlu0 %2141 }
 0x4f3   :  { %v1747_v37 = vadd.f32 1e-05, %v1739_v38  ;;  %v1733_v24 = vsub.f32 %v1725_v31, %v1729_v30 }
 0x4f5   :  { %2818 = vrsqrt.f32 %v1747_v37  ;;  %v1737_v47 = vmax.f32 %v1733_v24, 0.0 }
 0x4f7   :  { %v1745_v45 = vadd.f32 1e-05, %v1737_v47 }
 0x4f9   :  { %2820 = vrsqrt.f32 %v1745_v45 }
 0x4fb   :  { %v2815_v51 = vpop.eup %2814 }
 0x4fc   :  { %v1752_v58 = vmul.f32 %v2815_v51, %v1740_v33  ;;  %v2817_v60 = vpop.eup %2816 }
 0x4fd   :  { %v1956_v4 = vmul.f32 %v2817_v60, %v1944_v3 }
 0x4fe   :  { %v1780_v63 = vmul.f32 %v3371_v32, %v1752_v58  ;;  %v2007_v32 = vpop.permute.xlu1 %2006 }
 0x4ff   :  { %v2819_v1 = vpop.eup %2818  ;;  %v1984_v48 = vmul.f32 %v3425_v46, %v1956_v4 }
 0x500   :  { %v1755_v36 = vmul.f32 %v2819_v1, %v1743_v62  ;;  %v1808_v7 = vadd.f32 %v3375_v35, %v1780_v63 }
 0x501   :  { %v2012_v12 = vadd.f32 %v2007_v32, %v1984_v48 }
 0x502   :  { %v1783_v41 = vmul.f32 %v3428_v54, %v1755_v36  ;;  %v1812_v22 = vmul.f32 %v3435_v5, %v1808_v7  ;;  %v2147_v27 = vpop.permute.xlu1 %2146 }
 0x503   :  { %v2821_v6 = vpop.eup %2820  ;;  %v2016_v15 = vmul.f32 %v3435_v5, %v2012_v12 }
 0x504   :  { %v1753_v40 = vmul.f32 %v2821_v6, %v1741_v2  ;;  %v1811_v11 = vadd.f32 %v1806_v57, %v1783_v41  ;;  %v2017_v42 = vadd.f32 %v2013_v10, %v1812_v22 }
 0x506   :  { %v1781_v35 = vmul.f32 %v3373_v34, %v1753_v40  ;;  %v2021_v13 = vmax.f32 %v2017_v42, 0.0  ;;  %v1815_v9 = vmul.f32 %v3435_v5, %v1811_v11 }
 0x508   :  { %v2025_v54 = vmul.f32 %v3435_v5, %v2021_v13  ;;  %v1809_v14 = vadd.f32 %v3382_v39, %v1781_v35  ;;  %v2020_v50 = vadd.f32 %v2016_v15, %v1815_v9 }
 0x50a   :  { %2633 = vmatprep.mubr.msk.f32.mxu1 %vm788_vm4, %v2025_v54  ;;  %v1813_v46 = vmul.f32 %v3435_v5, %v1809_v14  ;;  %v2024_v43 = vmax.f32 %v2020_v50, 0.0 }
 0x50c   :  { %v2018_v34 = vadd.f32 %v2014_v16, %v1813_v46  ;;  %v2028_v39 = vmul.f32 %v3435_v5, %v2024_v43 }
 0x50e   :  { %v2022_v18 = vmax.f32 %v2018_v34, 0.0 }
 0x510   :  { %v2026_v21 = vmul.f32 %v3435_v5, %v2022_v18  ;;  %v2136_v5 = vld [vmem:[%s3499_s12 + $0x8] sm:$0x3] }
 0x512   :  { %2634 = vmatmul.mubr.msk.f32.vlgmr.msra.gmra.mrb[8].mxu1 %vm788_vm4, %v2026_v21 }
 0x513   :  { %2636 = vmatprep.mubr.msk.f32.mxu1 %vm788_vm4, %v2027_v52 }
 0x516   :  { %2637 = vmatmul.mubr.msk.f32.gmra.mrb[10].mxu1 %vm788_vm4, %v2028_v39 }
 0x5e5   :  { %v2635_v8 = vpop.f32.mrb[8].mxu1 }
 0x5e6   :  { %v2116_v23 = vpop.f32.mrb[9].mxu1 }
 0x5e7   :  { %v2666_v29 = vpack.c.bf16 %v2635_v8, %v2116_v23 }
 0x5e9   :  { %v2638_v0 = vpop.f32.mrb[10].mxu1  ;;  %2667 = vmatprep.subr.bf16.mxu0 %v2666_v29 }
 0x5ea   :  { %v2126_v56 = vpop.f32.mrb[11].mxu1  ;;  %2669 = vmatpush3.bf16.msra.mxu0 %v2666_v29 }
 0x5eb   :  { %v2670_v26 = vpack.c.bf16 %v2638_v0, %v2126_v56 }
 0x5ed   :  { %2671 = vmatprep.subr.bf16.mxu0 %v2670_v26 }
 0x5ee   :  { %2673 = vmatpush3.bf16.msra.mxu0 %v2670_v26 }
 0x5f1   :  { %2648 = vmatmul.mubr.msk.f32.vlgmr.msra.gmra.mrb[12].mxu0 %vm984_vm5, %v2136_v5 }
 0x6c4   :  { %v2649_v53 = vpop.f32.mrb[12].mxu0 }
 0x6c5   :  { %v2227_v25 = vadd.f32 %v2649_v53, %v2147_v27  ;;  %v2221_v30 = vpop.f32.mrb[13].mxu0 }
 0x6c6   :  { %v2222_v38 = vadd.f32 %v2221_v30, %v2142_v28 }
 0x6c7   :  { %2233 = vst.msk [vmem:[%s3500_s14 + $0x8] sm:$0x3] %vm2232_vm7, %v2227_v25 }
 0x6c8   :  { %2231 = vst.msk [vmem:[%s3500_s14] sm:$0xff] %vm2230_vm8, %v2222_v38 }

</bundles_post_ra>
